<compile_context>
chip_gen: v6e
topology: v6e:2x2x1
jax: 0.10.0
libtpu: 0.0.40
codegen_flags: <defaults>
</compile_context>

<pallas_src>
import jax
import jax.numpy as jnp
from jax import lax
from jax.experimental import pallas as pl
from jax.experimental.pallas import tpu as pltpu

LATENT = 20
C1 = 64            # conv1 out_channels (logical)
CP = 128           # conv1 out channels / conv2 in channels, padded to lanes
C2 = 128           # conv2 out_channels (= 2 * C1, already lane-dense)
CIN_PAD = 8        # conv1 in channels padded 3 -> 8
K1 = 4 * 4 * CIN_PAD     # conv1 GEMM contraction depth = 128 (lane-dense)
NPOS2 = 49         # 7*7 conv2 output positions
BLK = 56           # 49 conv1 parity-block rows padded to a sublane multiple
PAD_ROWS = 8       # zero-row margin at the top of the h1 scratch
SCR_ROWS = 72      # 8 + 49 + 15 (covers max read row 64, multiple of 8)

_DELTA = (-1, 0, 0, 1)   # window shift per kernel tap index (kh or kw = 0..3)


# ---------------------------------------------------------------------------
# Fused conv1 + conv2 kernel (one grid step per sample).
# ---------------------------------------------------------------------------
def _fused_conv_kernel(cols1_ref, w1_ref, b1_ref, w2_ref, b2_ref,
                       h2_ref, h1s_ref):
    # ---- conv1: one [224,128] @ [128,128] MXU GEMM + bias + ReLU ----------
    acc1 = jnp.dot(cols1_ref[...], w1_ref[...],
                   preferred_element_type=jnp.float32)
    h1 = jnp.maximum(acc1 + b1_ref[...], 0.0).astype(jnp.bfloat16)

    # ---- scatter the 4 parity blocks into a zero-bordered VMEM scratch ----
    # (zero every step: with a "parallel" batch grid each core owns its own
    #  scratch, so a program_id==0 init would leave one core uninitialized)
    h1s_ref[...] = jnp.zeros((4, SCR_ROWS, CP), jnp.bfloat16)
    for q in range(4):
        h1s_ref[q, PAD_ROWS:PAD_ROWS + NPOS2, :] = (
            h1[q * BLK:q * BLK + NPOS2, :])

    # ---- conv2: 16 accumulated taps, each [49,128] @ [128,128] ------------
    ow = lax.broadcasted_iota(jnp.int32, (NPOS2, CP), 0) % 7
    mask_l = ow != 0         # for dw == -1 (zero rows whose ow == 0)
    mask_r = ow != 6         # for dw == +1 (zero rows whose ow == 6)

    acc2 = jnp.zeros((NPOS2, C2), jnp.float32)
    for kh in range(4):
        for kw in range(4):
            q = ((kh + 1) % 2) * 2 + ((kw + 1) % 2)          # parity block
            start = PAD_ROWS + 7 * _DELTA[kh] + _DELTA[kw]    # static
            a = h1s_ref[q, start:start + NPOS2, :]
            if _DELTA[kw] == -1:
                a = jnp.where(mask_l, a, jnp.zeros_like(a))
            elif _DELTA[kw] == 1:
                a = jnp.where(mask_r, a, jnp.zeros_like(a))
            acc2 += jnp.dot(a, w2_ref[kh * 4 + kw],
                            preferred_element_type=jnp.float32)

    h2_ref[...] = jnp.maximum(acc2 + b2_ref[...], 0.0).astype(h2_ref.dtype)


def fused_conv(cols1, w1m, b1, w2t, b2):
    B = cols1.shape[0]
    return pl.pallas_call(
        _fused_conv_kernel,
        out_shape=jax.ShapeDtypeStruct((B, NPOS2, C2), jnp.bfloat16),
        grid=(B,),
        in_specs=[
            pl.BlockSpec((None, 4 * BLK, K1), lambda b: (b, 0, 0)),   # cols1
            pl.BlockSpec((K1, CP), lambda b: (0, 0)),                 # w1
            pl.BlockSpec((1, CP), lambda b: (0, 0)),                  # b1 (f32)
            pl.BlockSpec((16, CP, C2), lambda b: (0, 0, 0)),          # w2 taps
            pl.BlockSpec((1, C2), lambda b: (0, 0)),                  # b2 (f32)
        ],
        out_specs=pl.BlockSpec((None, NPOS2, C2), lambda b: (b, 0, 0)),
        scratch_shapes=[pltpu.VMEM((4, SCR_ROWS, CP), jnp.bfloat16)],
        compiler_params=pltpu.CompilerParams(
            dimension_semantics=("parallel",)),
    )(cols1, w1m, b1, w2t, b2)


# ---------------------------------------------------------------------------
# Batched FC kernel: [B, 6272] @ [6272, 128] + bias (mu & logvar fused).
# ---------------------------------------------------------------------------
def _fc_kernel(a_ref, w_ref, b_ref, o_ref):
    acc = jnp.dot(a_ref[...], w_ref[...], preferred_element_type=jnp.float32)
    o_ref[...] = acc + b_ref[...]


def fc(flat_bf16, wfc, bfc):
    B, F = flat_bf16.shape
    N = wfc.shape[1]
    return pl.pallas_call(
        _fc_kernel,
        out_shape=jax.ShapeDtypeStruct((B, N), jnp.float32),
        grid=(1,),
        in_specs=[
            pl.BlockSpec((B, F), lambda i: (0, 0)),
            pl.BlockSpec((F, N), lambda i: (0, 0)),
            pl.BlockSpec((1, N), lambda i: (0, 0)),
        ],
        out_specs=pl.BlockSpec((B, N), lambda i: (0, 0)),
        compiler_params=pltpu.CompilerParams(
            dimension_semantics=("arbitrary",)),
    )(flat_bf16, wfc, bfc)


# ---------------------------------------------------------------------------
# XLA glue: conv1 im2col (bf16, channels padded 3->8, rows ordered as the 4
# row/col-parity blocks of the 14x14 conv1 output, each padded 49 -> 56 rows).
# ---------------------------------------------------------------------------
def build_cols1(x_nchw):
    B = x_nchw.shape[0]
    x = x_nchw.astype(jnp.bfloat16).transpose(0, 2, 3, 1)           # [B,28,28,3]
    x = jnp.pad(x, ((0, 0), (1, 1), (1, 1), (0, CIN_PAD - 3)))      # [B,30,30,8]
    taps = []
    for i in range(4):
        for j in range(4):
            taps.append(x[:, i:i + 27:2, j:j + 27:2, :])             # [B,14,14,8]
    cols = jnp.concatenate(taps, axis=-1)                            # [B,14,14,128]
    blocks = []
    for hp in range(2):          # parity of conv1 output row
        for wp in range(2):      # parity of conv1 output col
            blk = cols[:, hp::2, wp::2, :].reshape(B, NPOS2, K1)     # [B,49,128]
            blocks.append(jnp.pad(blk, ((0, 0), (0, BLK - NPOS2), (0, 0))))
    return jnp.concatenate(blocks, axis=1)                           # [B,224,128]


# ---------------------------------------------------------------------------
# One-time parameter preparation (outside the forward hot path).
# ---------------------------------------------------------------------------
def prepare_params(p):
    # conv1: [64,3,4,4] -> (kh,kw,cin_pad=8)=128 rows x cout padded to 128
    w1 = jnp.pad(p["w1"], ((0, 0), (0, CIN_PAD - 3), (0, 0), (0, 0)))
    w1m = w1.transpose(2, 3, 1, 0).reshape(K1, C1)                   # [128,64]
    w1m = jnp.pad(w1m, ((0, 0), (0, CP - C1)))                       # [128,128]
    b1 = jnp.pad(p["b1"], (0, CP - C1)).reshape(1, CP)

    # conv2: [128,64,4,4] -> 16 taps of [cin_pad=128, cout=128]
    w2 = jnp.pad(p["w2"], ((0, 0), (0, CP - C1), (0, 0), (0, 0)))    # [128,128,4,4]
    w2t = w2.transpose(2, 3, 1, 0).reshape(16, CP, C2)               # [16,128,128]
    b2 = p["b2"].reshape(1, C2)

    # FC: permute torch NCHW flatten (c,h,w) -> NHWC flatten (h,w,c); fuse
    # mu & logvar and pad the output dim to 128 lanes.
    def perm(w):                                                     # [L, 6272]
        return w.reshape(LATENT, C2, 7, 7).transpose(0, 2, 3, 1).reshape(LATENT, -1)

    wfc = jnp.concatenate([perm(p["w_mu"]), perm(p["w_lv"])], axis=0).T  # [6272,40]
    wfc = jnp.pad(wfc, ((0, 0), (0, 128 - 2 * LATENT)))                   # [6272,128]
    bfc = jnp.concatenate(
        [p["b_mu"], p["b_lv"], jnp.zeros((128 - 2 * LATENT,), jnp.float32)]
    ).reshape(1, 128)

    return {"w1m": w1m.astype(jnp.bfloat16), "b1": b1,
            "w2t": w2t.astype(jnp.bfloat16), "b2": b2,
            "wfc": wfc.astype(jnp.bfloat16), "bfc": bfc}


def encoder_forward(x_nchw, prep):
    B = x_nchw.shape[0]
    cols1 = build_cols1(x_nchw)                                       # [B,224,128] bf16
    h2 = fused_conv(cols1, prep["w1m"], prep["b1"],
                    prep["w2t"], prep["b2"])                          # [B,49,128] bf16
    flat = h2.reshape(B, NPOS2 * C2)                                  # free bitcast
    out = fc(flat, prep["wfc"], prep["bfc"])                          # [B,128] f32
    return out[:, :LATENT], out[:, LATENT:2 * LATENT]


# ---------------------------------------------------------------------------
# Params / reference (PyTorch-equivalent semantics, f32 throughout).
# ---------------------------------------------------------------------------
def init_params(key):
    c, latent = C1, LATENT
    ks = jax.random.split(key, 8)

    def u(k, shape, fan_in):
        bound = 1.0 / jnp.sqrt(jnp.float32(fan_in))
        return jax.random.uniform(k, shape, jnp.float32, -bound, bound)

    fc_in = 2 * c * 7 * 7
    return {
        "w1": u(ks[0], (c, 3, 4, 4), 3 * 4 * 4),
        "b1": u(ks[1], (c,), 3 * 4 * 4),
        "w2": u(ks[2], (2 * c, c, 4, 4), c * 4 * 4),
        "b2": u(ks[3], (2 * c,), c * 4 * 4),
        "w_mu": u(ks[4], (latent, fc_in), fc_in),
        "b_mu": u(ks[5], (latent,), fc_in),
        "w_lv": u(ks[6], (latent, fc_in), fc_in),
        "b_lv": u(ks[7], (latent,), fc_in),
    }


def reference_forward(x, p):
    def conv(x, w, b):
        y = lax.conv_general_dilated(
            x, w, (2, 2), ((1, 1), (1, 1)),
            dimension_numbers=("NCHW", "OIHW", "NCHW"))
        return jnp.maximum(y + b[None, :, None, None], 0.0)

    x1 = conv(x, p["w1"], p["b1"])
    x2 = conv(x1, p["w2"], p["b2"])
    flat = x2.reshape(x.shape[0], -1)
    return flat @ p["w_mu"].T + p["b_mu"], flat @ p["w_lv"].T + p["b_lv"]


if __name__ == "__main__":
    key = jax.random.PRNGKey(0)
    kx, kp = jax.random.split(key)
    x = jax.random.normal(kx, (2, 3, 28, 28), jnp.float32)  # NCHW, 28x28 -> 7x7
    params = init_params(kp)
    prep = prepare_params(params)

    fwd = jax.jit(encoder_forward)
    mu, logvar = jax.block_until_ready(fwd(x, prep))

    ref_mu, ref_lv = reference_forward(x, params)
    assert mu.shape == (2, LATENT) and logvar.shape == (2, LATENT)
    # Tolerance reflects bf16 MXU inputs (f32 accumulation / bias / ReLU);
    # any indexing/permutation bug would produce O(0.1+) errors.
    assert jnp.allclose(mu, ref_mu, atol=2e-2, rtol=2e-2)
    assert jnp.allclose(logvar, ref_lv, atol=2e-2, rtol=2e-2)
    print("KERNEL_OK")
</pallas_src>

<mosaic_0001>
module attributes {stable_mosaic.version = 11 : i64} {
  func.func @_fused_conv_kernel(%arg0: i32, %arg1: memref<1x224x128xbf16, #tpu.memory_space<vmem>>, %arg2: memref<128x128xbf16, #tpu.memory_space<vmem>>, %arg3: memref<1x128xf32, #tpu.memory_space<vmem>>, %arg4: memref<16x128x128xbf16, #tpu.memory_space<vmem>>, %arg5: memref<1x128xf32, #tpu.memory_space<vmem>>, %arg6: memref<1x49x128xbf16, #tpu.memory_space<vmem>>, %arg7: memref<4x72x128xbf16, #tpu.memory_space<vmem>>) attributes {dimension_semantics = [#tpu.dimension_semantics<parallel>], iteration_bounds = array<i64: 2>, scalar_prefetch = 0 : i64, scratch_operands = 1 : i64, tpu.core_type = #tpu.core_type<tc>, window_params = [{transform_indices = @transform_0, window_bounds = array<i64: 1, 224, 128>}, {pipeline_mode = #tpu.pipeline_mode<synchronous>, transform_indices = @transform_1, window_bounds = array<i64: 128, 128>}, {pipeline_mode = #tpu.pipeline_mode<synchronous>, transform_indices = @transform_2, window_bounds = array<i64: 1, 128>}, {pipeline_mode = #tpu.pipeline_mode<synchronous>, transform_indices = @transform_3, window_bounds = array<i64: 16, 128, 128>}, {pipeline_mode = #tpu.pipeline_mode<synchronous>, transform_indices = @transform_4, window_bounds = array<i64: 1, 128>}, {transform_indices = @transform_5, window_bounds = array<i64: 1, 49, 128>}]} {
    %c0 = arith.constant 0 : index
    %c0_0 = arith.constant 0 : index
    %c0_1 = arith.constant 0 : index
    %0 = vector.load %arg1[%c0, %c0_0, %c0_1] : memref<1x224x128xbf16, #tpu.memory_space<vmem>>, vector<1x224x128xbf16>
    %1 = vector.shape_cast %0 : vector<1x224x128xbf16> to vector<224x128xbf16>
    %c0_2 = arith.constant 0 : index
    %c0_3 = arith.constant 0 : index
    %2 = vector.load %arg2[%c0_2, %c0_3] : memref<128x128xbf16, #tpu.memory_space<vmem>>, vector<128x128xbf16>
    %cst = arith.constant dense<0.000000e+00> : vector<224x128xf32>
    %3 = tpu.matmul %1, %2, %cst {dimension_numbers = #tpu.dot_dimension_numbers<[1], [0], [0], [1], [0, 0, 1, 1], [], []>} : vector<224x128xbf16>, vector<128x128xbf16>, vector<224x128xf32> -> vector<224x128xf32>
    %c0_4 = arith.constant 0 : index
    %c0_5 = arith.constant 0 : index
    %4 = vector.load %arg3[%c0_4, %c0_5] : memref<1x128xf32, #tpu.memory_space<vmem>>, vector<1x128xf32>
    %5 = vector.broadcast %4 : vector<1x128xf32> to vector<224x128xf32>
    %6 = arith.addf %3, %5 : vector<224x128xf32>
    %cst_6 = arith.constant 0.000000e+00 : f32
    %7 = vector.broadcast %cst_6 : f32 to vector<224x128xf32>
    %8 = arith.maximumf %6, %7 : vector<224x128xf32>
    %9 = arith.truncf %8 : vector<224x128xf32> to vector<224x128xbf16>
    %cst_7 = arith.constant 0.000000e+00 : bf16
    %10 = vector.broadcast %cst_7 : bf16 to vector<4x72x128xbf16>
    %c0_8 = arith.constant 0 : index
    %c0_9 = arith.constant 0 : index
    %c0_10 = arith.constant 0 : index
    %11 = vector.load %arg7[%c0_8, %c0_9, %c0_10] : memref<4x72x128xbf16, #tpu.memory_space<vmem>>, vector<4x72x128xbf16>
    tpu.vector_store %arg7[%c0_8, %c0_9, %c0_10], %10 {strides = array<i32>} : memref<4x72x128xbf16, #tpu.memory_space<vmem>>, vector<4x72x128xbf16>,
    %12 = vector.extract_strided_slice %9 {offsets = [0, 0], sizes = [49, 128], strides = [1, 1]} : vector<224x128xbf16> to vector<49x128xbf16>
    %c0_11 = arith.constant 0 : index
    %c8 = arith.constant 8 : index
    %c0_12 = arith.constant 0 : index
    %13 = vector.load %arg7[%c0_11, %c8, %c0_12] : memref<4x72x128xbf16, #tpu.memory_space<vmem>>, vector<1x49x128xbf16>
    %14 = vector.shape_cast %13 : vector<1x49x128xbf16> to vector<49x128xbf16>
    %15 = vector.shape_cast %12 : vector<49x128xbf16> to vector<1x49x128xbf16>
    tpu.vector_store %arg7[%c0_11, %c8, %c0_12], %15 {strides = array<i32>} : memref<4x72x128xbf16, #tpu.memory_space<vmem>>, vector<1x49x128xbf16>,
    %16 = vector.extract_strided_slice %9 {offsets = [56, 0], sizes = [49, 128], strides = [1, 1]} : vector<224x128xbf16> to vector<49x128xbf16>
    %c1 = arith.constant 1 : index
    %c8_13 = arith.constant 8 : index
    %c0_14 = arith.constant 0 : index
    %17 = vector.load %arg7[%c1, %c8_13, %c0_14] : memref<4x72x128xbf16, #tpu.memory_space<vmem>>, vector<1x49x128xbf16>
    %18 = vector.shape_cast %17 : vector<1x49x128xbf16> to vector<49x128xbf16>
    %19 = vector.shape_cast %16 : vector<49x128xbf16> to vector<1x49x128xbf16>
    tpu.vector_store %arg7[%c1, %c8_13, %c0_14], %19 {strides = array<i32>} : memref<4x72x128xbf16, #tpu.memory_space<vmem>>, vector<1x49x128xbf16>,
    %20 = vector.extract_strided_slice %9 {offsets = [112, 0], sizes = [49, 128], strides = [1, 1]} : vector<224x128xbf16> to vector<49x128xbf16>
    %c2 = arith.constant 2 : index
    %c8_15 = arith.constant 8 : index
    %c0_16 = arith.constant 0 : index
    %21 = vector.load %arg7[%c2, %c8_15, %c0_16] : memref<4x72x128xbf16, #tpu.memory_space<vmem>>, vector<1x49x128xbf16>
    %22 = vector.shape_cast %21 : vector<1x49x128xbf16> to vector<49x128xbf16>
    %23 = vector.shape_cast %20 : vector<49x128xbf16> to vector<1x49x128xbf16>
    tpu.vector_store %arg7[%c2, %c8_15, %c0_16], %23 {strides = array<i32>} : memref<4x72x128xbf16, #tpu.memory_space<vmem>>, vector<1x49x128xbf16>,
    %24 = vector.extract_strided_slice %9 {offsets = [168, 0], sizes = [49, 128], strides = [1, 1]} : vector<224x128xbf16> to vector<49x128xbf16>
    %c3 = arith.constant 3 : index
    %c8_17 = arith.constant 8 : index
    %c0_18 = arith.constant 0 : index
    %25 = vector.load %arg7[%c3, %c8_17, %c0_18] : memref<4x72x128xbf16, #tpu.memory_space<vmem>>, vector<1x49x128xbf16>
    %26 = vector.shape_cast %25 : vector<1x49x128xbf16> to vector<49x128xbf16>
    %27 = vector.shape_cast %24 : vector<49x128xbf16> to vector<1x49x128xbf16>
    tpu.vector_store %arg7[%c3, %c8_17, %c0_18], %27 {strides = array<i32>} : memref<4x72x128xbf16, #tpu.memory_space<vmem>>, vector<1x49x128xbf16>,
    %28 = tpu.iota {dimensions = array<i32: 0>} : vector<49x128xi32>
    %c7_i32 = arith.constant 7 : i32
    %c0_i32 = arith.constant 0 : i32
    %29 = arith.cmpi eq, %c7_i32, %c0_i32 : i32
    %c1_i32 = arith.constant 1 : i32
    %30 = arith.select %29, %c1_i32, %c7_i32 : i32
    %31 = vector.broadcast %30 : i32 to vector<49x128xi32>
    %32 = arith.remsi %28, %31 : vector<49x128xi32>
    %c0_i32_19 = arith.constant 0 : i32
    %33 = vector.broadcast %c0_i32_19 : i32 to vector<49x128xi32>
    %34 = arith.cmpi ne, %32, %33 : vector<49x128xi32>
    %c0_i32_20 = arith.constant 0 : i32
    %35 = vector.broadcast %c0_i32_20 : i32 to vector<49x128xi32>
    %36 = arith.cmpi slt, %32, %35 : vector<49x128xi32>
    %c0_i32_21 = arith.constant 0 : i32
    %37 = arith.cmpi slt, %30, %c0_i32_21 : i32
    %38 = vector.broadcast %37 : i1 to vector<49x128xi1>
    %39 = vector.broadcast %38 : vector<49x128xi1> to vector<49x128xi1>
    %40 = arith.xori %36, %39 : vector<49x128xi1>
    %41 = arith.andi %40, %34 : vector<49x128xi1>
    %42 = vector.broadcast %30 : i32 to vector<49x128xi32>
    %43 = arith.addi %32, %42 : vector<49x128xi32>
    %44 = arith.select %41, %43, %32 : vector<49x128xi1>, vector<49x128xi32>
    %c0_i32_22 = arith.constant 0 : i32
    %45 = vector.broadcast %c0_i32_22 : i32 to vector<49x128xi32>
    %46 = arith.cmpi ne, %44, %45 : vector<49x128xi32>
    %c6_i32 = arith.constant 6 : i32
    %47 = vector.broadcast %c6_i32 : i32 to vector<49x128xi32>
    %48 = arith.cmpi ne, %44, %47 : vector<49x128xi32>
    %cst_23 = arith.constant 0.000000e+00 : f32
    %49 = vector.broadcast %cst_23 : f32 to vector<49x128xf32>
    %c3_24 = arith.constant 3 : index
    %c0_25 = arith.constant 0 : index
    %c0_26 = arith.constant 0 : index
    %50 = vector.load %arg7[%c3_24, %c0_25, %c0_26] : memref<4x72x128xbf16, #tpu.memory_space<vmem>>, vector<1x49x128xbf16>
    %51 = vector.shape_cast %50 : vector<1x49x128xbf16> to vector<49x128xbf16>
    %cst_27 = arith.constant 0.000000e+00 : bf16
    %52 = vector.broadcast %cst_27 : bf16 to vector<49x128xbf16>
    %53 = arith.select %46, %51, %52 : vector<49x128xi1>, vector<49x128xbf16>
    %c0_28 = arith.constant 0 : index
    %c0_29 = arith.constant 0 : index
    %c0_30 = arith.constant 0 : index
    %54 = vector.load %arg4[%c0_28, %c0_29, %c0_30] : memref<16x128x128xbf16, #tpu.memory_space<vmem>>, vector<1x128x128xbf16>
    %55 = vector.shape_cast %54 : vector<1x128x128xbf16> to vector<128x128xbf16>
    %cst_31 = arith.constant dense<0.000000e+00> : vector<49x128xf32>
    %56 = tpu.matmul %53, %55, %cst_31 {dimension_numbers = #tpu.dot_dimension_numbers<[1], [0], [0], [1], [0, 0, 1, 1], [], []>} : vector<49x128xbf16>, vector<128x128xbf16>, vector<49x128xf32> -> vector<49x128xf32>
    %57 = arith.addf %49, %56 : vector<49x128xf32>
    %c2_32 = arith.constant 2 : index
    %c1_33 = arith.constant 1 : index
    %c0_34 = arith.constant 0 : index
    %58 = vector.load %arg7[%c2_32, %c1_33, %c0_34] : memref<4x72x128xbf16, #tpu.memory_space<vmem>>, vector<1x49x128xbf16>
    %59 = vector.shape_cast %58 : vector<1x49x128xbf16> to vector<49x128xbf16>
    %c1_35 = arith.constant 1 : index
    %c0_36 = arith.constant 0 : index
    %c0_37 = arith.constant 0 : index
    %60 = vector.load %arg4[%c1_35, %c0_36, %c0_37] : memref<16x128x128xbf16, #tpu.memory_space<vmem>>, vector<1x128x128xbf16>
    %61 = vector.shape_cast %60 : vector<1x128x128xbf16> to vector<128x128xbf16>
    %cst_38 = arith.constant dense<0.000000e+00> : vector<49x128xf32>
    %62 = tpu.matmul %59, %61, %cst_38 {dimension_numbers = #tpu.dot_dimension_numbers<[1], [0], [0], [1], [0, 0, 1, 1], [], []>} : vector<49x128xbf16>, vector<128x128xbf16>, vector<49x128xf32> -> vector<49x128xf32>
    %63 = arith.addf %57, %62 : vector<49x128xf32>
    %c3_39 = arith.constant 3 : index
    %c1_40 = arith.constant 1 : index
    %c0_41 = arith.constant 0 : index
    %64 = vector.load %arg7[%c3_39, %c1_40, %c0_41] : memref<4x72x128xbf16, #tpu.memory_space<vmem>>, vector<1x49x128xbf16>
    %65 = vector.shape_cast %64 : vector<1x49x128xbf16> to vector<49x128xbf16>
    %c2_42 = arith.constant 2 : index
    %c0_43 = arith.constant 0 : index
    %c0_44 = arith.constant 0 : index
    %66 = vector.load %arg4[%c2_42, %c0_43, %c0_44] : memref<16x128x128xbf16, #tpu.memory_space<vmem>>, vector<1x128x128xbf16>
    %67 = vector.shape_cast %66 : vector<1x128x128xbf16> to vector<128x128xbf16>
    %cst_45 = arith.constant dense<0.000000e+00> : vector<49x128xf32>
    %68 = tpu.matmul %65, %67, %cst_45 {dimension_numbers = #tpu.dot_dimension_numbers<[1], [0], [0], [1], [0, 0, 1, 1], [], []>} : vector<49x128xbf16>, vector<128x128xbf16>, vector<49x128xf32> -> vector<49x128xf32>
    %69 = arith.addf %63, %68 : vector<49x128xf32>
    %c2_46 = arith.constant 2 : index
    %c2_47 = arith.constant 2 : index
    %c0_48 = arith.constant 0 : index
    %70 = vector.load %arg7[%c2_46, %c2_47, %c0_48] : memref<4x72x128xbf16, #tpu.memory_space<vmem>>, vector<1x49x128xbf16>
    %71 = vector.shape_cast %70 : vector<1x49x128xbf16> to vector<49x128xbf16>
    %cst_49 = arith.constant 0.000000e+00 : bf16
    %72 = vector.broadcast %cst_49 : bf16 to vector<49x128xbf16>
    %73 = arith.select %48, %71, %72 : vector<49x128xi1>, vector<49x128xbf16>
    %c3_50 = arith.constant 3 : index
    %c0_51 = arith.constant 0 : index
    %c0_52 = arith.constant 0 : index
    %74 = vector.load %arg4[%c3_50, %c0_51, %c0_52] : memref<16x128x128xbf16, #tpu.memory_space<vmem>>, vector<1x128x128xbf16>
    %75 = vector.shape_cast %74 : vector<1x128x128xbf16> to vector<128x128xbf16>
    %cst_53 = arith.constant dense<0.000000e+00> : vector<49x128xf32>
    %76 = tpu.matmul %73, %75, %cst_53 {dimension_numbers = #tpu.dot_dimension_numbers<[1], [0], [0], [1], [0, 0, 1, 1], [], []>} : vector<49x128xbf16>, vector<128x128xbf16>, vector<49x128xf32> -> vector<49x128xf32>
    %77 = arith.addf %69, %76 : vector<49x128xf32>
    %c1_54 = arith.constant 1 : index
    %c7 = arith.constant 7 : index
    %c0_55 = arith.constant 0 : index
    %78 = vector.load %arg7[%c1_54, %c7, %c0_55] : memref<4x72x128xbf16, #tpu.memory_space<vmem>>, vector<1x49x128xbf16>
    %79 = vector.shape_cast %78 : vector<1x49x128xbf16> to vector<49x128xbf16>
    %cst_56 = arith.constant 0.000000e+00 : bf16
    %80 = vector.broadcast %cst_56 : bf16 to vector<49x128xbf16>
    %81 = arith.select %46, %79, %80 : vector<49x128xi1>, vector<49x128xbf16>
    %c4 = arith.constant 4 : index
    %c0_57 = arith.constant 0 : index
    %c0_58 = arith.constant 0 : index
    %82 = vector.load %arg4[%c4, %c0_57, %c0_58] : memref<16x128x128xbf16, #tpu.memory_space<vmem>>, vector<1x128x128xbf16>
    %83 = vector.shape_cast %82 : vector<1x128x128xbf16> to vector<128x128xbf16>
    %cst_59 = arith.constant dense<0.000000e+00> : vector<49x128xf32>
    %84 = tpu.matmul %81, %83, %cst_59 {dimension_numbers = #tpu.dot_dimension_numbers<[1], [0], [0], [1], [0, 0, 1, 1], [], []>} : vector<49x128xbf16>, vector<128x128xbf16>, vector<49x128xf32> -> vector<49x128xf32>
    %85 = arith.addf %77, %84 : vector<49x128xf32>
    %c0_60 = arith.constant 0 : index
    %c8_61 = arith.constant 8 : index
    %c0_62 = arith.constant 0 : index
    %86 = vector.load %arg7[%c0_60, %c8_61, %c0_62] : memref<4x72x128xbf16, #tpu.memory_space<vmem>>, vector<1x49x128xbf16>
    %87 = vector.shape_cast %86 : vector<1x49x128xbf16> to vector<49x128xbf16>
    %c5 = arith.constant 5 : index
    %c0_63 = arith.constant 0 : index
    %c0_64 = arith.constant 0 : index
    %88 = vector.load %arg4[%c5, %c0_63, %c0_64] : memref<16x128x128xbf16, #tpu.memory_space<vmem>>, vector<1x128x128xbf16>
    %89 = vector.shape_cast %88 : vector<1x128x128xbf16> to vector<128x128xbf16>
    %cst_65 = arith.constant dense<0.000000e+00> : vector<49x128xf32>
    %90 = tpu.matmul %87, %89, %cst_65 {dimension_numbers = #tpu.dot_dimension_numbers<[1], [0], [0], [1], [0, 0, 1, 1], [], []>} : vector<49x128xbf16>, vector<128x128xbf16>, vector<49x128xf32> -> vector<49x128xf32>
    %91 = arith.addf %85, %90 : vector<49x128xf32>
    %c1_66 = arith.constant 1 : index
    %c8_67 = arith.constant 8 : index
    %c0_68 = arith.constant 0 : index
    %92 = vector.load %arg7[%c1_66, %c8_67, %c0_68] : memref<4x72x128xbf16, #tpu.memory_space<vmem>>, vector<1x49x128xbf16>
    %93 = vector.shape_cast %92 : vector<1x49x128xbf16> to vector<49x128xbf16>
    %c6 = arith.constant 6 : index
    %c0_69 = arith.constant 0 : index
    %c0_70 = arith.constant 0 : index
    %94 = vector.load %arg4[%c6, %c0_69, %c0_70] : memref<16x128x128xbf16, #tpu.memory_space<vmem>>, vector<1x128x128xbf16>
    %95 = vector.shape_cast %94 : vector<1x128x128xbf16> to vector<128x128xbf16>
    %cst_71 = arith.constant dense<0.000000e+00> : vector<49x128xf32>
    %96 = tpu.matmul %93, %95, %cst_71 {dimension_numbers = #tpu.dot_dimension_numbers<[1], [0], [0], [1], [0, 0, 1, 1], [], []>} : vector<49x128xbf16>, vector<128x128xbf16>, vector<49x128xf32> -> vector<49x128xf32>
    %97 = arith.addf %91, %96 : vector<49x128xf32>
    %c0_72 = arith.constant 0 : index
    %c9 = arith.constant 9 : index
    %c0_73 = arith.constant 0 : index
    %98 = vector.load %arg7[%c0_72, %c9, %c0_73] : memref<4x72x128xbf16, #tpu.memory_space<vmem>>, vector<1x49x128xbf16>
    %99 = vector.shape_cast %98 : vector<1x49x128xbf16> to vector<49x128xbf16>
    %cst_74 = arith.constant 0.000000e+00 : bf16
    %100 = vector.broadcast %cst_74 : bf16 to vector<49x128xbf16>
    %101 = arith.select %48, %99, %100 : vector<49x128xi1>, vector<49x128xbf16>
    %c7_75 = arith.constant 7 : index
    %c0_76 = arith.constant 0 : index
    %c0_77 = arith.constant 0 : index
    %102 = vector.load %arg4[%c7_75, %c0_76, %c0_77] : memref<16x128x128xbf16, #tpu.memory_space<vmem>>, vector<1x128x128xbf16>
    %103 = vector.shape_cast %102 : vector<1x128x128xbf16> to vector<128x128xbf16>
    %cst_78 = arith.constant dense<0.000000e+00> : vector<49x128xf32>
    %104 = tpu.matmul %101, %103, %cst_78 {dimension_numbers = #tpu.dot_dimension_numbers<[1], [0], [0], [1], [0, 0, 1, 1], [], []>} : vector<49x128xbf16>, vector<128x128xbf16>, vector<49x128xf32> -> vector<49x128xf32>
    %105 = arith.addf %97, %104 : vector<49x128xf32>
    %c3_79 = arith.constant 3 : index
    %c7_80 = arith.constant 7 : index
    %c0_81 = arith.constant 0 : index
    %106 = vector.load %arg7[%c3_79, %c7_80, %c0_81] : memref<4x72x128xbf16, #tpu.memory_space<vmem>>, vector<1x49x128xbf16>
    %107 = vector.shape_cast %106 : vector<1x49x128xbf16> to vector<49x128xbf16>
    %cst_82 = arith.constant 0.000000e+00 : bf16
    %108 = vector.broadcast %cst_82 : bf16 to vector<49x128xbf16>
    %109 = arith.select %46, %107, %108 : vector<49x128xi1>, vector<49x128xbf16>
    %c8_83 = arith.constant 8 : index
    %c0_84 = arith.constant 0 : index
    %c0_85 = arith.constant 0 : index
    %110 = vector.load %arg4[%c8_83, %c0_84, %c0_85] : memref<16x128x128xbf16, #tpu.memory_space<vmem>>, vector<1x128x128xbf16>
    %111 = vector.shape_cast %110 : vector<1x128x128xbf16> to vector<128x128xbf16>
    %cst_86 = arith.constant dense<0.000000e+00> : vector<49x128xf32>
    %112 = tpu.matmul %109, %111, %cst_86 {dimension_numbers = #tpu.dot_dimension_numbers<[1], [0], [0], [1], [0, 0, 1, 1], [], []>} : vector<49x128xbf16>, vector<128x128xbf16>, vector<49x128xf32> -> vector<49x128xf32>
    %113 = arith.addf %105, %112 : vector<49x128xf32>
    %c2_87 = arith.constant 2 : index
    %c8_88 = arith.constant 8 : index
    %c0_89 = arith.constant 0 : index
    %114 = vector.load %arg7[%c2_87, %c8_88, %c0_89] : memref<4x72x128xbf16, #tpu.memory_space<vmem>>, vector<1x49x128xbf16>
    %115 = vector.shape_cast %114 : vector<1x49x128xbf16> to vector<49x128xbf16>
    %c9_90 = arith.constant 9 : index
    %c0_91 = arith.constant 0 : index
    %c0_92 = arith.constant 0 : index
    %116 = vector.load %arg4[%c9_90, %c0_91, %c0_92] : memref<16x128x128xbf16, #tpu.memory_space<vmem>>, vector<1x128x128xbf16>
    %117 = vector.shape_cast %116 : vector<1x128x128xbf16> to vector<128x128xbf16>
    %cst_93 = arith.constant dense<0.000000e+00> : vector<49x128xf32>
    %118 = tpu.matmul %115, %117, %cst_93 {dimension_numbers = #tpu.dot_dimension_numbers<[1], [0], [0], [1], [0, 0, 1, 1], [], []>} : vector<49x128xbf16>, vector<128x128xbf16>, vector<49x128xf32> -> vector<49x128xf32>
    %119 = arith.addf %113, %118 : vector<49x128xf32>
    %c3_94 = arith.constant 3 : index
    %c8_95 = arith.constant 8 : index
    %c0_96 = arith.constant 0 : index
    %120 = vector.load %arg7[%c3_94, %c8_95, %c0_96] : memref<4x72x128xbf16, #tpu.memory_space<vmem>>, vector<1x49x128xbf16>
    %121 = vector.shape_cast %120 : vector<1x49x128xbf16> to vector<49x128xbf16>
    %c10 = arith.constant 10 : index
    %c0_97 = arith.constant 0 : index
    %c0_98 = arith.constant 0 : index
    %122 = vector.load %arg4[%c10, %c0_97, %c0_98] : memref<16x128x128xbf16, #tpu.memory_space<vmem>>, vector<1x128x128xbf16>
    %123 = vector.shape_cast %122 : vector<1x128x128xbf16> to vector<128x128xbf16>
    %cst_99 = arith.constant dense<0.000000e+00> : vector<49x128xf32>
    %124 = tpu.matmul %121, %123, %cst_99 {dimension_numbers = #tpu.dot_dimension_numbers<[1], [0], [0], [1], [0, 0, 1, 1], [], []>} : vector<49x128xbf16>, vector<128x128xbf16>, vector<49x128xf32> -> vector<49x128xf32>
    %125 = arith.addf %119, %124 : vector<49x128xf32>
    %c2_100 = arith.constant 2 : index
    %c9_101 = arith.constant 9 : index
    %c0_102 = arith.constant 0 : index
    %126 = vector.load %arg7[%c2_100, %c9_101, %c0_102] : memref<4x72x128xbf16, #tpu.memory_space<vmem>>, vector<1x49x128xbf16>
    %127 = vector.shape_cast %126 : vector<1x49x128xbf16> to vector<49x128xbf16>
    %cst_103 = arith.constant 0.000000e+00 : bf16
    %128 = vector.broadcast %cst_103 : bf16 to vector<49x128xbf16>
    %129 = arith.select %48, %127, %128 : vector<49x128xi1>, vector<49x128xbf16>
    %c11 = arith.constant 11 : index
    %c0_104 = arith.constant 0 : index
    %c0_105 = arith.constant 0 : index
    %130 = vector.load %arg4[%c11, %c0_104, %c0_105] : memref<16x128x128xbf16, #tpu.memory_space<vmem>>, vector<1x128x128xbf16>
    %131 = vector.shape_cast %130 : vector<1x128x128xbf16> to vector<128x128xbf16>
    %cst_106 = arith.constant dense<0.000000e+00> : vector<49x128xf32>
    %132 = tpu.matmul %129, %131, %cst_106 {dimension_numbers = #tpu.dot_dimension_numbers<[1], [0], [0], [1], [0, 0, 1, 1], [], []>} : vector<49x128xbf16>, vector<128x128xbf16>, vector<49x128xf32> -> vector<49x128xf32>
    %133 = arith.addf %125, %132 : vector<49x128xf32>
    %c1_107 = arith.constant 1 : index
    %c14 = arith.constant 14 : index
    %c0_108 = arith.constant 0 : index
    %134 = vector.load %arg7[%c1_107, %c14, %c0_108] : memref<4x72x128xbf16, #tpu.memory_space<vmem>>, vector<1x49x128xbf16>
    %135 = vector.shape_cast %134 : vector<1x49x128xbf16> to vector<49x128xbf16>
    %cst_109 = arith.constant 0.000000e+00 : bf16
    %136 = vector.broadcast %cst_109 : bf16 to vector<49x128xbf16>
    %137 = arith.select %46, %135, %136 : vector<49x128xi1>, vector<49x128xbf16>
    %c12 = arith.constant 12 : index
    %c0_110 = arith.constant 0 : index
    %c0_111 = arith.constant 0 : index
    %138 = vector.load %arg4[%c12, %c0_110, %c0_111] : memref<16x128x128xbf16, #tpu.memory_space<vmem>>, vector<1x128x128xbf16>
    %139 = vector.shape_cast %138 : vector<1x128x128xbf16> to vector<128x128xbf16>
    %cst_112 = arith.constant dense<0.000000e+00> : vector<49x128xf32>
    %140 = tpu.matmul %137, %139, %cst_112 {dimension_numbers = #tpu.dot_dimension_numbers<[1], [0], [0], [1], [0, 0, 1, 1], [], []>} : vector<49x128xbf16>, vector<128x128xbf16>, vector<49x128xf32> -> vector<49x128xf32>
    %141 = arith.addf %133, %140 : vector<49x128xf32>
    %c0_113 = arith.constant 0 : index
    %c15 = arith.constant 15 : index
    %c0_114 = arith.constant 0 : index
    %142 = vector.load %arg7[%c0_113, %c15, %c0_114] : memref<4x72x128xbf16, #tpu.memory_space<vmem>>, vector<1x49x128xbf16>
    %143 = vector.shape_cast %142 : vector<1x49x128xbf16> to vector<49x128xbf16>
    %c13 = arith.constant 13 : index
    %c0_115 = arith.constant 0 : index
    %c0_116 = arith.constant 0 : index
    %144 = vector.load %arg4[%c13, %c0_115, %c0_116] : memref<16x128x128xbf16, #tpu.memory_space<vmem>>, vector<1x128x128xbf16>
    %145 = vector.shape_cast %144 : vector<1x128x128xbf16> to vector<128x128xbf16>
    %cst_117 = arith.constant dense<0.000000e+00> : vector<49x128xf32>
    %146 = tpu.matmul %143, %145, %cst_117 {dimension_numbers = #tpu.dot_dimension_numbers<[1], [0], [0], [1], [0, 0, 1, 1], [], []>} : vector<49x128xbf16>, vector<128x128xbf16>, vector<49x128xf32> -> vector<49x128xf32>
    %147 = arith.addf %141, %146 : vector<49x128xf32>
    %c1_118 = arith.constant 1 : index
    %c15_119 = arith.constant 15 : index
    %c0_120 = arith.constant 0 : index
    %148 = vector.load %arg7[%c1_118, %c15_119, %c0_120] : memref<4x72x128xbf16, #tpu.memory_space<vmem>>, vector<1x49x128xbf16>
    %149 = vector.shape_cast %148 : vector<1x49x128xbf16> to vector<49x128xbf16>
    %c14_121 = arith.constant 14 : index
    %c0_122 = arith.constant 0 : index
    %c0_123 = arith.constant 0 : index
    %150 = vector.load %arg4[%c14_121, %c0_122, %c0_123] : memref<16x128x128xbf16, #tpu.memory_space<vmem>>, vector<1x128x128xbf16>
    %151 = vector.shape_cast %150 : vector<1x128x128xbf16> to vector<128x128xbf16>
    %cst_124 = arith.constant dense<0.000000e+00> : vector<49x128xf32>
    %152 = tpu.matmul %149, %151, %cst_124 {dimension_numbers = #tpu.dot_dimension_numbers<[1], [0], [0], [1], [0, 0, 1, 1], [], []>} : vector<49x128xbf16>, vector<128x128xbf16>, vector<49x128xf32> -> vector<49x128xf32>
    %153 = arith.addf %147, %152 : vector<49x128xf32>
    %c0_125 = arith.constant 0 : index
    %c16 = arith.constant 16 : index
    %c0_126 = arith.constant 0 : index
    %154 = vector.load %arg7[%c0_125, %c16, %c0_126] : memref<4x72x128xbf16, #tpu.memory_space<vmem>>, vector<1x49x128xbf16>
    %155 = vector.shape_cast %154 : vector<1x49x128xbf16> to vector<49x128xbf16>
    %cst_127 = arith.constant 0.000000e+00 : bf16
    %156 = vector.broadcast %cst_127 : bf16 to vector<49x128xbf16>
    %157 = arith.select %48, %155, %156 : vector<49x128xi1>, vector<49x128xbf16>
    %c15_128 = arith.constant 15 : index
    %c0_129 = arith.constant 0 : index
    %c0_130 = arith.constant 0 : index
    %158 = vector.load %arg4[%c15_128, %c0_129, %c0_130] : memref<16x128x128xbf16, #tpu.memory_space<vmem>>, vector<1x128x128xbf16>
    %159 = vector.shape_cast %158 : vector<1x128x128xbf16> to vector<128x128xbf16>
    %cst_131 = arith.constant dense<0.000000e+00> : vector<49x128xf32>
    %160 = tpu.matmul %157, %159, %cst_131 {dimension_numbers = #tpu.dot_dimension_numbers<[1], [0], [0], [1], [0, 0, 1, 1], [], []>} : vector<49x128xbf16>, vector<128x128xbf16>, vector<49x128xf32> -> vector<49x128xf32>
    %161 = arith.addf %153, %160 : vector<49x128xf32>
    %c0_132 = arith.constant 0 : index
    %c0_133 = arith.constant 0 : index
    %162 = vector.load %arg5[%c0_132, %c0_133] : memref<1x128xf32, #tpu.memory_space<vmem>>, vector<1x128xf32>
    %163 = vector.broadcast %162 : vector<1x128xf32> to vector<49x128xf32>
    %164 = arith.addf %161, %163 : vector<49x128xf32>
    %cst_134 = arith.constant 0.000000e+00 : f32
    %165 = vector.broadcast %cst_134 : f32 to vector<49x128xf32>
    %166 = arith.maximumf %164, %165 : vector<49x128xf32>
    %167 = arith.truncf %166 : vector<49x128xf32> to vector<49x128xbf16>
    %c0_135 = arith.constant 0 : index
    %c0_136 = arith.constant 0 : index
    %c0_137 = arith.constant 0 : index
    %168 = vector.load %arg6[%c0_135, %c0_136, %c0_137] : memref<1x49x128xbf16, #tpu.memory_space<vmem>>, vector<1x49x128xbf16>
    %169 = vector.shape_cast %168 : vector<1x49x128xbf16> to vector<49x128xbf16>
    %170 = vector.shape_cast %167 : vector<49x128xbf16> to vector<1x49x128xbf16>
    tpu.vector_store %arg6[%c0_135, %c0_136, %c0_137], %170 {strides = array<i32>} : memref<1x49x128xbf16, #tpu.memory_space<vmem>>, vector<1x49x128xbf16>,
    return
  }
  func.func @transform_0(%arg0: i32) -> (i32, i32, i32) {
    %c0_i32 = arith.constant 0 : i32
    %c0_i32_0 = arith.constant 0 : i32
    %c0_i32_1 = arith.constant 0 : i32
    return %arg0, %c0_i32, %c0_i32_0 : i32, i32, i32
  }
  func.func @transform_1(%arg0: i32) -> (i32, i32) {
    %c0_i32 = arith.constant 0 : i32
    %c0_i32_0 = arith.constant 0 : i32
    %c0_i32_1 = arith.constant 0 : i32
    return %c0_i32, %c0_i32_0 : i32, i32
  }
  func.func @transform_2(%arg0: i32) -> (i32, i32) {
    %c0_i32 = arith.constant 0 : i32
    %c0_i32_0 = arith.constant 0 : i32
    %c0_i32_1 = arith.constant 0 : i32
    return %c0_i32, %c0_i32_0 : i32, i32
  }
  func.func @transform_3(%arg0: i32) -> (i32, i32, i32) {
    %c0_i32 = arith.constant 0 : i32
    %c0_i32_0 = arith.constant 0 : i32
    %c0_i32_1 = arith.constant 0 : i32
    %c0_i32_2 = arith.constant 0 : i32
    return %c0_i32, %c0_i32_0, %c0_i32_1 : i32, i32, i32
  }
  func.func @transform_4(%arg0: i32) -> (i32, i32) {
    %c0_i32 = arith.constant 0 : i32
    %c0_i32_0 = arith.constant 0 : i32
    %c0_i32_1 = arith.constant 0 : i32
    return %c0_i32, %c0_i32_0 : i32, i32
  }
  func.func @transform_5(%arg0: i32) -> (i32, i32, i32) {
    %c0_i32 = arith.constant 0 : i32
    %c0_i32_0 = arith.constant 0 : i32
    %c0_i32_1 = arith.constant 0 : i32
    return %arg0, %c0_i32, %c0_i32_0 : i32, i32, i32
  }
}

module attributes {stable_mosaic.version = 11 : i64} {
  func.func @_fc_kernel(%arg0: i32, %arg1: memref<2x6272xbf16, #tpu.memory_space<vmem>>, %arg2: memref<6272x128xbf16, #tpu.memory_space<vmem>>, %arg3: memref<1x128xf32, #tpu.memory_space<vmem>>, %arg4: memref<2x128xf32, #tpu.memory_space<vmem>>) attributes {dimension_semantics = [#tpu.dimension_semantics<arbitrary>], iteration_bounds = array<i64: 1>, scalar_prefetch = 0 : i64, scratch_operands = 0 : i64, tpu.core_type = #tpu.core_type<tc>, window_params = [{pipeline_mode = #tpu.pipeline_mode<synchronous>, transform_indices = @transform_0, window_bounds = array<i64: 2, 6272>}, {pipeline_mode = #tpu.pipeline_mode<synchronous>, transform_indices = @transform_1, window_bounds = array<i64: 6272, 128>}, {pipeline_mode = #tpu.pipeline_mode<synchronous>, transform_indices = @transform_2, window_bounds = array<i64: 1, 128>}, {pipeline_mode = #tpu.pipeline_mode<synchronous>, transform_indices = @transform_3, window_bounds = array<i64: 2, 128>}]} {
    %c0 = arith.constant 0 : index
    %c0_0 = arith.constant 0 : index
    %0 = vector.load %arg1[%c0, %c0_0] : memref<2x6272xbf16, #tpu.memory_space<vmem>>, vector<2x6272xbf16>
    %c0_1 = arith.constant 0 : index
    %c0_2 = arith.constant 0 : index
    %1 = vector.load %arg2[%c0_1, %c0_2] : memref<6272x128xbf16, #tpu.memory_space<vmem>>, vector<6272x128xbf16>
    %cst = arith.constant dense<0.000000e+00> : vector<2x128xf32>
    %2 = tpu.matmul %0, %1, %cst {dimension_numbers = #tpu.dot_dimension_numbers<[1], [0], [0], [1], [0, 0, 1, 1], [], []>} : vector<2x6272xbf16>, vector<6272x128xbf16>, vector<2x128xf32> -> vector<2x128xf32>
    %c0_3 = arith.constant 0 : index
    %c0_4 = arith.constant 0 : index
    %3 = vector.load %arg3[%c0_3, %c0_4] : memref<1x128xf32, #tpu.memory_space<vmem>>, vector<1x128xf32>
    %4 = vector.broadcast %3 : vector<1x128xf32> to vector<2x128xf32>
    %5 = arith.addf %2, %4 : vector<2x128xf32>
    %c0_5 = arith.constant 0 : index
    %c0_6 = arith.constant 0 : index
    %6 = vector.load %arg4[%c0_5, %c0_6] : memref<2x128xf32, #tpu.memory_space<vmem>>, vector<2x128xf32>
    tpu.vector_store %arg4[%c0_5, %c0_6], %5 {strides = array<i32>} : memref<2x128xf32, #tpu.memory_space<vmem>>, vector<2x128xf32>,
    return
  }
  func.func @transform_0(%arg0: i32) -> (i32, i32) {
    %c0_i32 = arith.constant 0 : i32
    %c0_i32_0 = arith.constant 0 : i32
    %c0_i32_1 = arith.constant 0 : i32
    return %c0_i32, %c0_i32_0 : i32, i32
  }
  func.func @transform_1(%arg0: i32) -> (i32, i32) {
    %c0_i32 = arith.constant 0 : i32
    %c0_i32_0 = arith.constant 0 : i32
    %c0_i32_1 = arith.constant 0 : i32
    return %c0_i32, %c0_i32_0 : i32, i32
  }
  func.func @transform_2(%arg0: i32) -> (i32, i32) {
    %c0_i32 = arith.constant 0 : i32
    %c0_i32_0 = arith.constant 0 : i32
    %c0_i32_1 = arith.constant 0 : i32
    return %c0_i32, %c0_i32_0 : i32, i32
  }
  func.func @transform_3(%arg0: i32) -> (i32, i32) {
    %c0_i32 = arith.constant 0 : i32
    %c0_i32_0 = arith.constant 0 : i32
    %c0_i32_1 = arith.constant 0 : i32
    return %c0_i32, %c0_i32_0 : i32, i32
  }
}

</mosaic_0001>

<bundles_post_ra>
// kernel: encoder_forward.2
= control target key start
LH: loop header
LB: loop body
LE: loop exit
PB: predicated region body
PF: predicated region fallthrough
CT: control target
= control target key end

     0   :  { %s5650_s18 = smov 0   ;;  %s7118_s0 = inlined_call_operand.vmem [shape: bf16[2,224,128], index: 0, kind: input, shape index: {}]   ;;  %s7119_s1 = inlined_call_operand.vmem [shape: bf16[128,128], index: 1, kind: input, shape index: {}]   ;;  %s7120_s2 = inlined_call_operand.vmem [shape: f32[1,128], index: 2, kind: input, shape index: {}]   ;;  %s7121_s3 = inlined_call_operand.vmem [shape: bf16[16,128,128], index: 3, kind: input, shape index: {}]   ;;  %s7122_s4 = inlined_call_operand.vmem [shape: f32[1,128], index: 4, kind: input, shape index: {}]   ;;  %s7123_s5 = inlined_call_operand.vmem [shape: bf16[2,49,128], index: 5, kind: output, shape index: {}]  }
   0x1 LB: > { %s4155_s19 = sadd.s32 4294967295, %s5617_s18   ;;  %p4159_p0 = scmp.ge.s32.totalorder %s5617_s18, 1  ;;  %s5617_s18 = sphi %s5650_s18, %s15_s18  }
   0x2   : > { %p187_p1 = scmp.lt.s32.totalorder %s5617_s18, 3 }
   0x4   : > { %p188_p2 = pnand %p4159_p0, %p187_p1 }
   0x6   : > { %191 = sbr.rel (%p188_p2) target bundleno = 771 (0x303), region = 40 }
   0xb   : > { %v5430_v0 = vld [vmem:[%s7119_s1 + $0x38] sm:$0xff]   ;;  %p215_p3 = scmp.lt.s32.totalorder %s4155_s19, 1  ;;  %v5431_v1 = vld [vmem:[%s7119_s1 + $0x30] sm:$0xff]   ;;  %v5432_v2 = vld [vmem:[%s7119_s1 + $0x28] sm:$0xff]   ;;  %v774_v22 = vlaneseq  ;;  %v5619_v24 = vmov 0  }
   0xc   : > { %4977 = vmatprep.subr.bf16.mxu0 %v5430_v0  ;;  %v5433_v3 = vld [vmem:[%s7119_s1 + $0x20] sm:$0xff]   ;;  %v5434_v5 = vld [vmem:[%s7119_s1 + $0x18] sm:$0xff]   ;;  %v5435_v6 = vld [vmem:[%s7119_s1 + $0x10] sm:$0xff]   ;;  %599 = vst [vmem:[#allocation2 + $0x4] sm:$0xf] %v5619_v24 }
   0xd   : > { %s7338_s19 = smov (!%p215_p3, %s4155_s19), 1  ;;  %4978 = vmatpush3.bf16.msra.mxu0 %v5430_v0  ;;  %v5436_v7 = vld [vmem:[%s7119_s1 + $0x8] sm:$0xff]   ;;  %v5437_v8 = vld [vmem:[%s7119_s1] sm:$0xff]   ;;  %v5704_v23 = vshrl.u32 %v774_v22, 7  ;;  %600 = vst [vmem:[#allocation2 + $0x8] sm:$0xf] %v5619_v24 }
   0xe   : > { %4979 = vmatprep.subr.bf16.mxu0 %v5431_v1  ;;  %s5405_s26 = smul.u32 112, %s7338_s19  ;;  %601 = vst [vmem:[#allocation2 + $0xc] sm:$0xf] %v5619_v24  ;;  %602 = vst [vmem:[#allocation2 + $0x10] sm:$0xf] %v5619_v24  ;;  %v5454_v22 = vld [vmem:[%s7121_s3 + $0x68] sm:$0xff]  }
   0xf   : > { %603 = vst [vmem:[#allocation2 + $0x14] sm:$0xf] %v5619_v24  ;;  %604 = vst [vmem:[#allocation2 + $0x18] sm:$0xf] %v5619_v24  ;;  %v776_v25 = vadd.s32 8, %v5704_v23  ;;  %v777_v30 = vadd.s32 16, %v5704_v23 }
  0x10   : > { %s5673_s29 = scalar_lea.vmem %s7118_s0, %s5405_s26  ;;  %605 = vst [vmem:[#allocation2 + $0x1c] sm:$0xf] %v5619_v24  ;;  %606 = vst [vmem:[#allocation2 + $0x20] sm:$0xf] %v5619_v24  ;;  %v5740_v26 = vmul.u32.u64.low 2454267026, %v5704_v23  ;;  %v5741_v27 = vmul.u32.u64.high 2454267026, %v5704_v23, %v5740_v26 }
  0x11   : > { %4980 = vmatpush3.bf16.msra.mxu0 %v5431_v1  ;;  %v5438_v4 = vld [vmem:[%s5673_s29] sm:$0xff]   ;;  %v5439_v9 = vld [vmem:[%s5673_s29 + $0x8] sm:$0xff]   ;;  %v5440_v10 = vld [vmem:[%s5673_s29 + $0x10] sm:$0xff]   ;;  %607 = vst [vmem:[#allocation2 + $0x24] sm:$0xf] %v5619_v24  ;;  %v778_v31 = vadd.s32 24, %v5704_v23 }
  0x12   : > { %4981 = vmatprep.subr.bf16.mxu0 %v5432_v2  ;;  %4993 = vmatprep.mubr.bf16.mxu0 %v5438_v4  ;;  %v5441_v11 = vld [vmem:[%s5673_s29 + $0x18] sm:$0xff]   ;;  %v5442_v12 = vld [vmem:[%s5673_s29 + $0x20] sm:$0xff]   ;;  %v5443_v13 = vld [vmem:[%s5673_s29 + $0x28] sm:$0xff]   ;;  %608 = vst [vmem:[#allocation2 + $0x28] sm:$0xf] %v5619_v24  ;;  %v779_v32 = vadd.s32 32, %v5704_v23 }
  0x13   : > { %v5444_v14 = vld [vmem:[%s5673_s29 + $0x30] sm:$0xff]   ;;  %v5445_v15 = vld [vmem:[%s5673_s29 + $0x38] sm:$0xff]   ;;  %v5446_v16 = vld [vmem:[%s5673_s29 + $0x40] sm:$0xff]   ;;  %609 = vst [vmem:[#allocation2 + $0x2c] sm:$0xf] %v5619_v24  ;;  %v780_v34 = vadd.s32 40, %v5704_v23 }
  0x14   : > { %v5447_v17 = vld [vmem:[%s5673_s29 + $0x48] sm:$0xff]   ;;  %v5448_v18 = vld [vmem:[%s5673_s29 + $0x50] sm:$0xff]   ;;  %v5449_v19 = vld [vmem:[%s5673_s29 + $0x58] sm:$0xff]   ;;  %610 = vst [vmem:[#allocation2 + $0x30] sm:$0xf] %v5619_v24  ;;  %v5776_v1 = vadd.s32 48, %v5704_v23 }
  0x15   : > { %4982 = vmatpush3.bf16.msra.mxu0 %v5432_v2  ;;  %v5450_v20 = vld [vmem:[%s5673_s29 + $0x60] sm:$0xff]   ;;  %v5451_v21 = vld [vmem:[%s5673_s29 + $0x68] sm:$0xff]   ;;  %611 = vst [vmem:[#allocation2 + $0x34] sm:$0xf] %v5619_v24  ;;  %612 = vst [vmem:[#allocation2 + $0x38] sm:$0xf] %v5619_v24 }
  0x16   : > { %4983 = vmatprep.subr.bf16.mxu0 %v5433_v3  ;;  %613 = vst [vmem:[#allocation2 + $0x3c] sm:$0xf] %v5619_v24  ;;  %614 = vst [vmem:[#allocation2 + $0x40] sm:$0xf] %v5619_v24  ;;  %v5743_v28 = vmul.u32.u64.low 2454267026, %v776_v25  ;;  %v5744_v29 = vmul.u32.u64.high 2454267026, %v776_v25, %v5743_v28 }
  0x17   : > { %616 = vst [vmem:[#allocation2 + $0x48] sm:$0xf] %v5619_v24  ;;  %617 = vst [vmem:[#allocation2 + $0x4c] sm:$0xf] %v5619_v24  ;;  %vm788_vm1 = vc.u32 %v5740_v26, 2454267026 }
  0x18   : > { %618 = vst [vmem:[#allocation2 + $0x50] sm:$0xf] %v5619_v24  ;;  %619 = vst [vmem:[#allocation2 + $0x54] sm:$0xf] %v5619_v24  ;;  %vm802_vm0 = vc.u32 %v5743_v28, 2454267026 }
  0x19   : > { %4984 = vmatpush3.bf16.msra.mxu0 %v5433_v3  ;;  %620 = vst [vmem:[#allocation2 + $0x58] sm:$0xf] %v5619_v24  ;;  %621 = vst [vmem:[#allocation2 + $0x5c] sm:$0xf] %v5619_v24  ;;  %v803_v33 = vsel %vm802_vm0, 1, %v5619_v24  ;;  %v789_v39 = vsel %vm788_vm1, 1, %v5619_v24 }
  0x1a   : > { %4985 = vmatprep.subr.bf16.mxu0 %v5434_v5  ;;  %622 = vst [vmem:[#allocation2 + $0x60] sm:$0xf] %v5619_v24  ;;  %623 = vst [vmem:[#allocation2 + $0x64] sm:$0xf] %v5619_v24  ;;  %v5751_v35 = vmul.u32.u64.low 2454267026, %v777_v30  ;;  %v5752_v36 = vmul.u32.u64.high 2454267026, %v777_v30, %v5751_v35  ;;  %v804_v42 = vadd.s32 %v5744_v29, %v803_v33  ;;  %v790_v45 = vadd.s32 %v5741_v27, %v789_v39 }
  0x1b   : > { %625 = vst [vmem:[#allocation2 + $0x6c] sm:$0xf] %v5619_v24  ;;  %626 = vst [vmem:[#allocation2 + $0x70] sm:$0xf] %v5619_v24  ;;  %v5754_v37 = vmul.u32.u64.low 2454267026, %v779_v32  ;;  %v5755_v38 = vmul.u32.u64.high 2454267026, %v779_v32, %v5754_v37 }
  0x1c   : > { %627 = vst [vmem:[#allocation2 + $0x74] sm:$0xf] %v5619_v24  ;;  %628 = vst [vmem:[#allocation2 + $0x78] sm:$0xf] %v5619_v24  ;;  %v5758_v40 = vmul.u32.u64.low 2454267026, %v778_v31  ;;  %v5759_v41 = vmul.u32.u64.high 2454267026, %v778_v31, %v5758_v40 }
  0x1d   : > { %4986 = vmatpush3.bf16.msra.mxu0 %v5434_v5  ;;  %629 = vst [vmem:[#allocation2 + $0x7c] sm:$0xf] %v5619_v24  ;;  %630 = vst [vmem:[#allocation2 + $0x80] sm:$0xf] %v5619_v24  ;;  %vm844_vm2 = vc.u32 %v5754_v37, 2454267026 }
  0x1e   : > { %4987 = vmatprep.subr.bf16.mxu0 %v5435_v6  ;;  %631 = vst [vmem:[#allocation2 + $0x84] sm:$0xf] %v5619_v24  ;;  %632 = vst [vmem:[#allocation2 + $0x88] sm:$0xf] %v5619_v24  ;;  %v5762_v43 = vmul.u32.u64.low 2454267026, %v780_v34  ;;  %v5763_v44 = vmul.u32.u64.high 2454267026, %v780_v34, %v5762_v43 }
  0x1f   : > { %vm816_vm3 = vc.u32 %v5751_v35, 2454267026  ;;  %v845_v46 = vsel %vm844_vm2, 1, %v5619_v24  ;;  %vm830_vm4 = vc.u32 %v5758_v40, 2454267026  ;;  %v805_v47 = vshrl.u32 %v804_v42, 2 }
  0x20   : > { %v817_v48 = vsel %vm816_vm3, 1, %v5619_v24  ;;  %v846_v49 = vadd.s32 %v5755_v38, %v845_v46  ;;  %vm858_vm5 = vc.u32 %v5762_v43, 2454267026  ;;  %v791_v50 = vshrl.u32 %v790_v45, 2  ;;  %v5456_v39 = vld [vmem:[%s7121_s3 + $0x58] sm:$0xff]   ;;  %v5475_v45 = vld [vmem:[%s7121_s3 + $0x80] sm:$0xff]  }
  0x21   : > { %4988 = vmatpush3.bf16.msra.mxu0 %v5435_v6  ;;  %v831_v51 = vsel %vm830_vm4, 1, %v5619_v24  ;;  %v806_v52 = vmul.u32 7, %v805_v47  ;;  %v818_v53 = vadd.s32 %v5752_v36, %v817_v48  ;;  %v859_v54 = vsel %vm858_vm5, 1, %v5619_v24  ;;  %v5457_v40 = vld [vmem:[%s7121_s3 + $0xb8] sm:$0xff]   ;;  %s5406_s24 = smul.u32 28, %s7338_s19 }
  0x22   : > { %4989 = vmatprep.subr.bf16.mxu0 %v5436_v7  ;;  %v832_v55 = vadd.s32 %v5759_v41, %v831_v51  ;;  %v847_v56 = vshrl.u32 %v846_v49, 2  ;;  %v792_v57 = vmul.u32 7, %v791_v50  ;;  %v860_v58 = vadd.s32 %v5763_v44, %v859_v54 }
  0x23   : > { %v807_v59 = vsub.s32 %v776_v25, %v806_v52  ;;  %v819_v60 = vshrl.u32 %v818_v53, 2  ;;  %v7175_v28 = vmov 0  ;;  %v7178_v33 = vmov 0  ;;  %s224_s27 = scalar_lea.vmem %s7123_s5, %s5406_s24 }
  0x24   : > { %v833_v61 = vshrl.u32 %v832_v55, 2  ;;  %v848_v62 = vmul.u32 7, %v847_v56  ;;  %v793_v63 = vsub.s32 %v5704_v23, %v792_v57  ;;  %v861_v0 = vshrl.u32 %v860_v58, 2  ;;  %v5458_v56 = vld [vmem:[%s7121_s3 + $0x50] sm:$0xff]  }
  0x25   : > { %4990 = vmatpush3.bf16.msra.mxu0 %v5436_v7  ;;  %vm881_vm6 = vcmp.ne.s32.totalorder %v807_v59, 0  ;;  %v820_v2 = vmul.u32 7, %v819_v60  ;;  %vm888_vm7 = vcmp.lt.s32.totalorder %v807_v59, 0  ;;  %v902_v5 = vadd.s32 7, %v807_v59  ;;  %v5459_v57 = vld [vmem:[%s7121_s3 + $0xb0] sm:$0xff]  }
  0x26   : > { %4991 = vmatprep.subr.bf16.mxu0 %v5437_v8  ;;  %v834_v3 = vmul.u32 7, %v833_v61  ;;  %v849_v4 = vsub.s32 %v779_v32, %v848_v62  ;;  %vm880_vm8 = vcmp.ne.s32.totalorder %v793_v63, 0  ;;  %vm887_vm9 = vcmp.lt.s32.totalorder %v793_v63, 0  ;;  %vm895_vm10 = vmand %vm888_vm7, %vm881_vm6 }
  0x27   : > { %v862_v6 = vmul.u32 7, %v861_v0  ;;  %vm894_vm13 = vmand %vm887_vm9, %vm880_vm8  ;;  %v7172_v23 = vmov 0  ;;  %v7181_v38 = vmov 0  ;;  %v7184_v42 = vmov 0 }
  0x28   : > { %vm884_vm11 = vcmp.ne.s32.totalorder %v849_v4, 0  ;;  %vm891_vm12 = vcmp.lt.s32.totalorder %v849_v4, 0  ;;  %v7189_v48 = vmov 0 }
  0x29   : > { %4992 = vmatpush3.bf16.msra.mxu0 %v5437_v8  ;;  %v5779_v7 = vmul.u32.u64.low 2454267026, %v5776_v1  ;;  %v5780_v8 = vmul.u32.u64.high 2454267026, %v5776_v1, %v5779_v7  ;;  %vm898_vm1 = vmand %vm891_vm12, %vm884_vm11 }
  0x2a   : > { %5069 = vmatprep.subr.bf16.mxu0 %v5457_v40 }
  0x2b   : > { %vm872_vm14 = vc.u32 %v5779_v7, 2454267026 }
  0x2c   : > { %4994 = vmatmul.mubr.bf16.vlgmr.msra.gmra.mxu0 %v5439_v9  ;;  %v821_v9 = vsub.s32 %v777_v30, %v820_v2 }
  0x2d   : > { %4997 = vmatprep.mubr.bf16.mxu0 %v5440_v10  ;;  %v5452_v10 = vld [vmem:[%s7121_s3 + $0x78] sm:$0xff]   ;;  %5070 = vmatpush3.bf16.msra.mxu0 %v5457_v40 }
  0x2e   : > { %5021 = vmatprep.subr.bf16.mxu1 %v5452_v10  ;;  %vm882_vm15 = vcmp.ne.s32.totalorder %v821_v9, 0  ;;  %vm889_vm0 = vcmp.lt.s32.totalorder %v821_v9, 0  ;;  %5071 = vmatprep.subr.bf16.mxu0 %v5459_v57 }
  0x2f   : > { %5022 = vmatpush3.bf16.msra.mxu1 %v5452_v10  ;;  %vm896_vm5 = vmand %vm889_vm0, %vm882_vm15 }
  0x31   : > { %5072 = vmatpush3.bf16.msra.mxu0 %v5459_v57 }
  0x34   : > { %4998 = vmatmul.mubr.bf16.gmra.mxu0 %v5441_v11  ;;  %v901_v11 = vadd.s32 7, %v793_v63 }
  0x35   : > { %5001 = vmatprep.mubr.bf16.mxu0 %v5442_v12  ;;  %v835_v12 = vsub.s32 %v778_v31, %v834_v3  ;;  %v5455_v31 = vld [vmem:[%s7121_s3 + $0x60] sm:$0xff]  }
  0x37   : > { %vm883_vm2 = vcmp.ne.s32.totalorder %v835_v12, 0  ;;  %vm890_vm3 = vcmp.lt.s32.totalorder %v835_v12, 0 }
  0x38   : > { %vm897_vm9 = vmand %vm890_vm3, %vm883_vm2  ;;  %vm7124_vm2 = vcmask 1040384  }
  0x3c   : > { %5002 = vmatmul.mubr.bf16.gmra.mxu0 %v5443_v13  ;;  %v5785_v13 = vsel %vm895_vm10, %v902_v5, %v807_v59 }
  0x3d   : > { %5005 = vmatprep.mubr.bf16.mxu0 %v5444_v14  ;;  %v863_v14 = vsub.s32 %v780_v34, %v862_v6  ;;  %vm923_vm4 = vcmp.ne.s32.totalorder %v5785_v13, 6 }
  0x3e   : > { %vm5798_vm10 = vmpackc.low %vm923_vm4, %vm923_vm4 }
  0x3f   : > { %vm885_vm6 = vcmp.ne.s32.totalorder %v863_v14, 0  ;;  %vm892_vm7 = vcmp.lt.s32.totalorder %v863_v14, 0  ;;  %v7173_v23 = vsel %vm5798_vm10, 4294967295, %v7172_v23  ;;  %v906_v25 = vadd.s32 7, %v863_v14 }
  0x40   : > { %7174 = vst [vmem:[#allocation3_spill] sm:$0xff] %v7173_v23  ;;  %vm899_vm11 = vmand %vm892_vm7, %vm885_vm6  ;;  %v5814_v30 = vsel %vm5798_vm10, 65537, %v5619_v24  ;;  %vm7125_vm7 = vsmask.f32 256 }
  0x41   : > { %v913_v32 = vsel %vm899_vm11, %v906_v25, %v863_v14  ;;  %v2324_v36 = vshrl.u32 %v5814_v30, 16  ;;  %v1497_v46 = vrot.slane %v5814_v30, 7  ;;  %v2327_v51 = vshll.u32 %v5814_v30, 16 }
  0x42   : > { %vm927_vm3 = vcmp.ne.s32.totalorder %v913_v32, 6 }
  0x43   : > { %v5859_v47 = vrot.slane %v2324_v36, 7  ;;  %vm5863_vm11 = vmpackc.low %vm927_vm3, %vm927_vm3  ;;  %v1499_v0 = vrot.slane %v1497_v46, 4 }
  0x44   : > { %5006 = vmatmul.mubr.bf16.gmra.mxu0 %v5445_v15  ;;  %v905_v15 = vadd.s32 7, %v849_v4  ;;  %v7190_v48 = vsel %vm5863_vm11, 4294967295, %v7189_v48  ;;  %v5899_v59 = vsel %vm5863_vm11, 65537, %v5619_v24  ;;  %vm1708_vm11 = vsmask.f32 3328 }
  0x45   : > { %5009 = vmatprep.mubr.bf16.mxu0 %v5446_v16  ;;  %v5453_v16 = vld [vmem:[%s7121_s3 + $0x70] sm:$0xff]   ;;  %7191 = vst [vmem:[#allocation8_spill] sm:$0xff] %v7190_v48  ;;  %v2360_v10 = vshrl.u32 %v5899_v59, 16  ;;  %v1509_v40 = vrot.slane %v5899_v59, 7 }
  0x46   : > { %5023 = vmatprep.subr.bf16.mxu1 %v5453_v16 }
  0x47   : > { %5024 = vmatpush3.bf16.msra.mxu1 %v5453_v16 }
  0x48   : > { %5025 = vmatprep.subr.bf16.mxu1 %v5454_v22 }
  0x4b   : > { %5026 = vmatpush3.bf16.msra.mxu1 %v5454_v22 }
  0x4c   : > { %5010 = vmatmul.mubr.bf16.gmra.mxu0 %v5447_v17  ;;  %v5790_v17 = vsel %vm894_vm13, %v901_v11, %v793_v63  ;;  %5027 = vmatprep.subr.bf16.mxu1 %v5455_v31 }
  0x4d   : > { %5013 = vmatprep.mubr.bf16.mxu0 %v5448_v18  ;;  %v903_v18 = vadd.s32 7, %v821_v9  ;;  %vm922_vm8 = vcmp.ne.s32.totalorder %v5790_v17, 6 }
  0x4e   : > { %vm5805_vm13 = vmpackc.low %vm922_vm8, %vm922_vm8 }
  0x4f   : > { %v5803_v27 = vsel %vm896_vm5, %v903_v18, %v821_v9  ;;  %v7176_v28 = vsel %vm5805_vm13, 4294967295, %v7175_v28  ;;  %v5827_v35 = vsel %vm5805_vm13, 65537, %v5619_v24  ;;  %5028 = vmatpush3.bf16.msra.mxu1 %v5455_v31  ;;  %v5461_v9 = vld [vmem:[%s7121_s3 + $0xa8] sm:$0xff]   ;;  %v2362_v31 = vrot.slane %v2360_v10, 7 }
  0x50   : > { %7177 = vst [vmem:[#allocation4_spill] sm:$0xff] %v7176_v28  ;;  %vm924_vm15 = vcmp.ne.s32.totalorder %v5803_v27, 6  ;;  %v7127_v43 = vrot.slane %v5827_v35, 7  ;;  %v2316_v44 = vshrl.u32 %v5827_v35, 16  ;;  %5029 = vmatprep.subr.bf16.mxu1 %v5456_v39  ;;  %5073 = vmatprep.subr.bf16.mxu0 %v5461_v9 }
  0x51   : > { %vm5836_vm4 = vmpackc.low %vm924_vm15, %vm924_vm15  ;;  %vm920_vm15 = vcmp.ne.s32.totalorder %v913_v32, 0  ;;  %5074 = vmatpush3.bf16.msra.mxu0 %v5461_v9  ;;  %v7201_v32 = vmov 0 }
  0x52   : > { %v7182_v38 = vsel %vm5836_vm4, 4294967295, %v7181_v38  ;;  %v1496_v50 = vrot.slane %v7127_v43, 4  ;;  %v5881_v54 = vsel %vm5836_vm4, 65537, %v5619_v24  ;;  %v5894_v58 = vrot.slane %v2316_v44, 7 }
  0x53   : > { %7183 = vst [vmem:[#allocation6_spill] sm:$0xff] %v7182_v38  ;;  %5030 = vmatpush3.bf16.msra.mxu1 %v5456_v39  ;;  %v1500_v62 = vrot.slane %v5881_v54, 7  ;;  %v2333_v57 = vshrl.u32 %v5881_v54, 16 }
  0x54   : > { %5014 = vmatmul.mubr.bf16.gmra.mxu0 %v5449_v19  ;;  %v873_v19 = vsel %vm872_vm14, 1, %v5619_v24  ;;  %5031 = vmatprep.subr.bf16.mxu1 %v5458_v56  ;;  %v2322_v6 = vrot.slane %v5894_v58, 4 }
  0x55   : > { %5017 = vmatprep.mubr.bf16.mxu0 %v5450_v20  ;;  %v904_v20 = vadd.s32 7, %v835_v12  ;;  %v874_v26 = vadd.s32 %v5780_v8, %v873_v19  ;;  %v1502_v5 = vrot.slane %v1500_v62, 4  ;;  %v5460_v8 = vld [vmem:[%s7121_s3 + $0x48] sm:$0xff]   ;;  %v2363_v19 = vshll.u32 %v5899_v59, 16  ;;  %v6009_v59 = vld [vmem:[%s7121_s3 + $0x38] sm:$0xff]  }
  0x56   : > { %v2335_v9 = vrot.slane %v2333_v57, 7 }
  0x57   : > { %v5809_v29 = vsel %vm897_vm9, %v904_v20, %v835_v12  ;;  %v875_v34 = vshrl.u32 %v874_v26, 2  ;;  %vm2313_vm9 = vsmask.f32 4368  ;;  %5032 = vmatpush3.bf16.msra.mxu1 %v5458_v56  ;;  %v5462_v26 = vld [vmem:[%s7121_s3 + $0x40] sm:$0xff]  }
  0x58   : > { %vm925_vm0 = vcmp.ne.s32.totalorder %v5809_v29, 6  ;;  %5033 = vmatprep.subr.bf16.mxu1 %v5460_v8 }
  0x59   : > { %v876_v41 = vmul.u32 7, %v875_v34  ;;  %vm5846_vm6 = vmpackc.low %vm925_vm0, %vm925_vm0 }
  0x5a   : > { %v7185_v42 = vsel %vm5846_vm6, 4294967295, %v7184_v42  ;;  %v5886_v55 = vsel %vm5846_vm6, 65537, %v5619_v24 }
  0x5b   : > { %7186 = vst [vmem:[#allocation7_spill] sm:$0xff] %v7185_v42  ;;  %v877_v49 = vsub.s32 %v5776_v1, %v876_v41  ;;  %v1503_v1 = vrot.slane %v5886_v55, 7  ;;  %5034 = vmatpush3.bf16.msra.mxu1 %v5460_v8  ;;  %v2342_v36 = vshrl.u32 %v5886_v55, 16  ;;  %v2331_v8 = vrot.slane %v5859_v47, 4 }
  0x5c   : > { %5018 = vmatmul.mubr.bf16.gmra.mxu0 %v5451_v21  ;;  %v912_v21 = vsel %vm898_vm1, %v905_v15, %v849_v4  ;;  %vm1493_vm1 = vcmask 1044484   ;;  %v2329_v15 = vor.u32 %v2327_v51, %v5859_v47  ;;  %5035 = vmatprep.subr.bf16.mxu1 %v5462_v26  ;;  %v2345_v47 = vshll.u32 %v5886_v55, 16 }
  0x5d   : > { %vm926_vm12 = vcmp.ne.s32.totalorder %v912_v21, 6  ;;  %vm919_vm5 = vcmp.ne.s32.totalorder %v912_v21, 0  ;;  %vm5854_vm8 = vmor %vm7124_vm2, %vm1493_vm1  ;;  %vm886_vm0 = vcmp.ne.s32.totalorder %v877_v49, 0  ;;  %vm893_vm1 = vcmp.lt.s32.totalorder %v877_v49, 0 }
  0x5e   : > { %vm5819_vm14 = vmpackc.low %vm926_vm12, %vm926_vm12  ;;  %v907_v60 = vadd.s32 7, %v877_v49  ;;  %v5903_v61 = vsel %vm5854_vm8, %v1496_v50, %v1497_v46  ;;  %v5938_v11 = vsel %vm5854_vm8, %v1499_v0, %v1500_v62  ;;  %v5951_v14 = vsel %vm5854_vm8, %v1502_v5, %v1503_v1 }
  0x5f   : > { %v7179_v33 = vsel %vm5819_vm14, 4294967295, %v7178_v33  ;;  %v5834_v37 = vsel %vm5819_vm14, 65537, %v5619_v24  ;;  %vm5873_vm12 = vmpackc.low %vm919_vm5, %vm919_vm5  ;;  %vm918_vm5 = vcmp.ne.s32.totalorder %v5809_v29, 0  ;;  %v5463_v29 = vld [vmem:[%s7121_s3 + $0xa0] sm:$0xff]   ;;  %vm3304_vm2 = vcmask 1046532   ;;  %5036 = vmatpush3.bf16.msra.mxu1 %v5462_v26 }
  0x60   : > { %7180 = vst [vmem:[#allocation5_spill] sm:$0xff] %v7179_v33  ;;  %v2351_v53 = vshrl.u32 %v5834_v37, 16  ;;  %vm900_vm3 = vmand %vm893_vm1, %vm886_vm0  ;;  %v5910_v63 = vsel %vm5873_vm12, 65537, %v5619_v24  ;;  %v2354_v18 = vshll.u32 %v5834_v37, 16  ;;  %5075 = vmatprep.subr.bf16.mxu0 %v5463_v29  ;;  %v1506_v39 = vrot.slane %v5834_v37, 7  ;;  %5045 = vmatprep.subr.bf16.mxu1 %v6009_v59 }
  0x61   : > { %vm5915_vm0 = vmpackc.low %vm920_vm15, %vm920_vm15  ;;  %v3317_v3 = vrot.slane %v5910_v63, 5  ;;  %v5920_v4 = vsel %vm900_vm3, %v907_v60, %v877_v49  ;;  %vm3303_vm3 = vcmask 1042432   ;;  %v2365_v46 = vor.u32 %v2363_v19, %v2362_v31  ;;  %5076 = vmatpush3.bf16.msra.mxu0 %v5463_v29  ;;  %v5467_v60 = vld [vmem:[%s7121_s3 + $0x98] sm:$0xff]  }
  0x62   : > { %vm5925_vm1 = vmor %vm7125_vm7, %vm2313_vm9  ;;  %v5957_v16 = vsel %vm5915_vm0, 65537, %v5619_v24  ;;  %vm928_vm15 = vcmp.ne.s32.totalorder %v5920_v4, 6  ;;  %v2353_v20 = vrot.slane %v2351_v53, 7  ;;  %v2344_v37 = vrot.slane %v2342_v36, 7  ;;  %5077 = vmatprep.subr.bf16.mxu0 %v5467_v60 }
  0x63   : > { %vm5943_vm9 = vmpackc.low %vm918_vm5, %vm918_vm5  ;;  %v3319_v21 = vrot.slane %v3317_v3, 4  ;;  %v3320_v22 = vrot.slane %v5957_v16, 5  ;;  %v5965_v25 = vsel %vm5925_vm1, %v2322_v6, %v2329_v15  ;;  %v2336_v6 = vshll.u32 %v5881_v54, 16 }
  0x64   : > { %7200 = vst [vmem:[#allocation9_spill] sm:$0xff] %v5965_v25  ;;  %v5976_v30 = vsel %vm5943_vm9, 65537, %v5619_v24  ;;  %vm5978_vm5 = vmpackc.low %vm928_vm15, %vm928_vm15  ;;  %v2358_v44 = vrot.slane %v2353_v20, 4  ;;  %v2356_v51 = vor.u32 %v2354_v18, %v2353_v20  ;;  %v2349_v5 = vrot.slane %v2344_v37, 4 }
  0x65   : > { %v7202_v32 = vsel %vm5978_vm5, 4294967295, %v7201_v32  ;;  %v3314_v34 = vrot.slane %v5976_v30, 5  ;;  %vm5986_vm7 = vmor %vm3303_vm3, %vm3304_vm2  ;;  %v1492_v53 = vsel %vm5978_vm5, 65537, %v5619_v24  ;;  %v1508_v10 = vrot.slane %v1506_v39, 4  ;;  %5078 = vmatpush3.bf16.msra.mxu0 %v5467_v60 }
  0x66   : > { %7203 = vst [vmem:[#allocation10_spill] sm:$0xff] %v7202_v32  ;;  %v5996_v50 = vsel %vm5986_vm7, %v3319_v21, %v3320_v22  ;;  %v6003_v56 = vsel %vm5925_vm1, %v2358_v44, %v2365_v46  ;;  %v1512_v62 = vrot.slane %v1492_v53, 7  ;;  %v1505_v15 = vrot.slane %v1503_v1, 4  ;;  %v5471_v21 = vld [vmem:[%s7121_s3 + $0x90] sm:$0xff]  }
  0x67   : > { %v3316_v49 = vrot.slane %v3314_v34, 4  ;;  %7206 = vst [vmem:[#allocation11_spill] sm:$0xff] %v6003_v56  ;;  %v1511_v18 = vrot.slane %v1509_v40, 4  ;;  %v6025_v19 = vsel %vm5925_vm1, %v2349_v5, %v2356_v51  ;;  %v2338_v20 = vor.u32 %v2336_v6, %v2335_v9  ;;  %5079 = vmatprep.subr.bf16.mxu0 %v5471_v21 }
  0x68   : > { %7207 = vst [vmem:[#allocation12_spill] sm:$0xff] %v6025_v19  ;;  %v2367_v26 = vrot.slane %v2362_v31, 4  ;;  %v6041_v29 = vsel %vm5854_vm8, %v1505_v15, %v1506_v39  ;;  %v6045_v36 = vsel %vm5854_vm8, %v1508_v10, %v1509_v40  ;;  %v2340_v44 = vrot.slane %v2335_v9, 4  ;;  %v5473_v39 = vld [vmem:[%s7121_s3 + $0x88] sm:$0xff]   ;;  %v5474_v40 = vld [vmem:[%s7121_s3 + $0x20] sm:$0xff]  }
  0x69   : > { %v6016_v0 = vsel %vm5986_vm7, %v3316_v49, %v3317_v3  ;;  %v2369_v3 = vshll.u32 %v1492_v53, 16  ;;  %v6029_v54 = vsel %vm5854_vm8, %v1511_v18, %v1512_v62  ;;  %v6037_v1 = vsel %vm5925_vm1, %v2331_v8, %v2338_v20  ;;  %5080 = vmatpush3.bf16.msra.mxu0 %v5471_v21 }
  0x6a   : > { %7208 = vst [vmem:[#allocation13_spill] sm:$0xff] %v6037_v1  ;;  %v2347_v46 = vor.u32 %v2345_v47, %v2344_v37  ;;  %vm915_vm2 = vcmp.ne.s32.totalorder %v5790_v17, 0  ;;  %5081 = vmatprep.subr.bf16.mxu0 %v5473_v39  ;;  %vm916_vm15 = vcmp.ne.s32.totalorder %v5785_v13, 0  ;;  %v6075_v17 = vld [vmem:[%s7121_s3 + $0x138] sm:$0xff]   ;;  %vm917_vm3 = vcmp.ne.s32.totalorder %v5803_v27, 0 }
  0x6b   : > { %v6049_v55 = vsel %vm5925_vm1, %v2367_v26, %v2369_v3  ;;  %vm6062_vm8 = vmpackc.low %vm915_vm2, %vm915_vm2  ;;  %7213 = vst [vmem:[#allocation16_spill] sm:$0xff] %v6075_v17  ;;  %vm1709_vm14 = vsmask.f32 7440  ;;  %vm7149_vm4 = vcmp.ne.s16.totalorder %v6025_v19, 0  ;;  %vm7236_vm10 = vcmp.ne.s16.totalorder %v6037_v1, 0 }
  0x6c   : > { %7209 = vst [vmem:[#allocation14_spill] sm:$0xff] %v6049_v55  ;;  %v6053_v31 = vsel %vm5925_vm1, %v2340_v44, %v2347_v46  ;;  %v6070_v7 = vsel %vm6062_vm8, 65537, %v5619_v24  ;;  %vm6077_vm1 = vmpackc.low %vm916_vm15, %vm916_vm15  ;;  %vm921_vm15 = vcmp.ne.s32.totalorder %v5920_v4, 0  ;;  %v3322_v4 = vrot.slane %v3320_v22, 4 }
  0x6d   : > { %7210 = vst [vmem:[#allocation15_spill] sm:$0xff] %v6053_v31  ;;  %5082 = vmatpush3.bf16.msra.mxu0 %v5473_v39  ;;  %v7126_v37 = vrot.slane %v6070_v7, 5  ;;  %v1702_v13 = vsel %vm6077_vm1, 65537, %v5619_v24  ;;  %vm6089_vm2 = vmpackc.low %vm917_vm3, %vm917_vm3  ;;  %v1715_v20 = vshrl.u32 %v6070_v7, 16  ;;  %vm7237_vm13 = vcmp.ne.s16.totalorder %v6053_v31, 0 }
  0x6e   : > { %5083 = vmatprep.subr.bf16.mxu0 %v5475_v45  ;;  %v3308_v53 = vrot.slane %v1702_v13, 5  ;;  %v1703_v60 = vsel %vm6089_vm2, 65537, %v5619_v24  ;;  %vm6111_vm3 = vmpackc.low %vm921_vm15, %vm921_vm15  ;;  %v1721_v21 = vshll.u32 %v1702_v13, 16  ;;  %v1725_v26 = vshrl.u32 %v1702_v13, 16 }
  0x6f   : > { %v3307_v51 = vrot.slane %v7126_v37, 4  ;;  %v3311_v5 = vrot.slane %v1703_v60, 5  ;;  %v6118_v15 = vsel %vm6111_vm3, 65537, %v5619_v24  ;;  %v6132_v24 = vld [vmem:[%s7120_s2] ss:$0 sm:$0xff]  ;;  %v1717_v41 = vrot.slane %v1715_v20, 4 }
  0x70   : > { %v3310_v62 = vrot.slane %v3308_v53, 4  ;;  %v3323_v18 = vrot.slane %v6118_v15, 5  ;;  %v1731_v13 = vshll.u32 %v1703_v60, 16  ;;  %v1741_v20 = vshll.u32 %v5976_v30, 16 }
  0x71   : > { %5084 = vmatpush3.bf16.msra.mxu0 %v5475_v45  ;;  %v6098_v27 = vsel %vm5986_vm7, %v3307_v51, %v3308_v53  ;;  %v3313_v6 = vrot.slane %v3311_v5, 4  ;;  %v6137_v45 = vrot.slane %v1721_v21, 5  ;;  %v1727_v51 = vrot.slane %v1725_v26, 4 }
  0x72   : > { %5117 = vmatprep.subr.bf16.mxu0 %v6075_v17  ;;  %v6103_v8 = vsel %vm5986_vm7, %v3310_v62, %v3311_v5  ;;  %v6125_v3 = vsel %vm5986_vm7, %v3322_v4, %v3323_v18  ;;  %v6146_v32 = vrot.slane %v1731_v13, 5  ;;  %vm7223_vm15 = vcmask 1040384  }
  0x73   : > { %v6109_v9 = vsel %vm5986_vm7, %v3313_v6, %v3314_v34  ;;  %7221 = vst [vmem:[#allocation18_spill] sm:$0xff] %v6125_v3  ;;  %v1712_v34 = vshll.u32 %v6070_v7, 16  ;;  %v1735_v6 = vshrl.u32 %v1703_v60, 16  ;;  %vm7222_vm7 = vsmask.f32 256 }
  0x74   : > { %7218 = vst [vmem:[#allocation17_spill] sm:$0xff] %v6109_v9  ;;  %vm6153_vm5 = vmand %vm7223_vm15, %vm7222_vm7 }
  0x75   : > { %v6135_v46 = vrot.slane %v1712_v34, 5  ;;  %v1728_v34 = vor.u32 %v1727_v51, %v6137_v45  ;;  %v1737_v60 = vrot.slane %v1735_v6, 4  ;;  %v668_v51 = vld [vmem:[#allocation2 + $0x1c] sm:$0x1]  ;;  %v1755_v6 = vshrl.u32 %v5910_v63, 16  ;;  %vm6173_vm7 = vmor %vm1708_vm11, %vm1709_vm14 }
  0x76   : > { %vm7138_vm14 = vcmp.ne.s16.totalorder %v5965_v25, 0 }
  0x77   : > { %v1718_v37 = vor.u32 %v1717_v41, %v6135_v46  ;;  %v2319_v41 = vshll.u32 %v5827_v35, 16  ;;  %v6157_v13 = vrot.slane %v1728_v34, 4  ;;  %vm7140_vm15 = vcmp.ne.s16.totalorder %v6135_v46, 0 }
  0x79   : > { %v6165_v42 = vor.u32 %v2319_v41, %v5894_v58  ;;  %v1757_v58 = vrot.slane %v1755_v6, 4 }
  0x7b   : > { %7227 = vst [vmem:[#allocation20_spill] sm:$0xff] %v6165_v42  ;;  %vm7139_vm6 = vcmp.ne.s16.totalorder %v6165_v42, 0 }
  0xec   : > { %v4995_v47 = vpop.f32.mrf.mxu0 }
  0xed   : > { %v454_v53 = vadd.f32 %v4995_v47, %v6132_v24 }
  0xee   : > { %v445_v44 = vpop.f32.mrf.mxu0 }
  0xef   : > { %v446_v22 = vadd.f32 %v6132_v24, %v445_v44  ;;  %v558_v44 = vmax.f32 %v454_v53, 0.0  ;;  %v1719_v53 = vrot.slane %v1718_v37, 4 }
  0xf0   : > { %v4996_v39 = vpop.f32.mrf.mxu0 }
  0xf1   : > { %v556_v62 = vmax.f32 %v446_v22, 0.0  ;;  %v457_v21 = vadd.f32 %v4996_v39, %v6132_v24  ;;  %v7224_v39 = vmov 0 }
  0xf2   : > { %v448_v5 = vpop.f32.mrf.mxu0  ;;  %v7225_v39 = vsel %vm6153_vm5, 4294967295, %v7224_v39 }
  0xf3   : > { %v4651_v4 = vpack.c.bf16 %v556_v62, %v556_v62  ;;  %v449_v18 = vadd.f32 %v6132_v24, %v448_v5  ;;  %v1745_v62 = vshrl.u32 %v5976_v30, 16  ;;  %7226 = vst [vmem:[#allocation19_spill] sm:$0xff] %v7225_v39  ;;  %v1751_v30 = vshll.u32 %v5910_v63, 16 }
  0xf4   : > { %v4999_v43 = vpop.f32.mrf.mxu0 }
  0xf5   : > { %659 = vst [vmem:[#allocation2 + $0x4] sm:$0xf] %v4651_v4  ;;  %v557_v26 = vmax.f32 %v449_v18, 0.0  ;;  %v470_v47 = vadd.f32 %v4999_v43, %v6132_v24  ;;  %v559_v4 = vmax.f32 %v457_v21, 0.0  ;;  %v1761_v21 = vshll.u32 %v5957_v16, 16 }
  0xf6   : > { %v461_v22 = vpop.f32.mrf.mxu0 }
  0xf7   : > { %v4689_v5 = vpack.c.bf16 %v558_v44, %v557_v26  ;;  %v562_v48 = vmax.f32 %v470_v47, 0.0  ;;  %v462_v33 = vadd.f32 %v6132_v24, %v461_v22  ;;  %v1738_v26 = vor.u32 %v1737_v60, %v6146_v32 }
  0xf8   : > { %v5000_v43 = vpop.f32.mrf.mxu0  ;;  %v6162_v47 = vrot.slane %v1741_v20, 5  ;;  %v1747_v22 = vrot.slane %v1745_v62, 4  ;;  %v6177_v60 = vrot.slane %v1751_v30, 5  ;;  %v1765_v62 = vshrl.u32 %v5957_v16, 16 }
  0xf9   : > { %4751 = vst [vmem:[#allocation2 + $0x8] sm:$0xff] %v4689_v5   ;;  %v4657_v18 = vpack.c.bf16 %v562_v48, %v562_v48  ;;  %v560_v44 = vmax.f32 %v462_v33, 0.0  ;;  %v473_v33 = vadd.f32 %v5000_v43, %v6132_v24  ;;  %v1734_v16 = vsel %vm6173_vm7, %v6157_v13, %v6146_v32 }
  0xfa   : > { %v464_v37 = vpop.f32.mrf.mxu0 }
  0xfb   : > { %v669_v34 = vsel %vm6153_vm5, %v4657_v18, %v668_v51  ;;  %v4694_v38 = vpack.c.bf16 %v560_v44, %v559_v4  ;;  %v465_v63 = vadd.f32 %v6132_v24, %v464_v37  ;;  %v1739_v51 = vrot.slane %v1738_v26, 4  ;;  %v1694_v44 = vld [vmem:[#allocation2 + $0x24] sm:$0x8] }
  0xfc   : > { %670 = vst [vmem:[#allocation2 + $0x1c] sm:$0x1] %v669_v34  ;;  %v5003_v48 = vpop.f32.mrf.mxu0  ;;  %v1748_v4 = vor.u32 %v1747_v22, %v6162_v47  ;;  %v1983_v43 = vld [vmem:[#allocation2 + $0x4] sm:$0xf]  ;;  %v563_v6 = vmax.f32 %v473_v33, 0.0  ;;  %v1758_v26 = vor.u32 %v1757_v58, %v6177_v60  ;;  %v6193_v22 = vrot.slane %v1761_v21, 5 }
  0xfd   : > { %4752 = vst [vmem:[#allocation2 + $0x10] sm:$0xff] %v4694_v38   ;;  %v561_v41 = vmax.f32 %v465_v63, 0.0  ;;  %v1724_v38 = vsel %vm6173_vm7, %v1719_v53, %v6137_v45  ;;  %v1767_v34 = vrot.slane %v1765_v62, 4  ;;  %v2379_v45 = vsel %vm7139_vm6, %v1983_v43, 0 }
  0xfe   : > { %v477_v5 = vpop.f32.mrf.mxu0  ;;  %v1744_v32 = vsel %vm6173_vm7, %v1739_v51, %v6162_v47  ;;  %vm6203_vm11 = vcmp.ne.s16.totalorder %v1724_v38, 0  ;;  %v6209_v21 = vsel %vm7140_vm15, %v1694_v44, 0  ;;  %v6211_v33 = vrot.slane %v1748_v4, 4 }
  0xff   : > { %v4656_v18 = vpack.c.bf16 %v561_v41, %v561_v41  ;;  %v478_v30 = vadd.f32 %v6132_v24, %v477_v5  ;;  %v486_v41 = vadd.f32 %v5003_v48, %v6132_v24  ;;  %v1759_v51 = vrot.slane %v1758_v26, 4 }
 0x100   : > { %v5004_v37 = vpop.f32.mrf.mxu0  ;;  %v1984_v63 = vld [vmem:[#allocation2 + $0x8] sm:$0xf]  ;;  %v6216_v43 = vld [vmem:[#allocation2 + $0xc] sm:$0xf]  ;;  %vm6231_vm6 = vcmp.ne.s16.totalorder %v1744_v32, 0  ;;  %vm7150_vm15 = vcmp.ne.s16.totalorder %v6049_v55, 0 }
 0x101   : > { %664 = vst [vmem:[#allocation2 + $0x18] sm:$0xf] %v4656_v18  ;;  %v564_v5 = vmax.f32 %v478_v30, 0.0  ;;  %v2380_v53 = vsel %vm7138_vm14, %v1984_v63, 0  ;;  %v1768_v18 = vor.u32 %v1767_v34, %v6193_v22  ;;  %v1771_v30 = vshll.u32 %v6118_v15, 16  ;;  %v5483_v55 = vld [vmem:[%s7121_s3 + $0x8] sm:$0xff]  }
 0x102   : > { %v480_v23 = vpop.f32.mrf.mxu0  ;;  %v6213_v48 = vcombine.low %v2379_v45, %v2380_v53  ;;  %v566_v4 = vmax.f32 %v486_v41, 0.0  ;;  %vm6227_vm14 = vcmp.ne.s16.totalorder %v1734_v16, 0  ;;  %v7234_v34 = vmov 0 }
 0x103   : > { %v4699_v58 = vpack.c.bf16 %v564_v5, %v563_v6  ;;  %v481_v62 = vadd.f32 %v6132_v24, %v480_v23  ;;  %v489_v23 = vadd.f32 %v5004_v37, %v6132_v24  ;;  %v7232_v5 = vmov 0  ;;  %v1989_v32 = vld [vmem:[#allocation2 + $0x1c] sm:$0x1] }
 0x104   : > { %v5007_v47 = vpop.f32.mrf.mxu0  ;;  %v6222_v44 = vld [vmem:[#allocation2 + $0x10] sm:$0xf]  ;;  %v7233_v5 = vsel %vm6227_vm14, 4294967295, %v7232_v5  ;;  %v7235_v34 = vsel %vm6231_vm6, 4294967295, %v7234_v34  ;;  %v2381_v15 = vsel %vm7236_vm10, %v6216_v43, 0  ;;  %v1764_v28 = vsel %vm6173_vm7, %v1759_v51, %v6193_v22 }
 0x105   : > { %4753 = vst [vmem:[#allocation2 + $0x28] sm:$0xff] %v4699_v58   ;;  %v565_v38 = vmax.f32 %v481_v62, 0.0  ;;  %v502_v6 = vadd.f32 %v5007_v47, %v6132_v24  ;;  %v2382_v16 = vsel %vm7237_vm13, %v6222_v44, 0  ;;  %v6244_v53 = vld [vmem:[#allocation2 + $0x14] sm:$0xf]  ;;  %v1754_v47 = vsel %vm6173_vm7, %v6211_v33, %v6177_v60 }
 0x106   : > { %v493_v26 = vpop.f32.mrf.mxu0  ;;  %v6246_v58 = vcombine.low %v2381_v15, %v2382_v16  ;;  %v1769_v31 = vrot.slane %v1768_v18, 4  ;;  %v567_v15 = vmax.f32 %v489_v23, 0.0  ;;  %v1773_v25 = vrot.slane %v1771_v30, 5  ;;  %v3505_v60 = vld [vmem:[#allocation2 + $0x4] sm:$0x8] }
 0x107   : > { %v4704_v37 = vpack.c.bf16 %v566_v4, %v565_v38  ;;  %v570_v41 = vmax.f32 %v502_v6, 0.0  ;;  %v494_v45 = vadd.f32 %v6132_v24, %v493_v26  ;;  %v6255_v4 = vld [vmem:[#allocation2 + $0x48] sm:$0xe]  ;;  %v7239_v38 = vrot.slane %v5827_v35, 7 }
 0x108   : > { %7238 = vst [vmem:[#allocation21_spill] sm:$0xff] %v6246_v58  ;;  %v5008_v62 = vpop.f32.mrf.mxu0  ;;  %v1988_v26 = vld [vmem:[#allocation2 + $0x18] sm:$0xf]  ;;  %v6263_v42 = vcombine.low %v3505_v60, %v1984_v63  ;;  %v2383_v22 = vsel %vm7149_vm4, %v6244_v53, 0  ;;  %vm7243_vm13 = vcmp.ne.s16.totalorder %v6003_v56, 0  ;;  %v2385_v51 = vsel %vm7150_vm15, %v1989_v32, 0 }
 0x109   : > { %vm6259_vm10 = vcmp.ne.s16.totalorder %v7239_v38, 0  ;;  %4754 = vst [vmem:[#allocation2 + $0x30] sm:$0xff] %v4704_v37   ;;  %v4665_v16 = vpack.c.bf16 %v570_v41, %v570_v41  ;;  %v568_v1 = vmax.f32 %v494_v45, 0.0  ;;  %v2384_v35 = vsel %vm7243_vm13, %v1988_v26, 0  ;;  %v2574_v37 = vld [vmem:[#allocation2 + $0x6c] sm:$0x8] }
 0x10a   : > { %v496_v33 = vpop.f32.mrf.mxu0  ;;  %7242 = vst [vmem:[#allocation22_spill] sm:$0xff] %v6263_v42  ;;  %v6273_v30 = vcombine.low %v2383_v22, %v2384_v35  ;;  %v2424_v63 = vshll.u32 %v6213_v48, 16  ;;  %v505_v41 = vadd.f32 %v5008_v62, %v6132_v24  ;;  %vm6277_vm4 = vcmp.ne.s16.totalorder %v1764_v28, 0 }
 0x10b   : > { %731 = vst [vmem:[#allocation2 + $0x4c] sm:$0xf] %v4665_v16  ;;  %v4709_v18 = vpack.c.bf16 %v568_v1, %v567_v15  ;;  %v497_v23 = vadd.f32 %v6132_v24, %v496_v33  ;;  %v6285_v15 = vld [vmem:[#allocation2 + $0x6c] sm:$0xf]  ;;  %v1774_v28 = vsel %vm6173_vm7, %v1769_v31, %v1773_v25  ;;  %v702_v33 = vld [vmem:[#allocation2 + $0x40] sm:$0x1] }
 0x10c   : > { %v5011_v45 = vpop.f32.mrf.mxu0  ;;  %v1695_v38 = vld [vmem:[#allocation2 + $0x28] sm:$0xf]  ;;  %v1696_v16 = vld [vmem:[#allocation2 + $0x2c] sm:$0xf]  ;;  %vm6294_vm15 = vcmp.ne.s16.totalorder %v1754_v47, 0  ;;  %vm7248_vm13 = vcmp.ne.s16.totalorder %v6135_v46, 0 }
 0x10d   : > { %4755 = vst [vmem:[#allocation2 + $0x38] sm:$0xff] %v4709_v18   ;;  %v569_v32 = vmax.f32 %v497_v23, 0.0  ;;  %v1783_v62 = vsel %vm6203_vm11, %v1695_v38, 0  ;;  %v6300_v18 = vsel %vm7248_vm13, %v2574_v37, 0  ;;  %v6302_v23 = vcombine.low %v2385_v51, %v2385_v51 }
 0x10e   : > { %v509_v22 = vpop.f32.mrf.mxu0  ;;  %v3531_v38 = vshrl.u32 %v6263_v42, 16  ;;  %v6307_v1 = vrot.slane %v2424_v63, 1  ;;  %v571_v35 = vmax.f32 %v505_v41, 0.0  ;;  %v518_v47 = vadd.f32 %v5011_v45, %v6132_v24  ;;  %v966_v42 = vld [vmem:[#allocation2 + $0x48] sm:$0xf] }
 0x10f   : > { %7249 = vst [vmem:[#allocation23_spill] sm:$0xff] %v6302_v23  ;;  %v4664_v20 = vpack.c.bf16 %v569_v32, %v569_v32  ;;  %v510_v25 = vadd.f32 %v6132_v24, %v509_v22  ;;  %v1784_v46 = vsel %vm6227_vm14, %v1696_v16, 0  ;;  %v4325_v51 = vcombine.low %v6209_v21, %v1783_v62 }
 0x110   : > { %v5012_v56 = vpop.f32.mrf.mxu0  ;;  %v1697_v19 = vld [vmem:[#allocation2 + $0x30] sm:$0xf]  ;;  %vm6318_vm7 = vcmp.ne.s16.totalorder %v1774_v28, 0  ;;  %v7250_v41 = vmov 0  ;;  %v6323_v21 = vcombine.low %v6244_v53, %v1988_v26  ;;  %vm7254_vm13 = vcmp.ne.s16.totalorder %v5903_v61, 0 }
 0x111   : > { %v703_v37 = vsel %vm6153_vm5, %v4664_v20, %v702_v33  ;;  %v572_v32 = vmax.f32 %v510_v25, 0.0  ;;  %v521_v22 = vadd.f32 %v5012_v56, %v6132_v24  ;;  %v1785_v63 = vsel %vm6231_vm6, %v1697_v19, 0 }
 0x112   : > { %v7251_v41 = vsel %vm6318_vm7, 4294967295, %v7250_v41  ;;  %704 = vst [vmem:[#allocation2 + $0x40] sm:$0x1] %v703_v37  ;;  %v512_v45 = vpop.f32.mrf.mxu0  ;;  %v967_v31 = vld [vmem:[#allocation2 + $0x4c] sm:$0xf]  ;;  %v4326_v16 = vcombine.low %v1784_v46, %v1785_v63  ;;  %v6326_v33 = vrot.slane %v3531_v38, 3 }
 0x113   : > { %7252 = vst [vmem:[#allocation24_spill] sm:$0xff] %v7251_v41  ;;  %v4714_v56 = vpack.c.bf16 %v572_v32, %v571_v35  ;;  %v575_v20 = vmax.f32 %v521_v22, 0.0  ;;  %v513_v25 = vadd.f32 %v6132_v24, %v512_v45  ;;  %v6330_v3 = vcombine.low %v966_v42, %v967_v31  ;;  %v1698_v45 = vld [vmem:[#allocation2 + $0x34] sm:$0xf] }
 0x114   : > { %7253 = vst [vmem:[#allocation25_spill] sm:$0xff] %v6326_v33  ;;  %v5015_v28 = vpop.f32.mrf.mxu0  ;;  %v1826_v37 = vshrl.u32 %v4325_v51, 16  ;;  %v1829_v17 = vshll.u32 %v4325_v51, 16  ;;  %v1699_v9 = vld [vmem:[#allocation2 + $0x38] sm:$0xf]  ;;  %v1522_v53 = vsel %vm7254_vm13, %v967_v31, 0 }
 0x115   : > { %v574_v26 = vmax.f32 %v518_v47, 0.0  ;;  %4756 = vst [vmem:[#allocation2 + $0x50] sm:$0xff] %v4714_v56   ;;  %v4670_v46 = vpack.c.bf16 %v575_v20, %v575_v20  ;;  %v573_v38 = vmax.f32 %v513_v25, 0.0  ;;  %v534_v32 = vadd.f32 %v5015_v28, %v6132_v24  ;;  %v6348_v20 = vld [vmem:[#allocation2 + $0x2c] sm:$0xf] }
 0x116   : > { %v525_v22 = vpop.f32.mrf.mxu0  ;;  %v1834_v63 = vshrl.u32 %v4326_v16, 16  ;;  %v1837_v42 = vshll.u32 %v4326_v16, 16  ;;  %v1787_v31 = vsel %vm6277_vm4, %v1699_v9, 0  ;;  %v7255_v47 = vsel %vm6259_vm10, %v6255_v4, 0  ;;  %7256 = vst [vmem:[#allocation26_spill] sm:$0xff] %v6348_v20 }
 0x117   : > { %736 = vst [vmem:[#allocation2 + $0x60] sm:$0xf] %v4670_v46  ;;  %v4719_v62 = vpack.c.bf16 %v574_v26, %v573_v38  ;;  %v526_v61 = vadd.f32 %v6132_v24, %v525_v22  ;;  %v6346_v56 = vcombine.low %v7255_v47, %v1522_v53  ;;  %v1012_v25 = vshll.u32 %v6330_v3, 16  ;;  %v6355_v46 = vld [vmem:[#allocation2 + $0x28] sm:$0x8] }
 0x118   : > { %v5016_v16 = vpop.f32.mrf.mxu0  ;;  %v6351_v28 = vrot.slane %v1826_v37, 3  ;;  %v6353_v26 = vrot.slane %v1829_v17, 4  ;;  %7257 = vst [vmem:[#allocation27_spill] sm:$0xff] %v6355_v46  ;;  %v1786_v4 = vsel %vm6294_vm15, %v1698_v45, 0  ;;  %v1700_v6 = vld [vmem:[#allocation2 + $0x3c] sm:$0xf]  ;;  %v6362_v53 = vcombine.low %v6216_v43, %v6222_v44 }
 0x119   : > { %4757 = vst [vmem:[#allocation2 + $0x58] sm:$0xff] %v4719_v62   ;;  %v576_v38 = vmax.f32 %v526_v61, 0.0  ;;  %v737_v22 = vld [vmem:[#allocation2 + $0x64] sm:$0x1]  ;;  %vm7170_vm10 = vsmask.f32 7424  ;;  %v6365_v19 = vcombine.low %v1786_v4, %v1787_v31  ;;  %v537_v45 = vadd.f32 %v5016_v16, %v6132_v24 }
 0x11a   : > { %7258 = vst [vmem:[#allocation28_spill] sm:$0xff] %v6362_v53  ;;  %v528_v47 = vpop.f32.mrf.mxu0  ;;  %v1010_v17 = vshrl.u32 %v6330_v3, 16  ;;  %v1836_v37 = vrot.slane %v1834_v63, 3  ;;  %v1839_v35 = vrot.slane %v1837_v42, 4  ;;  %v578_v62 = vmax.f32 %v534_v32, 0.0 }
 0x11b   : > { %v4671_v61 = vpack.c.bf16 %v576_v38, %v576_v38  ;;  %v529_v9 = vadd.f32 %v6132_v24, %v528_v47  ;;  %v1014_v3 = vrot.slane %v1012_v25, 1  ;;  %v1788_v63 = vsel %vm6318_vm7, %v1700_v6, 0 }
 0x11c   : > { %v5019_v43 = vpop.f32.mrf.mxu0  ;;  %v968_v44 = vld [vmem:[#allocation2 + $0x50] sm:$0xf]  ;;  %v969_v51 = vld [vmem:[#allocation2 + $0x54] sm:$0xf]  ;;  %v6376_v42 = vcombine.low %v6355_v46, %v6348_v20  ;;  %v7260_v32 = vshrl.u32 %v6213_v48, 16  ;;  %v6391_v53 = vor.u32 %v1839_v35, %v1836_v37  ;;  %vm7262_vm14 = vcmp.ne.s16.totalorder %v5938_v11, 0 }
 0x11d   : > { %v738_v16 = vsel %vm6153_vm5, %v4671_v61, %v737_v22  ;;  %v577_v38 = vmax.f32 %v529_v9, 0.0  ;;  %v4230_v4 = vcombine.low %v968_v44, %v969_v51  ;;  %v550_v6 = vadd.f32 %v5019_v43, %v6132_v24 }
 0x11e   : > { %7259 = vst [vmem:[#allocation29_spill] sm:$0xff] %v6376_v42  ;;  %v6381_v31 = vor.u32 %v6307_v1, %v7260_v32  ;;  %739 = vst [vmem:[#allocation2 + $0x64] sm:$0x1] %v738_v16  ;;  %v541_v47 = vpop.f32.mrf.mxu0  ;;  %v6387_v33 = vld [vmem:[#allocation2 + $0x60] ss:$0 sps:$4 sm:$0x11]   ;;  %v1015_v25 = vor.u32 %v1014_v3, %v1010_v17  ;;  %v6398_v23 = vcombine.low %v1788_v63, %v1788_v63 }
 0x11f   : > { %v1843_v1 = vshrl.u32 %v6365_v19, 16  ;;  %v579_v32 = vmax.f32 %v537_v45, 0.0  ;;  %v4724_v22 = vpack.c.bf16 %v578_v62, %v577_v38  ;;  %v542_v9 = vadd.f32 %v6132_v24, %v541_v47 }
 0x120   : > { %7261 = vst [vmem:[#allocation30_spill] sm:$0xff] %v6381_v31  ;;  %v1017_v61 = vshll.u32 %v4230_v4, 16  ;;  %v5020_v42 = vpop.f32.mrf.mxu0  ;;  %v970_v16 = vld [vmem:[#allocation2 + $0x58] sm:$0xf]  ;;  %v971_v20 = vld [vmem:[#allocation2 + $0x5c] sm:$0xf] }
 0x121   : > { %v1523_v43 = vsel %vm7262_vm14, %v968_v44, 0  ;;  %v1846_v46 = vshll.u32 %v6365_v19, 16  ;;  %4758 = vst [vmem:[#allocation2 + $0x70] sm:$0xff] %v4724_v22   ;;  %v580_v35 = vmax.f32 %v542_v9, 0.0  ;;  %v553_v37 = vadd.f32 %v5020_v42, %v6132_v24  ;;  %v1478_v9 = vld [vmem:[#allocation2 + $0x60] sm:$0x3] }
 0x122   : > { %v1019_v62 = vrot.slane %v1017_v61, 1  ;;  %v4231_v45 = vcombine.low %v970_v16, %v971_v20  ;;  %v582_v17 = vmax.f32 %v550_v6, 0.0  ;;  %v544_v3 = vpop.f32.mrf.mxu0  ;;  %v1021_v38 = vshrl.u32 %v4230_v4, 16  ;;  %v771_v42 = vld [vmem:[#allocation2 + $0x88] sm:$0x1] }
 0x123   : > { %v1033_v11 = vshll.u32 %v6387_v33, 16  ;;  %vm7263_vm14 = vcmp.ne.s16.totalorder %v5951_v14, 0  ;;  %v4729_v44 = vpack.c.bf16 %v580_v35, %v579_v32  ;;  %v583_v63 = vmax.f32 %v553_v37, 0.0  ;;  %v2153_v37 = vld [vmem:[#allocation2 + $0x3c] sm:$0xf] }
 0x124   : > { %v1524_v19 = vsel %vm7263_vm14, %v969_v51, 0  ;;  %v545_v47 = vadd.f32 %v6132_v24, %v544_v3  ;;  %v1020_v22 = vsel %vm7170_vm10, %v1015_v25, %v1019_v62  ;;  %v1023_v61 = vor.u32 %v1021_v38, %v1019_v62  ;;  %v2152_v51 = vld [vmem:[#allocation2 + $0x38] sm:$0xf] }
 0x125   : > { %5037 = vmatprep.mubr.bf16.mxu1 %v1020_v22  ;;  %v1025_v48 = vshll.u32 %v4231_v45, 16  ;;  %v4298_v41 = vcombine.low %v1523_v43, %v1524_v19  ;;  %4759 = vst [vmem:[#allocation2 + $0x78] sm:$0xff] %v4729_v44   ;;  %v4678_v4 = vpack.c.bf16 %v583_v63, %v583_v63  ;;  %v1029_v58 = vshrl.u32 %v4231_v45, 16  ;;  %v6449_v22 = vld [vmem:[#allocation2 + $0x30] sm:$0xf] }
 0x126   : > { %v581_v31 = vmax.f32 %v545_v47, 0.0  ;;  %vm7264_vm14 = vcmp.ne.s16.totalorder %v6041_v29, 0  ;;  %vm7265_vm13 = vcmp.ne.s16.totalorder %v6045_v36, 0  ;;  %vm7266_vm6 = vcmp.ne.s16.totalorder %v6029_v54, 0  ;;  %v5470_v29 = vld [vmem:[%s7121_s3 + $0x30] sm:$0xff]  }
 0x127   : > { %v1525_v14 = vsel %vm7264_vm14, %v970_v16, 0  ;;  %v1027_v32 = vrot.slane %v1025_v48, 1  ;;  %v1565_v24 = vrot.slane %v4298_v41, 1  ;;  %v1526_v25 = vsel %vm7265_vm13, %v971_v20, 0 }
 0x128   : > { %v1527_v35 = vsel %vm7266_vm6, %v1478_v9, 0  ;;  %v772_v43 = vsel %vm6153_vm5, %v4678_v4, %v771_v42  ;;  %v4734_v62 = vpack.c.bf16 %v582_v17, %v581_v31  ;;  %v1035_v3 = vrot.slane %v1033_v11, 1  ;;  %v6421_v20 = vld [vmem:[#allocation2 + $0x70] sm:$0xf]  ;;  %v6441_v19 = vld [vmem:[#allocation2 + $0x74] sm:$0xf] }
 0x129   : > { %vm1824_vm14 = vsmask.f32 4352  ;;  %v4299_v16 = vcombine.low %v1525_v14, %v1526_v25  ;;  %773 = vst [vmem:[#allocation2 + $0x88] sm:$0x1] %v772_v43  ;;  %v1028_v41 = vsel %vm7170_vm10, %v1023_v61, %v1027_v32  ;;  %v1031_v36 = vor.u32 %v1029_v58, %v1027_v32  ;;  %v6461_v14 = vld [vmem:[#allocation2 + $0x34] sm:$0xf] }
 0x12a   : > { %v7267_v54 = vrot.slane %v6346_v56, 1  ;;  %vm7268_vm6 = vcmask 1046528   ;;  %v4300_v45 = vcombine.low %v1527_v35, %v1527_v35  ;;  %4760 = vst [vmem:[#allocation2 + $0x80] sm:$0xff] %v4734_v62   ;;  %5038 = vmatmul.mubr.bf16.vlgmr.msra.gmra.mxu1 %v1028_v41  ;;  %v4269_v31 = vcombine.low %v6285_v15, %v6421_v20  ;;  %v5472_v56 = vld [vmem:[%s7121_s3 + $0x28] sm:$0xff]  }
 0x12b   : > { %v6430_v17 = vrot.slane %v1843_v1, 3  ;;  %v6432_v38 = vrot.slane %v1846_v46, 4  ;;  %v6434_v11 = vcombine.low %v2152_v51, %v2153_v37  ;;  %5046 = vmatpush3.bf16.msra.mxu1 %v6009_v59  ;;  %v1036_v58 = vsel %vm7170_vm10, %v1031_v36, %v1035_v3 }
 0x12c   : > { %v6426_v48 = vsel %vm7268_vm6, %v7267_v54, %v1565_v24  ;;  %v944_v44 = vsel %vm6077_vm1, %v6421_v20, 0  ;;  %v1567_v1 = vrot.slane %v4299_v16, 1  ;;  %v6446_v63 = vrot.slane %v4300_v45, 1  ;;  %5041 = vmatprep.mubr.bf16.mxu1 %v1036_v58  ;;  %5047 = vmatprep.subr.bf16.mxu1 %v5470_v29  ;;  %v932_v42 = vld [vmem:[#allocation2 + $0x78] sm:$0xf]  ;;  %vm7270_vm1 = vmmov %vm7268_vm6 }
 0x12d   : > { %v1037_v46 = vshrl.u32 %v6387_v33, 16  ;;  %v1325_v59 = vshrl.u32 %v4269_v31, 16  ;;  %v1327_v47 = vshll.u32 %v4269_v31, 16  ;;  %vm7269_vm13 = vcmp.ne.s16.totalorder %v6016_v0, 0  ;;  %v6466_v0 = vld [vmem:[#allocation2 + $0x7c] sm:$0xf] }
 0x12e   : > { %v3336_v9 = vsel %vm7269_vm13, %v2152_v51, 0  ;;  %v6455_v49 = vsel %vm7268_vm6, %v1565_v24, %v1567_v1  ;;  %v6459_v4 = vsel %vm7270_vm1, %v1567_v1, %v6446_v63  ;;  %vm7271_vm10 = vcmp.ne.s16.totalorder %v5996_v50, 0 }
 0x12f   : > { %v3337_v33 = vsel %vm7271_vm10, %v2153_v37, 0  ;;  %v4270_v32 = vcombine.low %v6441_v19, %v932_v42  ;;  %v1329_v25 = vrot.slane %v1327_v47, 1  ;;  %v7272_v51 = vsel %vm6062_vm8, %v6285_v15, 0  ;;  %5048 = vmatpush3.bf16.msra.mxu1 %v5470_v29 }
 0x130   : > { %v4241_v24 = vcombine.low %v7272_v51, %v944_v44  ;;  %v945_v35 = vsel %vm6089_vm2, %v6441_v19, 0  ;;  %v946_v43 = vsel %vm5943_vm9, %v932_v42, 0  ;;  %v2580_v50 = vsel %vm6294_vm15, %v6466_v0, 0  ;;  %5049 = vmatprep.subr.bf16.mxu1 %v5472_v56 }
 0x131   : > { %v4551_v37 = vcombine.low %v3336_v9, %v3337_v33  ;;  %v3729_v62 = vshrl.u32 %v6434_v11, 16  ;;  %v1330_v15 = vor.u32 %v1329_v25, %v1325_v59  ;;  %v1332_v3 = vshll.u32 %v4270_v32, 16  ;;  %v934_v29 = vld [vmem:[#allocation2 + $0x80] sm:$0xf]  ;;  %v935_v16 = vld [vmem:[#allocation2 + $0x84] sm:$0x1] }
 0x132   : > { %v1336_v57 = vshrl.u32 %v4270_v32, 16  ;;  %v947_v12 = vsel %vm5873_vm12, %v6466_v0, 0  ;;  %v7273_v41 = vor.u32 %v6353_v26, %v6351_v28  ;;  %v6496_v54 = vcombine.low %v6449_v22, %v6461_v14  ;;  %5042 = vmatmul.mubr.bf16.gmra.mxu1 %v1037_v46 }
 0x133   : > { %v3732_v45 = vshll.u32 %v6434_v11, 16  ;;  %v2577_v52 = vsel %vm6203_vm11, %v6421_v20, 0  ;;  %v1334_v31 = vrot.slane %v1332_v3, 1  ;;  %v4271_v58 = vcombine.low %v6466_v0, %v934_v29  ;;  %5050 = vmatpush3.bf16.msra.mxu1 %v5472_v56  ;;  %5061 = vmatprep.mubr.bf16.mxu1 %v4241_v24  ;;  %v5476_v20 = vld [vmem:[%s7121_s3 + $0x18] sm:$0xff]   ;;  %v7281_v3 = vld [vmem:[#allocation17_spill] sm:$0xff] }
 0x134   : > { %v6492_v36 = vsel %vm1824_vm14, %v7273_v41, %v6391_v53  ;;  %v6503_v44 = vcombine.low %v935_v16, %v935_v16  ;;  %v948_v28 = vsel %vm5915_vm0, %v934_v29, 0  ;;  %v6507_v26 = vcombine.low %v945_v35, %v946_v43  ;;  %5051 = vmatprep.subr.bf16.mxu1 %v5474_v40 }
 0x135   : > { %v2581_v1 = vsel %vm6277_vm4, %v934_v29, 0  ;;  %v6511_v59 = vrot.slane %v4551_v37, 3  ;;  %v6513_v13 = vrot.slane %v3729_v62, 3  ;;  %vm7274_vm12 = vsmask.f32 7424 }
 0x136   : > { %v1335_v46 = vsel %vm7274_vm12, %v1330_v15, %v1334_v31  ;;  %v1338_v2 = vor.u32 %v1336_v57, %v1334_v31  ;;  %v1340_v47 = vshll.u32 %v4271_v58, 16  ;;  %v1344_v56 = vshrl.u32 %v4271_v58, 16  ;;  %vm7282_vm11 = vmmov %vm7274_vm12  ;;  %v2575_v58 = vld [vmem:[#allocation2 + $0x84] sm:$0xf] }
 0x137   : > { %5085 = vmatprep.mubr.bf16.mxu0 %v1335_v46  ;;  %v1348_v9 = vshll.u32 %v6503_v44, 16  ;;  %v6520_v33 = vcombine.low %v947_v12, %v948_v28  ;;  %v6524_v60 = vsel %vm6111_vm3, %v935_v16, 0  ;;  %vm7275_vm4 = vnez %v7233_v5  ;;  %5052 = vmatpush3.bf16.msra.mxu1 %v5474_v40  ;;  %v5482_v5 = vld [vmem:[%s7121_s3 + $0x130] sm:$0xff]   ;;  %v7286_v28 = vld [vmem:[#allocation16_spill] sm:$0xff]  ;;  %vm7287_vm10 = vmmov %vm7282_vm11 }
 0x138   : > { %v2578_v32 = vsel %vm7275_vm4, %v6441_v19, 0  ;;  %v7276_v25 = vrot.slane %v6070_v7, 5  ;;  %vm3326_vm9 = vcmp.ne.s16.totalorder %v6098_v27, 0  ;;  %v1342_v24 = vrot.slane %v1340_v47, 1  ;;  %5053 = vmatprep.subr.bf16.mxu1 %v5476_v20  ;;  %vm7289_vm13 = vmmov %vm7287_vm10 }
 0x139   : > { %v6536_v35 = vrot.slane %v3732_v45, 4  ;;  %vm7279_vm8 = vnez %v7235_v34  ;;  %v4437_v43 = vcombine.low %v6300_v18, %v2577_v52  ;;  %v1350_v7 = vrot.slane %v1348_v9, 1  ;;  %v5481_v18 = vld [vmem:[%s7121_s3 + $0x10] sm:$0xff]   ;;  %v7284_v45 = vld [vmem:[#allocation21_spill] sm:$0xff]  ;;  %v5485_v9 = vld [vmem:[%s7121_s3 + $0x128] sm:$0xff]  }
 0x13a   : > { %vm6531_vm0 = vcmp.ne.s16.totalorder %v7276_v25, 0  ;;  %v2579_v10 = vsel %vm7279_vm8, %v932_v42, 0  ;;  %v1352_v19 = vshrl.u32 %v6503_v44, 16  ;;  %v7280_v62 = vshll.u32 %v6273_v30, 16  ;;  %vm7293_vm1 = vmmov %vm7287_vm10 }
 0x13b   : > { %v4438_v37 = vcombine.low %v2578_v32, %v2579_v10  ;;  %vm3327_vm2 = vcmp.ne.s16.totalorder %v6103_v8, 0  ;;  %vm3328_vm3 = vcmp.ne.s16.totalorder %v7281_v3, 0  ;;  %v1343_v34 = vsel %vm7282_vm11, %v1338_v2, %v1342_v24  ;;  %5054 = vmatpush3.bf16.msra.mxu1 %v5476_v20  ;;  %vm7302_vm4 = vmmov %vm7293_vm1  ;;  %v7303_v8 = vld [vmem:[#allocation12_spill] sm:$0xff] }
 0x13c   : > { %v2439_v15 = vrot.slane %v7280_v62, 1  ;;  %v1346_v42 = vor.u32 %v1344_v56, %v1342_v24  ;;  %v2619_v40 = vshrl.u32 %v4437_v43, 16  ;;  %v2622_v57 = vshll.u32 %v4437_v43, 16  ;;  %5086 = vmatmul.mubr.bf16.vlgmr.msra.gmra.mxu0 %v1343_v34  ;;  %v7288_v24 = vld [vmem:[#allocation30_spill] sm:$0xff]  ;;  %5055 = vmatprep.subr.bf16.mxu1 %v5481_v18  ;;  %vm7314_vm11 = vmmov %vm7293_vm1 }
 0x13d   : > { %v2627_v12 = vshrl.u32 %v4438_v37, 16  ;;  %v2630_v29 = vshll.u32 %v4438_v37, 16  ;;  %v7283_v16 = vshrl.u32 %v6323_v21, 16  ;;  %v7285_v52 = vshll.u32 %v7284_v45, 16  ;;  %5118 = vmatpush3.bf16.msra.mxu0 %v7286_v28  ;;  %v6574_v37 = vld [vmem:[#allocation2 + $0x4c] sm:$0xf] }
 0x13e   : > { %v1351_v46 = vsel %vm7287_vm10, %v1346_v42, %v1350_v7  ;;  %v2621_v2 = vrot.slane %v2619_v40, 3  ;;  %v2624_v47 = vrot.slane %v2622_v57, 4  ;;  %v4439_v56 = vcombine.low %v2580_v50, %v2581_v1  ;;  %5119 = vmatprep.subr.bf16.mxu0 %v5482_v5  ;;  %v7292_v34 = vld [vmem:[#allocation18_spill] sm:$0xff]  ;;  %vm7317_vm10 = vmmov %vm7293_vm1 }
 0x13f   : > { %v6555_v41 = vrot.slane %v7283_v16, 3  ;;  %v2431_v31 = vrot.slane %v7285_v52, 1  ;;  %v2629_v32 = vrot.slane %v2627_v12, 3  ;;  %v2632_v25 = vrot.slane %v2630_v29, 4  ;;  %5089 = vmatprep.mubr.bf16.mxu0 %v1351_v46  ;;  %v6586_v29 = vld [vmem:[#allocation2 + $0x50] sm:$0xf]  ;;  %5056 = vmatpush3.bf16.msra.mxu1 %v5481_v18 }
 0x140   : > { %v7290_v43 = vshrl.u32 %v7284_v45, 16  ;;  %v2625_v0 = vor.u32 %v2624_v47, %v2621_v2  ;;  %v2636_v50 = vshrl.u32 %v4439_v56, 16  ;;  %v2639_v1 = vshll.u32 %v4439_v56, 16  ;;  %v7294_v52 = vld [vmem:[#allocation23_spill] sm:$0xff]  ;;  %v5487_v2 = vld [vmem:[%s7121_s3 + $0x120] sm:$0xff]   ;;  %5057 = vmatprep.subr.bf16.mxu1 %v5483_v55 }
 0x141   : > { %v6570_v10 = vsel %vm7289_vm13, %v7288_v24, %v2431_v31  ;;  %v2582_v62 = vsel %vm6318_vm7, %v2575_v58, 0  ;;  %vm3374_vm15 = vcmask 1044480   ;;  %vm3331_vm6 = vcmp.ne.s16.totalorder %v7292_v34, 0  ;;  %5120 = vmatpush3.bf16.msra.mxu0 %v5482_v5  ;;  %v7296_v58 = vld [vmem:[#allocation20_spill] sm:$0xff]  ;;  %v7298_v18 = vld [vmem:[#allocation9_spill] sm:$0xff]  ;;  %vm7318_vm13 = vmmov %vm7293_vm1 }
 0x142   : > { %v2435_v7 = vor.u32 %v7290_v43, %v2431_v31  ;;  %v2633_v42 = vor.u32 %v2632_v25, %v2629_v32  ;;  %v4440_v40 = vcombine.low %v2582_v62, %v2582_v62  ;;  %v2441_v12 = vshrl.u32 %v6273_v30, 16  ;;  %5121 = vmatprep.subr.bf16.mxu0 %v5485_v9  ;;  %v6599_v32 = vld [vmem:[#allocation2 + $0x5c] sm:$0xf]  ;;  %v5486_v25 = vld [vmem:[%s7121_s3] sm:$0xff]  }
 0x143   : > { %v2638_v16 = vrot.slane %v2636_v50, 3  ;;  %v2641_v45 = vrot.slane %v2639_v1, 4  ;;  %v7295_v31 = vshll.u32 %v7294_v52, 16  ;;  %vm7297_vm7 = vcmp.ne.s16.totalorder %v7296_v58, 0  ;;  %v7301_v50 = vld [vmem:[#allocation26_spill] sm:$0xff]  ;;  %5058 = vmatpush3.bf16.msra.mxu1 %v5483_v55  ;;  %v5488_v55 = vld [vmem:[%s7121_s3 + $0xf8] sm:$0xff]  }
 0x144   : > { %v6583_v57 = vsel %vm7293_vm1, %v2435_v7, %v2439_v15  ;;  %v3106_v46 = vsel %vm7297_vm7, %v6574_v37, 0  ;;  %v6597_v30 = vsel %vm1824_vm14, %v2625_v0, %v2633_v42  ;;  %v2645_v47 = vshrl.u32 %v4440_v40, 16  ;;  %v7300_v7 = vld [vmem:[#allocation27_spill] sm:$0xff]  ;;  %v6613_v1 = vld [vmem:[#allocation2 + $0x60] sm:$0xf]  ;;  %5090 = vmatmul.mubr.bf16.gmra.mxu0 %v1352_v19  ;;  %5059 = vmatprep.subr.bf16.mxu1 %v5486_v25 }
 0x145   : > { %v2447_v28 = vrot.slane %v7295_v31, 1  ;;  %v2648_v5 = vshll.u32 %v4440_v40, 16  ;;  %v2443_v56 = vor.u32 %v2441_v12, %v2439_v15  ;;  %v2642_v24 = vor.u32 %v2641_v45, %v2638_v16  ;;  %v6622_v16 = vld [vmem:[#allocation2 + $0x64] sm:$0x1]  ;;  %5122 = vmatpush3.bf16.msra.mxu0 %v5485_v9  ;;  %5133 = vmatprep.mubr.bf16.mxu0 %v6492_v36  ;;  %v6634_v45 = vld [vmem:[#allocation2 + $0x54] sm:$0xf] }
 0x146   : > { %vm7299_vm12 = vcmp.ne.s16.totalorder %v7298_v18, 0  ;;  %v3332_v0 = vsel %vm6531_vm0, %v7300_v7, 0  ;;  %v3333_v15 = vsel %vm3326_vm9, %v7301_v50, 0  ;;  %v6617_v20 = vrot.slane %v2645_v47, 3  ;;  %5123 = vmatprep.subr.bf16.mxu0 %v5487_v2  ;;  %v5489_v36 = vld [vmem:[%s7121_s3 + $0x118] sm:$0xff]   ;;  %v7307_v47 = vld [vmem:[#allocation14_spill] sm:$0xff] }
 0x147   : > { %v3107_v43 = vsel %vm7299_vm12, %v6586_v29, 0  ;;  %v2650_v62 = vrot.slane %v2648_v5, 4  ;;  %v6620_v40 = vsel %vm7302_vm4, %v2443_v56, %v2447_v28  ;;  %v6626_v27 = vsel %vm1824_vm14, %v2633_v42, %v2642_v24  ;;  %v6640_v31 = vld [vmem:[#allocation2 + $0x58] sm:$0xf]  ;;  %v6655_v56 = vld [vmem:[#allocation2 + $0x40] sm:$0xf]  ;;  %5060 = vmatpush3.bf16.msra.mxu1 %v5486_v25 }
 0x148   : > { %v4521_v12 = vcombine.low %v3106_v46, %v3107_v43  ;;  %v3334_v44 = vsel %vm3327_vm2, %v6449_v22, 0  ;;  %v3335_v51 = vsel %vm3328_vm3, %v6461_v14, 0  ;;  %v4549_v19 = vcombine.low %v3332_v0, %v3333_v15  ;;  %v7305_v14 = vld [vmem:[#allocation11_spill] sm:$0xff]  ;;  %v7309_v0 = vld [vmem:[#allocation13_spill] sm:$0xff]  ;;  %5093 = vmatprep.subr.bf16.mxu1 %v5488_v55 }
 0x149   : > { %v2651_v9 = vor.u32 %v2650_v62, %v6617_v20  ;;  %v4550_v42 = vcombine.low %v3334_v44, %v3335_v51  ;;  %vm7304_vm0 = vcmp.ne.s16.totalorder %v7303_v8, 0  ;;  %vm7306_vm9 = vcmp.ne.s16.totalorder %v7305_v14, 0  ;;  %5124 = vmatpush3.bf16.msra.mxu0 %v5487_v2  ;;  %v7311_v44 = vld [vmem:[#allocation15_spill] sm:$0xff] }
 0x14a   : > { %v3110_v22 = vsel %vm7304_vm0, %v6599_v32, 0  ;;  %v3111_v3 = vsel %vm7306_vm9, %v6613_v1, 0  ;;  %v3551_v28 = vshll.u32 %v6323_v21, 16  ;;  %v3375_v58 = vrot.slane %v4549_v19, 3  ;;  %5125 = vmatprep.subr.bf16.mxu0 %v5489_v36  ;;  %v5491_v25 = vld [vmem:[%s7121_s3 + $0x110] sm:$0xff]   ;;  %5062 = vmatmul.mubr.bf16.vlgmr.msra.gmra.mxu1 %v6507_v26  ;;  %v5492_v26 = vld [vmem:[%s7121_s3 + $0xe8] sm:$0xff]  }
 0x14b   : > { %v4523_v46 = vcombine.low %v3110_v22, %v3111_v3  ;;  %vm7308_vm8 = vcmp.ne.s16.totalorder %v7307_v47, 0  ;;  %v6658_v18 = vsel %vm1824_vm14, %v2642_v24, %v2651_v9  ;;  %v3376_v43 = vrot.slane %v4550_v42, 3  ;;  %v5490_v22 = vld [vmem:[%s7121_s3 + $0xf0] sm:$0xff]   ;;  %5065 = vmatprep.mubr.bf16.mxu1 %v6520_v33  ;;  %5094 = vmatpush3.bf16.msra.mxu1 %v5488_v55 }
 0x14c   : > { %v3112_v5 = vsel %vm7308_vm8, %v6622_v16, 0  ;;  %vm7310_vm2 = vcmp.ne.s16.totalorder %v7309_v0, 0  ;;  %vm7312_vm3 = vcmp.ne.s16.totalorder %v7311_v44, 0  ;;  %v3149_v19 = vshrl.u32 %v4521_v12, 16  ;;  %5095 = vmatprep.subr.bf16.mxu1 %v5490_v22 }
 0x14d   : > { %v6660_v7 = vcombine.low %v3112_v5, %v3112_v5  ;;  %v3108_v15 = vsel %vm7310_vm2, %v6634_v45, 0  ;;  %v3164_v62 = vshll.u32 %v4523_v46, 16  ;;  %v3109_v51 = vsel %vm7312_vm3, %v6640_v31, 0  ;;  %5126 = vmatpush3.bf16.msra.mxu0 %v5489_v36 }
 0x14e   : > { %v3151_v8 = vshll.u32 %v4521_v12, 16  ;;  %v6669_v24 = vsel %vm3374_vm15, %v3375_v58, %v3376_v43  ;;  %v4522_v9 = vcombine.low %v3108_v15, %v3109_v51  ;;  %v6673_v42 = vsel %vm3374_vm15, %v3376_v43, %v6511_v59  ;;  %v7313_v58 = vld [vmem:[#allocation29_spill] sm:$0xff]  ;;  %5127 = vmatprep.subr.bf16.mxu0 %v5491_v25 }
 0x14f   : > { %v3338_v2 = vsel %vm3331_vm6, %v6655_v56, 0  ;;  %v3166_v12 = vrot.slane %v3164_v62, 1  ;;  %v3712_v47 = vshrl.u32 %v7313_v58, 16  ;;  %v3715_v0 = vshll.u32 %v7313_v58, 16  ;;  %v5493_v62 = vld [vmem:[%s7121_s3 + $0x108] sm:$0xff]   ;;  %5096 = vmatpush3.bf16.msra.mxu1 %v5490_v22  ;;  %v5495_v22 = vld [vmem:[%s7121_s3 + $0x100] sm:$0xff]  }
 0x150   : > { %v3153_v14 = vrot.slane %v3151_v8, 1  ;;  %v4552_v3 = vcombine.low %v3338_v2, %v3338_v2  ;;  %v3156_v5 = vshll.u32 %v4522_v9, 16  ;;  %v3160_v43 = vshrl.u32 %v4522_v9, 16  ;;  %5097 = vmatprep.subr.bf16.mxu1 %v5492_v26 }
 0x151   : > { %v3720_v34 = vshrl.u32 %v6496_v54, 16  ;;  %v3714_v51 = vrot.slane %v3712_v47, 3  ;;  %v3723_v61 = vshll.u32 %v6496_v54, 16  ;;  %v3717_v9 = vrot.slane %v3715_v0, 4  ;;  %5128 = vmatpush3.bf16.msra.mxu0 %v5491_v25  ;;  %v5494_v25 = vld [vmem:[%s7121_s3 + $0xe0] sm:$0xff]  }
 0x152   : > { %v3154_v15 = vor.u32 %v3153_v14, %v3149_v19  ;;  %v6688_v44 = vrot.slane %v4552_v3, 3  ;;  %v3158_v8 = vrot.slane %v3156_v5, 1  ;;  %v3168_v58 = vshrl.u32 %v4523_v46, 16  ;;  %5129 = vmatprep.subr.bf16.mxu0 %v5493_v62 }
 0x153   : > { %v3722_v2 = vrot.slane %v3720_v34, 3  ;;  %v3553_v36 = vrot.slane %v3551_v28, 4  ;;  %v3725_v55 = vrot.slane %v3723_v61, 4  ;;  %v3172_v19 = vshll.u32 %v6660_v7, 16  ;;  %v7315_v34 = vld [vmem:[#allocation22_spill] sm:$0xff]  ;;  %v7316_v28 = vld [vmem:[#allocation28_spill] sm:$0xff]  ;;  %5098 = vmatpush3.bf16.msra.mxu1 %v5492_v26 }
 0x154   : > { %v6701_v33 = vsel %vm3374_vm15, %v6511_v59, %v6688_v44  ;;  %v6705_v14 = vsel %vm7314_vm11, %v3154_v15, %v3158_v8  ;;  %v3162_v3 = vor.u32 %v3160_v43, %v3158_v8  ;;  %v3718_v46 = vor.u32 %v3717_v9, %v3714_v51  ;;  %5099 = vmatprep.subr.bf16.mxu1 %v5494_v25 }
 0x155   : > { %v3170_v47 = vor.u32 %v3168_v58, %v3166_v12  ;;  %v3726_v5 = vor.u32 %v3725_v55, %v3722_v2  ;;  %v3174_v0 = vrot.slane %v3172_v19, 1  ;;  %v3534_v6 = vshll.u32 %v7315_v34, 16  ;;  %5130 = vmatpush3.bf16.msra.mxu0 %v5493_v62  ;;  %v5505_v34 = vld [vmem:[%s7121_s3 + $0x1a0] sm:$0xff]  }
 0x156   : > { %v3539_v39 = vshrl.u32 %v7316_v28, 16  ;;  %v4244_v59 = vcombine.low %v6524_v60, %v6524_v60  ;;  %v6712_v61 = vsel %vm7317_vm10, %v3162_v3, %v3166_v12  ;;  %v3542_v15 = vshll.u32 %v7316_v28, 16  ;;  %5131 = vmatprep.subr.bf16.mxu0 %v5495_v22 }
 0x157   : > { %v6717_v43 = vor.u32 %v6536_v35, %v6513_v13  ;;  %v6726_v60 = vsel %vm1824_vm14, %v3718_v46, %v3726_v5  ;;  %v6729_v12 = vsel %vm7318_vm13, %v3170_v47, %v3174_v0  ;;  %v3536_v51 = vrot.slane %v3534_v6, 4  ;;  %v7321_v6 = vld [vmem:[#allocation25_spill] sm:$0xff]  ;;  %v5496_v46 = vld [vmem:[%s7121_s3 + $0xd8] sm:$0xff]   ;;  %5100 = vmatpush3.bf16.msra.mxu1 %v5494_v25  ;;  %v2148_v0 = vld [vmem:[#allocation2 + $0x28] sm:$0xf] }
 0x158   : > { %v3541_v8 = vrot.slane %v3539_v39, 3  ;;  %v7319_v13 = vshrl.u32 %v6398_v23, 16  ;;  %v7320_v9 = vshll.u32 %v6398_v23, 16  ;;  %v3544_v58 = vrot.slane %v3542_v15, 4  ;;  %5066 = vmatmul.mubr.bf16.gmra.mxu1 %v4244_v59  ;;  %v5497_v39 = vld [vmem:[%s7121_s3 + $0x1b8] sm:$0xff]   ;;  %5101 = vmatprep.subr.bf16.mxu1 %v5496_v46  ;;  %v5504_v15 = vld [vmem:[%s7121_s3 + $0xc0] sm:$0xff]  }
 0x159   : > { %v6737_v55 = vsel %vm1824_vm14, %v3726_v5, %v6717_v43  ;;  %v6740_v19 = vor.u32 %v3553_v36, %v6555_v41  ;;  %5109 = vmatprep.mubr.bf16.mxu1 %v6426_v48  ;;  %v3537_v23 = vor.u32 %v3536_v51, %v7321_v6  ;;  %v1849_v41 = vor.u32 %v6432_v38, %v6430_v17  ;;  %v5499_v36 = vld [vmem:[%s7121_s3 + $0x1b0] sm:$0xff]   ;;  %v5501_v5 = vld [vmem:[%s7121_s3 + $0x1a8] sm:$0xff]   ;;  %v5507_v25 = vld [vmem:[%s7121_s3 + $0x198] sm:$0xff]  }
 0x15a   : > { %v1854_v35 = vrot.slane %v7319_v13, 3  ;;  %v1857_v2 = vrot.slane %v7320_v9, 4  ;;  %v3545_v3 = vor.u32 %v3544_v58, %v3541_v8  ;;  %5132 = vmatpush3.bf16.msra.mxu0 %v5495_v22  ;;  %v5498_v17 = vld [vmem:[%s7121_s3 + $0xd0] sm:$0xff]   ;;  %v4381_v59 = vcombine.low %v2148_v0, %v7301_v50  ;;  %v5506_v22 = vld [vmem:[%s7121_s3 + $0x178] sm:$0xff]   ;;  %v5511_v8 = vld [vmem:[%s7121_s3 + $0x188] sm:$0xff]  }
 0x15b   : > { %5165 = vmatprep.subr.bf16.mxu0 %v5497_v39  ;;  %v1850_v47 = vsel %vm1824_vm14, %v6391_v53, %v1849_v41  ;;  %5102 = vmatpush3.bf16.msra.mxu1 %v5496_v46  ;;  %v5500_v53 = vld [vmem:[%s7121_s3 + $0xc8] sm:$0xff]   ;;  %v5508_v50 = vld [vmem:[%s7121_s3 + $0x170] sm:$0xff]   ;;  %v5518_v58 = vld [vmem:[%s7121_s3 + $0x238] sm:$0xff]  }
 0x15c   : > { %v1858_v62 = vor.u32 %v1857_v2, %v1854_v35  ;;  %v6753_v26 = vsel %vm1824_vm14, %v3537_v23, %v3545_v3  ;;  %v6757_v48 = vsel %vm1824_vm14, %v3545_v3, %v6740_v19  ;;  %5103 = vmatprep.subr.bf16.mxu1 %v5498_v17  ;;  %v5509_v51 = vld [vmem:[%s7121_s3 + $0x190] sm:$0xff]   ;;  %v5510_v13 = vld [vmem:[%s7121_s3 + $0x168] sm:$0xff]   ;;  %v5523_v46 = vld [vmem:[#allocation2 + $0x40] ss:$0 sps:$4 sm:$0x11]  }
 0x15d   : > { %5134 = vmatmul.mubr.bf16.vlgmr.msra.gmra.mxu0 %v1850_v47  ;;  %v5609_v9 = vld [vmem:[#allocation2 + $0x8] sm:$0xf]  ;;  %v5520_v6 = vld [vmem:[%s7121_s3 + $0x150] sm:$0xff]   ;;  %v5538_v0 = vld [vmem:[%s7121_s3 + $0x1d8] sm:$0xff]  }
 0x15e   : > { %v1859_v38 = vsel %vm1824_vm14, %v1849_v41, %v1858_v62  ;;  %5166 = vmatpush3.bf16.msra.mxu0 %v5497_v39  ;;  %v5516_v39 = vld [vmem:[%s7121_s3 + $0x158] sm:$0xff]   ;;  %v5524_v23 = vld [vmem:[%s7121_s3 + $0x228] sm:$0xff]  }
 0x15f   : > { %5137 = vmatprep.mubr.bf16.mxu0 %v1859_v38  ;;  %5167 = vmatprep.subr.bf16.mxu0 %v5499_v36  ;;  %v5522_v3 = vld [vmem:[%s7121_s3 + $0x148] sm:$0xff]   ;;  %v5529_v41 = vld [vmem:[%s7121_s3 + $0x218] sm:$0xff]  }
 0x160   : > { %5104 = vmatpush3.bf16.msra.mxu1 %v5498_v17  ;;  %v5528_v62 = vld [vmem:[%s7121_s3 + $0x1f8] sm:$0xff]   ;;  %v5535_v47 = vld [vmem:[%s7121_s3 + $0x208] sm:$0xff]  }
 0x161   : > { %5105 = vmatprep.subr.bf16.mxu1 %v5500_v53  ;;  %v5534_v17 = vld [vmem:[%s7121_s3 + $0x1e8] sm:$0xff]   ;;  %v5610_v38 = vld [vmem:[#allocation2 + $0x1c] sm:$0x1] }
 0x162   : > { %5168 = vmatpush3.bf16.msra.mxu0 %v5499_v36  ;;  %v5531_v36 = vld [vmem:[%s7121_s3 + $0x1f0] sm:$0xff]  }
 0x163   : > { %5169 = vmatprep.subr.bf16.mxu0 %v5501_v5 }
 0x164   : > { %5106 = vmatpush3.bf16.msra.mxu1 %v5500_v53  ;;  %v5539_v53 = vld [vmem:[%s7121_s3 + $0x2b8] sm:$0xff]  }
 0x165   : > { %5138 = vmatmul.mubr.bf16.gmra.mxu0 %v1854_v35  ;;  %5107 = vmatprep.subr.bf16.mxu1 %v5504_v15  ;;  %v5608_v35 = vld [vmem:[#allocation2 + $0x4] sm:$0xf] }
 0x166   : > { %5170 = vmatpush3.bf16.msra.mxu0 %v5501_v5  ;;  %5181 = vmatprep.mubr.bf16.mxu0 %v4381_v59  ;;  %v4353_v2 = vcombine.low %v5608_v35, %v5609_v9  ;;  %v4356_v5 = vcombine.low %v5610_v38, %v5610_v38  ;;  %v5543_v59 = vld [vmem:[%s7121_s3 + $0x2a8] sm:$0xff]   ;;  %v5556_v35 = vld [vmem:[%s7121_s3 + $0x258] sm:$0xff]  }
 0x167   : > { %5171 = vmatprep.subr.bf16.mxu0 %v5505_v34  ;;  %v5557_v9 = vld [vmem:[#allocation2 + $0x78] sm:$0xff]  }
 0x168   : > { %5108 = vmatpush3.bf16.msra.mxu1 %v5504_v15  ;;  %v5542_v15 = vld [vmem:[%s7121_s3 + $0x1c8] sm:$0xff]   ;;  %v5588_v38 = vld [vmem:[%s7121_s3 + $0x398] sm:$0xff]  }
 0x169   : > { %5141 = vmatprep.subr.bf16.mxu1 %v5506_v22 }
 0x16a   : > { %5172 = vmatpush3.bf16.msra.mxu0 %v5505_v34  ;;  %v5541_v34 = vld [vmem:[%s7121_s3 + $0x2b0] sm:$0xff]  }
 0x16b   : > { %5173 = vmatprep.subr.bf16.mxu0 %v5507_v25  ;;  %5110 = vmatmul.mubr.bf16.vlgmr.msra.gmra.mxu1 %v6455_v49  ;;  %v5514_v49 = vld [vmem:[%s7121_s3 + $0x160] sm:$0xff]  }
 0x16c   : > { %5113 = vmatprep.mubr.bf16.mxu1 %v6459_v4  ;;  %5142 = vmatpush3.bf16.msra.mxu1 %v5506_v22  ;;  %v5515_v4 = vld [vmem:[%s7121_s3 + $0x180] sm:$0xff]   ;;  %v5548_v22 = vld [vmem:[%s7121_s3 + $0x298] sm:$0xff]  }
 0x16d   : > { %5143 = vmatprep.subr.bf16.mxu1 %v5508_v50 }
 0x16e   : > { %5174 = vmatpush3.bf16.msra.mxu0 %v5507_v25  ;;  %v5545_v25 = vld [vmem:[%s7121_s3 + $0x1c0] sm:$0xff]  }
 0x16f   : > { %5175 = vmatprep.subr.bf16.mxu0 %v5509_v51 }
 0x170   : > { %5144 = vmatpush3.bf16.msra.mxu1 %v5508_v50  ;;  %v5547_v50 = vld [vmem:[%s7121_s3 + $0x278] sm:$0xff]  }
 0x171   : > { %5145 = vmatprep.subr.bf16.mxu1 %v5510_v13 }
 0x172   : > { %5176 = vmatpush3.bf16.msra.mxu0 %v5509_v51  ;;  %v5550_v51 = vld [vmem:[%s7121_s3 + $0x290] sm:$0xff]  }
 0x173   : > { %5177 = vmatprep.subr.bf16.mxu0 %v5511_v8  ;;  %5114 = vmatmul.mubr.bf16.gmra.mxu1 %v6446_v63  ;;  %v5521_v63 = vld [vmem:[%s7121_s3 + $0x230] sm:$0xff]  }
 0x174   : > { %5146 = vmatpush3.bf16.msra.mxu1 %v5510_v13  ;;  %5157 = vmatprep.mubr.bf16.mxu1 %v4353_v2  ;;  %v5551_v13 = vld [vmem:[%s7121_s3 + $0x268] sm:$0xff]   ;;  %v5560_v2 = vld [vmem:[%s7121_s3 + $0x250] sm:$0xff]  }
 0x175   : > { %5147 = vmatprep.subr.bf16.mxu1 %v5514_v49 }
 0x176   : > { %5178 = vmatpush3.bf16.msra.mxu0 %v5511_v8  ;;  %v5552_v8 = vld [vmem:[%s7121_s3 + $0x288] sm:$0xff]  }
 0x177   : > { %5179 = vmatprep.subr.bf16.mxu0 %v5515_v4 }
 0x178   : > { %5148 = vmatpush3.bf16.msra.mxu1 %v5514_v49  ;;  %v2449_v49 = vshrl.u32 %v7294_v52, 16  ;;  %v5558_v52 = vld [vmem:[%s7121_s3 + $0x338] sm:$0xff]  }
 0x179   : > { %5149 = vmatprep.subr.bf16.mxu1 %v5516_v39 }
 0x17a   : > { %5180 = vmatpush3.bf16.msra.mxu0 %v5515_v4  ;;  %v4465_v4 = vcombine.low %v6574_v37, %v6586_v29  ;;  %v5561_v37 = vld [vmem:[%s7121_s3 + $0x330] sm:$0xff]   ;;  %v5559_v29 = vld [vmem:[#allocation2 + $0x80] sm:$0xff]  }
 0x17b   : > { %5213 = vmatprep.subr.bf16.mxu0 %v5518_v58 }
 0x17c   : > { %5150 = vmatpush3.bf16.msra.mxu1 %v5516_v39  ;;  %v5562_v39 = vld [vmem:[%s7121_s3 + $0x248] sm:$0xff]  }
 0x17d   : > { %5182 = vmatmul.mubr.bf16.vlgmr.msra.gmra.mxu0 %v6496_v54  ;;  %5151 = vmatprep.subr.bf16.mxu1 %v5520_v6  ;;  %v5525_v54 = vld [vmem:[%s7121_s3 + $0x140] sm:$0xff]  }
 0x17e   : > { %5185 = vmatprep.mubr.bf16.mxu0 %v6434_v11  ;;  %5214 = vmatpush3.bf16.msra.mxu0 %v5518_v58  ;;  %v5526_v11 = vld [vmem:[%s7121_s3 + $0x220] sm:$0xff]   ;;  %v5564_v58 = vld [vmem:[%s7121_s3 + $0x328] sm:$0xff]  }
 0x17f   : > { %5215 = vmatprep.subr.bf16.mxu0 %v5521_v63 }
 0x180   : > { %5152 = vmatpush3.bf16.msra.mxu1 %v5520_v6  ;;  %v5566_v6 = vld [vmem:[%s7121_s3 + $0x320] sm:$0xff]  }
 0x181   : > { %5153 = vmatprep.subr.bf16.mxu1 %v5522_v3 }
 0x182   : > { %5216 = vmatpush3.bf16.msra.mxu0 %v5521_v63  ;;  %v5563_v63 = vld [vmem:[#allocation2 + $0x88] ss:$0 sps:$4 sm:$0x11]  }
 0x183   : > { %5217 = vmatprep.subr.bf16.mxu0 %v5524_v23 }
 0x184   : > { %5154 = vmatpush3.bf16.msra.mxu1 %v5522_v3  ;;  %v5569_v3 = vld [vmem:[%s7121_s3 + $0x318] sm:$0xff]  }
 0x185   : > { %5186 = vmatmul.mubr.bf16.gmra.mxu0 %v5523_v46  ;;  %5155 = vmatprep.subr.bf16.mxu1 %v5525_v54  ;;  %v5568_v46 = vld [vmem:[%s7121_s3 + $0x2f8] sm:$0xff]  }
 0x186   : > { %5218 = vmatpush3.bf16.msra.mxu0 %v5524_v23  ;;  %5229 = vmatprep.mubr.bf16.mxu0 %v6597_v30  ;;  %v5532_v30 = vld [vmem:[%s7121_s3 + $0x210] sm:$0xff]   ;;  %v5565_v23 = vld [vmem:[%s7121_s3 + $0x240] sm:$0xff]  }
 0x187   : > { %5219 = vmatprep.subr.bf16.mxu0 %v5526_v11 }
 0x188   : > { %5156 = vmatpush3.bf16.msra.mxu1 %v5525_v54  ;;  %v5572_v54 = vld [vmem:[%s7121_s3 + $0x310] sm:$0xff]  }
 0x189   : > { %5189 = vmatprep.subr.bf16.mxu1 %v5528_v62 }
 0x18a   : > { %5220 = vmatpush3.bf16.msra.mxu0 %v5526_v11  ;;  %v4466_v11 = vcombine.low %v6634_v45, %v6640_v31  ;;  %v5575_v45 = vld [vmem:[%s7121_s3 + $0x308] sm:$0xff]  }
 0x18b   : > { %5221 = vmatprep.subr.bf16.mxu0 %v5529_v41  ;;  %5158 = vmatmul.mubr.bf16.vlgmr.msra.gmra.mxu1 %v7316_v28  ;;  %v5537_v28 = vld [vmem:[%s7121_s3 + $0x200] sm:$0xff]   ;;  %v5574_v31 = vld [vmem:[%s7121_s3 + $0x2e8] sm:$0xff]  }
 0x18c   : > { %5161 = vmatprep.mubr.bf16.mxu1 %v6323_v21  ;;  %5190 = vmatpush3.bf16.msra.mxu1 %v5528_v62  ;;  %v5536_v21 = vld [vmem:[%s7121_s3 + $0x1e0] sm:$0xff]  }
 0x18d   : > { %5191 = vmatprep.subr.bf16.mxu1 %v5531_v36  ;;  %v5577_v62 = vld [vmem:[%s7121_s3 + $0x300] sm:$0xff]  }
 0x18e   : > { %5222 = vmatpush3.bf16.msra.mxu0 %v5529_v41  ;;  %v4467_v41 = vcombine.low %v6599_v32, %v6613_v1  ;;  %v4468_v32 = vcombine.low %v6622_v16, %v6622_v16  ;;  %v5576_v1 = vld [vmem:[%s7121_s3 + $0x2e0] sm:$0xff]   ;;  %v5578_v16 = vld [vmem:[%s7121_s3 + $0x2d8] sm:$0xff]  }
 0x18f   : > { %5223 = vmatprep.subr.bf16.mxu0 %v5532_v30 }
 0x190   : > { %5192 = vmatpush3.bf16.msra.mxu1 %v5531_v36  ;;  %v5579_v36 = vld [vmem:[%s7121_s3 + $0x3b8] sm:$0xff]  }
 0x191   : > { %5193 = vmatprep.subr.bf16.mxu1 %v5534_v17 }
 0x192   : > { %5224 = vmatpush3.bf16.msra.mxu0 %v5532_v30  ;;  %v5582_v30 = vld [vmem:[%s7121_s3 + $0x3b0] sm:$0xff]  }
 0x193   : > { %5225 = vmatprep.subr.bf16.mxu0 %v5535_v47  ;;  %5162 = vmatmul.mubr.bf16.gmra.mxu1 %v4356_v5  ;;  %v5587_v5 = vld [vmem:[%s7121_s3 + $0x378] sm:$0xff]  }
 0x194   : > { %5194 = vmatpush3.bf16.msra.mxu1 %v5534_v17  ;;  %5205 = vmatprep.mubr.bf16.mxu1 %v6570_v10  ;;  %v5540_v10 = vld [vmem:[%s7121_s3 + $0x1d0] sm:$0xff]   ;;  %v5583_v17 = vld [vmem:[%s7121_s3 + $0x2c8] sm:$0xff]  }
 0x195   : > { %5195 = vmatprep.subr.bf16.mxu1 %v5536_v21 }
 0x196   : > { %5226 = vmatpush3.bf16.msra.mxu0 %v5535_v47  ;;  %v5584_v47 = vld [vmem:[%s7121_s3 + $0x3a8] sm:$0xff]  }
 0x197   : > { %5227 = vmatprep.subr.bf16.mxu0 %v5537_v28 }
 0x198   : > { %5196 = vmatpush3.bf16.msra.mxu1 %v5536_v21  ;;  %v4604_v21 = vcombine.low %v6655_v56, %v6655_v56  ;;  %v5591_v56 = vld [vmem:[%s7121_s3 + $0x368] sm:$0xff]  }
 0x199   : > { %5197 = vmatprep.subr.bf16.mxu1 %v5538_v0 }
 0x19a   : > { %5228 = vmatpush3.bf16.msra.mxu0 %v5537_v28 }
 0x19b   : > { %5261 = vmatprep.subr.bf16.mxu0 %v5539_v53 }
 0x19c   : > { %5198 = vmatpush3.bf16.msra.mxu1 %v5538_v0 }
 0x19d   : > { %5230 = vmatmul.mubr.bf16.vlgmr.msra.gmra.mxu0 %v6626_v27  ;;  %5199 = vmatprep.subr.bf16.mxu1 %v5540_v10  ;;  %v5546_v27 = vld [vmem:[%s7121_s3 + $0x2a0] sm:$0xff]  }
 0x19e   : > { %5233 = vmatprep.mubr.bf16.mxu0 %v6658_v18  ;;  %5262 = vmatpush3.bf16.msra.mxu0 %v5539_v53  ;;  %v5544_v18 = vld [vmem:[#allocation2 + $0x70] sm:$0xff]   ;;  %v5592_v53 = vld [vmem:[%s7121_s3 + $0x388] sm:$0xff]  }
 0x19f   : > { %5263 = vmatprep.subr.bf16.mxu0 %v5541_v34 }
 0x1a0   : > { %5200 = vmatpush3.bf16.msra.mxu1 %v5540_v10 }
 0x1a1   : > { %5201 = vmatprep.subr.bf16.mxu1 %v5542_v15 }
 0x1a2   : > { %5264 = vmatpush3.bf16.msra.mxu0 %v5541_v34  ;;  %v3738_v34 = vshrl.u32 %v4604_v21, 16 }
 0x1a3   : > { %5265 = vmatprep.subr.bf16.mxu0 %v5543_v59 }
 0x1a4   : > { %5202 = vmatpush3.bf16.msra.mxu1 %v5542_v15  ;;  %v5593_v15 = vld [vmem:[%s7121_s3 + $0x360] sm:$0xff]  }
 0x1a5   : > { %5234 = vmatmul.mubr.bf16.gmra.mxu0 %v6617_v20  ;;  %5203 = vmatprep.subr.bf16.mxu1 %v5545_v25  ;;  %v5549_v20 = vld [vmem:[%s7121_s3 + $0x270] sm:$0xff]  }
 0x1a6   : > { %5266 = vmatpush3.bf16.msra.mxu0 %v5543_v59  ;;  %5277 = vmatprep.mubr.bf16.mxu0 %v5544_v18  ;;  %v3176_v59 = vshrl.u32 %v6660_v7, 16  ;;  %v3740_v18 = vrot.slane %v3738_v34, 3  ;;  %v5595_v7 = vld [vmem:[%s7121_s3 + $0x358] sm:$0xff]  }
 0x1a7   : > { %5267 = vmatprep.subr.bf16.mxu0 %v5546_v27 }
 0x1a8   : > { %5204 = vmatpush3.bf16.msra.mxu1 %v5545_v25 }
 0x1a9   : > { %5237 = vmatprep.subr.bf16.mxu1 %v5547_v50 }
 0x1aa   : > { %5268 = vmatpush3.bf16.msra.mxu0 %v5546_v27  ;;  %v5594_v27 = vld [vmem:[%s7121_s3 + $0x380] sm:$0xff]  }
 0x1ab   : > { %5269 = vmatprep.subr.bf16.mxu0 %v5548_v22  ;;  %5206 = vmatmul.mubr.bf16.vlgmr.msra.gmra.mxu1 %v6583_v57  ;;  %v5554_v57 = vld [vmem:[%s7121_s3 + $0x260] sm:$0xff]  }
 0x1ac   : > { %5209 = vmatprep.mubr.bf16.mxu1 %v6620_v40  ;;  %5238 = vmatpush3.bf16.msra.mxu1 %v5547_v50  ;;  %v5555_v40 = vld [vmem:[%s7121_s3 + $0x280] sm:$0xff]  }
 0x1ad   : > { %5239 = vmatprep.subr.bf16.mxu1 %v5549_v20 }
 0x1ae   : > { %5270 = vmatpush3.bf16.msra.mxu0 %v5548_v22 }
 0x1af   : > { %5271 = vmatprep.subr.bf16.mxu0 %v5550_v51 }
 0x1b0   : > { %5240 = vmatpush3.bf16.msra.mxu1 %v5549_v20 }
 0x1b1   : > { %5241 = vmatprep.subr.bf16.mxu1 %v5551_v13 }
 0x1b2   : > { %5272 = vmatpush3.bf16.msra.mxu0 %v5550_v51 }
 0x1b3   : > { %5273 = vmatprep.subr.bf16.mxu0 %v5552_v8  ;;  %5210 = vmatmul.mubr.bf16.gmra.mxu1 %v2449_v49 }
 0x1b4   : > { %5242 = vmatpush3.bf16.msra.mxu1 %v5551_v13  ;;  %5253 = vmatprep.mubr.bf16.mxu1 %v4465_v4 }
 0x1b5   : > { %5243 = vmatprep.subr.bf16.mxu1 %v5554_v57 }
 0x1b6   : > { %5274 = vmatpush3.bf16.msra.mxu0 %v5552_v8  ;;  %v5596_v8 = vld [vmem:[%s7121_s3 + $0x350] sm:$0xff]  }
 0x1b7   : > { %5275 = vmatprep.subr.bf16.mxu0 %v5555_v40 }
 0x1b8   : > { %5244 = vmatpush3.bf16.msra.mxu1 %v5554_v57  ;;  %v5597_v57 = vld [vmem:[%s7121_s3 + $0x348] sm:$0xff]  }
 0x1b9   : > { %5245 = vmatprep.subr.bf16.mxu1 %v5556_v35 }
 0x1ba   : > { %5276 = vmatpush3.bf16.msra.mxu0 %v5555_v40  ;;  %v5600_v40 = vld [vmem:[#allocation2 + $0x1c] ss:$0 sps:$4 sm:$0xff]  }
 0x1bb   : > { %5309 = vmatprep.subr.bf16.mxu0 %v5558_v52 }
 0x1bc   : > { %5246 = vmatpush3.bf16.msra.mxu1 %v5556_v35  ;;  %v3557_v35 = vshrl.u32 %v5600_v40, 16 }
 0x1bd   : > { %5278 = vmatmul.mubr.bf16.vlgmr.msra.gmra.mxu0 %v5557_v9  ;;  %5247 = vmatprep.subr.bf16.mxu1 %v5560_v2 }
 0x1be   : > { %5281 = vmatprep.mubr.bf16.mxu0 %v5559_v29  ;;  %5310 = vmatpush3.bf16.msra.mxu0 %v5558_v52  ;;  %v5599_v29 = vld [vmem:[%s7121_s3 + $0x3f8] sm:$0xff]  }
 0x1bf   : > { %5311 = vmatprep.subr.bf16.mxu0 %v5561_v37 }
 0x1c0   : > { %5248 = vmatpush3.bf16.msra.mxu1 %v5560_v2  ;;  %v3559_v2 = vrot.slane %v3557_v35, 3 }
 0x1c1   : > { %5249 = vmatprep.subr.bf16.mxu1 %v5562_v39 }
 0x1c2   : > { %5312 = vmatpush3.bf16.msra.mxu0 %v5561_v37 }
 0x1c3   : > { %5313 = vmatprep.subr.bf16.mxu0 %v5564_v58 }
 0x1c4   : > { %5250 = vmatpush3.bf16.msra.mxu1 %v5562_v39 }
 0x1c5   : > { %5282 = vmatmul.mubr.bf16.gmra.mxu0 %v5563_v63  ;;  %5251 = vmatprep.subr.bf16.mxu1 %v5565_v23 }
 0x1c6   : > { %5314 = vmatpush3.bf16.msra.mxu0 %v5564_v58  ;;  %5325 = vmatprep.mubr.bf16.mxu0 %v6669_v24  ;;  %v5571_v24 = vld [vmem:[%s7121_s3 + $0x2f0] sm:$0xff]  }
 0x1c7   : > { %5315 = vmatprep.subr.bf16.mxu0 %v5566_v6 }
 0x1c8   : > { %5252 = vmatpush3.bf16.msra.mxu1 %v5565_v23  ;;  %v5601_v23 = vld [vmem:[%s7121_s3 + $0x3f0] sm:$0xff]  }
 0x1c9   : > { %5285 = vmatprep.subr.bf16.mxu1 %v5568_v46 }
 0x1ca   : > { %5316 = vmatpush3.bf16.msra.mxu0 %v5566_v6 }
 0x1cb   : > { %5317 = vmatprep.subr.bf16.mxu0 %v5569_v3  ;;  %5254 = vmatmul.mubr.bf16.vlgmr.msra.gmra.mxu1 %v4466_v11 }
 0x1cc   : > { %5257 = vmatprep.mubr.bf16.mxu1 %v4467_v41  ;;  %5286 = vmatpush3.bf16.msra.mxu1 %v5568_v46 }
 0x1cd   : > { %5287 = vmatprep.subr.bf16.mxu1 %v5571_v24 }
 0x1ce   : > { %5318 = vmatpush3.bf16.msra.mxu0 %v5569_v3 }
 0x1cf   : > { %5319 = vmatprep.subr.bf16.mxu0 %v5572_v54 }
 0x1d0   : > { %5288 = vmatpush3.bf16.msra.mxu1 %v5571_v24  ;;  %v3869_v24 = vld [vmem:[#allocation2 + $0x8] sm:$0xf] }
 0x1d1   : > { %5289 = vmatprep.subr.bf16.mxu1 %v5574_v31 }
 0x1d2   : > { %5320 = vmatpush3.bf16.msra.mxu0 %v5572_v54  ;;  %v3870_v54 = vld [vmem:[#allocation2 + $0xc] sm:$0xf] }
 0x1d3   : > { %5321 = vmatprep.subr.bf16.mxu0 %v5575_v45  ;;  %5258 = vmatmul.mubr.bf16.gmra.mxu1 %v4468_v32 }
 0x1d4   : > { %5290 = vmatpush3.bf16.msra.mxu1 %v5574_v31  ;;  %5301 = vmatprep.mubr.bf16.mxu1 %v6705_v14  ;;  %v5581_v14 = vld [vmem:[%s7121_s3 + $0x2d0] sm:$0xff]  }
 0x1d5   : > { %5291 = vmatprep.subr.bf16.mxu1 %v5576_v1 }
 0x1d6   : > { %5322 = vmatpush3.bf16.msra.mxu0 %v5575_v45  ;;  %v5602_v45 = vld [vmem:[%s7121_s3 + $0x3e8] sm:$0xff]  }
 0x1d7   : > { %5323 = vmatprep.subr.bf16.mxu0 %v5577_v62 }
 0x1d8   : > { %5292 = vmatpush3.bf16.msra.mxu1 %v5576_v1 }
 0x1d9   : > { %5293 = vmatprep.subr.bf16.mxu1 %v5578_v16 }
 0x1da   : > { %5324 = vmatpush3.bf16.msra.mxu0 %v5577_v62 }
 0x1db   : > { %5357 = vmatprep.subr.bf16.mxu0 %v5579_v36 }
 0x1dc   : > { %5294 = vmatpush3.bf16.msra.mxu1 %v5578_v16 }
 0x1dd   : > { %5326 = vmatmul.mubr.bf16.vlgmr.msra.gmra.mxu0 %v6673_v42  ;;  %5295 = vmatprep.subr.bf16.mxu1 %v5581_v14  ;;  %v5586_v42 = vld [vmem:[%s7121_s3 + $0x3a0] sm:$0xff]  }
 0x1de   : > { %5329 = vmatprep.mubr.bf16.mxu0 %v6701_v33  ;;  %5358 = vmatpush3.bf16.msra.mxu0 %v5579_v36  ;;  %v5585_v33 = vld [vmem:[%s7121_s3 + $0x2c0] sm:$0xff]  }
 0x1df   : > { %5359 = vmatprep.subr.bf16.mxu0 %v5582_v30 }
 0x1e0   : > { %5296 = vmatpush3.bf16.msra.mxu1 %v5581_v14 }
 0x1e1   : > { %5297 = vmatprep.subr.bf16.mxu1 %v5583_v17 }
 0x1e2   : > { %5360 = vmatpush3.bf16.msra.mxu0 %v5582_v30 }
 0x1e3   : > { %5361 = vmatprep.subr.bf16.mxu0 %v5584_v47 }
 0x1e4   : > { %5298 = vmatpush3.bf16.msra.mxu1 %v5583_v17 }
 0x1e5   : > { %5330 = vmatmul.mubr.bf16.gmra.mxu0 %v6688_v44  ;;  %5299 = vmatprep.subr.bf16.mxu1 %v5585_v33  ;;  %v5589_v44 = vld [vmem:[%s7121_s3 + $0x370] sm:$0xff]  }
 0x1e6   : > { %5362 = vmatpush3.bf16.msra.mxu0 %v5584_v47  ;;  %5373 = vmatprep.mubr.bf16.mxu0 %v6726_v60  ;;  %v5590_v60 = vld [vmem:[%s7121_s3 + $0x390] sm:$0xff]   ;;  %v5603_v47 = vld [vmem:[%s7121_s3 + $0x3e0] sm:$0xff]  }
 0x1e7   : > { %5363 = vmatprep.subr.bf16.mxu0 %v5586_v42 }
 0x1e8   : > { %5300 = vmatpush3.bf16.msra.mxu1 %v5585_v33 }
 0x1e9   : > { %5333 = vmatprep.subr.bf16.mxu1 %v5587_v5 }
 0x1ea   : > { %5364 = vmatpush3.bf16.msra.mxu0 %v5586_v42  ;;  %v7017_v28 = vpop.f32.mrf.mxu1 }
 0x1eb   : > { %5365 = vmatprep.subr.bf16.mxu0 %v5588_v38  ;;  %5302 = vmatmul.mubr.bf16.vlgmr.msra.gmra.mxu1 %v6712_v61  ;;  %v3741_v61 = vshll.u32 %v4604_v21, 16  ;;  %v5604_v21 = vld [vmem:[%s7121_s3 + $0x3d8] sm:$0xff]  }
 0x1ec   : > { %5305 = vmatprep.mubr.bf16.mxu1 %v6729_v12  ;;  %5334 = vmatpush3.bf16.msra.mxu1 %v5587_v5  ;;  %v7023_v0 = vpop.f32.mrf.mxu1 }
 0x1ed   : > { %5335 = vmatprep.subr.bf16.mxu1 %v5589_v44  ;;  %v3743_v25 = vrot.slane %v3741_v61, 4 }
 0x1ee   : > { %5366 = vmatpush3.bf16.msra.mxu0 %v5588_v38  ;;  %v7028_v10 = vpop.f32.mrf.mxu1 }
 0x1ef   : > { %5367 = vmatprep.subr.bf16.mxu0 %v5590_v60  ;;  %v3744_v20 = vor.u32 %v3743_v25, %v3740_v18 }
 0x1f0   : > { %5336 = vmatpush3.bf16.msra.mxu1 %v5589_v44  ;;  %v7030_v12 = vpop.f32.mrf.mxu1 }
 0x1f1   : > { %5337 = vmatprep.subr.bf16.mxu1 %v5591_v56 }
 0x1f2   : > { %5368 = vmatpush3.bf16.msra.mxu0 %v5590_v60  ;;  %v7039_v22 = vpop.f32.mrf.mxu1 }
 0x1f3   : > { %5369 = vmatprep.subr.bf16.mxu0 %v5592_v53  ;;  %5306 = vmatmul.mubr.bf16.gmra.mxu1 %v3176_v59 }
 0x1f4   : > { %5338 = vmatpush3.bf16.msra.mxu1 %v5591_v56  ;;  %5349 = vmatprep.mubr.bf16.mxu1 %v6753_v26  ;;  %v7042_v50 = vpop.f32.mrf.mxu1  ;;  %v3745_v26 = vsel %vm1824_vm14, %v6717_v43, %v3744_v20  ;;  %v3560_v43 = vshll.u32 %v5600_v40, 16  ;;  %v3871_v20 = vld [vmem:[#allocation2 + $0x10] sm:$0xf] }
 0x1f5   : > { %5339 = vmatprep.subr.bf16.mxu1 %v5593_v15  ;;  %v7328_v40 = vld [vmem:[#allocation7_spill] sm:$0xff] }
 0x1f6   : > { %5370 = vmatpush3.bf16.msra.mxu0 %v5592_v53  ;;  %v5044_v51 = vpop.f32.mrf.mxu1  ;;  %v3562_v58 = vrot.slane %v3560_v43, 4  ;;  %vm7329_vm1 = vnez %v7328_v40 }
 0x1f7   : > { %5371 = vmatprep.subr.bf16.mxu0 %v5594_v27  ;;  %v3872_v51 = vld [vmem:[#allocation2 + $0x14] sm:$0xf] }
 0x1f8   : > { %5340 = vmatpush3.bf16.msra.mxu1 %v5593_v15  ;;  %v1144_v63 = vpop.f32.mrf.mxu1  ;;  %v3563_v6 = vor.u32 %v3562_v58, %v3559_v2 }
 0x1f9   : > { %5341 = vmatprep.subr.bf16.mxu1 %v5595_v7 }
 0x1fa   : > { %5372 = vmatpush3.bf16.msra.mxu0 %v5594_v27  ;;  %v3564_v46 = vsel %vm1824_vm14, %v6740_v19, %v3563_v6  ;;  %v7324_v19 = vld [vmem:[#allocation3_spill] sm:$0xff] }
 0x1fb   : > { %vm7325_vm14 = vnez %v7324_v19 }
 0x1fc   : > { %v5087_v13 = vpop.f32.mrf.mxu0  ;;  %5342 = vmatpush3.bf16.msra.mxu1 %v5595_v7  ;;  %v3877_v36 = vsel %vm7325_vm14, %v3870_v54, 0 }
 0x1fd   : > { %5374 = vmatmul.mubr.bf16.vlgmr.msra.gmra.mxu0 %v6737_v55  ;;  %5343 = vmatprep.subr.bf16.mxu1 %v5596_v8  ;;  %v5598_v55 = vld [vmem:[%s7121_s3 + $0x340] sm:$0xff]  }
 0x1fe   : > { %5377 = vmatprep.mubr.bf16.mxu0 %v3745_v26  ;;  %v1440_v49 = vpop.f32.mrf.mxu0  ;;  %v3873_v26 = vld [vmem:[#allocation2 + $0x18] sm:$0xf] }
 0x200   : > { %v5088_v4 = vpop.f32.mrf.mxu0  ;;  %5344 = vmatpush3.bf16.msra.mxu1 %v5596_v8 }
 0x201   : > { %5345 = vmatprep.subr.bf16.mxu1 %v5597_v57 }
 0x202   : > { %v1443_v52 = vpop.f32.mrf.mxu0 }
 0x204   : > { %v5091_v9 = vpop.f32.mrf.mxu0  ;;  %5346 = vmatpush3.bf16.msra.mxu1 %v5597_v57 }
 0x205   : > { %5378 = vmatmul.mubr.bf16.gmra.mxu0 %v3740_v18  ;;  %5347 = vmatprep.subr.bf16.mxu1 %v5598_v55  ;;  %v5606_v18 = vld [vmem:[%s7121_s3 + $0x3c8] sm:$0xff]  }
 0x206   : > { %v1456_v37 = vpop.f32.mrf.mxu0 }
 0x208   : > { %v5092_v39 = vpop.f32.mrf.mxu0  ;;  %5348 = vmatpush3.bf16.msra.mxu1 %v5598_v55  ;;  %v7330_v55 = vld [vmem:[#allocation5_spill] sm:$0xff] }
 0x209   : > { %5381 = vmatprep.subr.bf16.mxu1 %v5599_v29  ;;  %vm7331_vm7 = vnez %v7330_v55 }
 0x20a   : > { %v5063_v3 = vpop.f32.mrf.mxu1  ;;  %v1459_v56 = vpop.f32.mrf.mxu0  ;;  %v3880_v35 = vsel %vm7331_vm7, %v3873_v26, 0 }
 0x20b   : > { %5350 = vmatmul.mubr.bf16.vlgmr.msra.gmra.mxu1 %v6757_v48  ;;  %v1268_v11 = vadd.f32 %v5063_v3, %v7017_v28  ;;  %v7322_v48 = vld [vmem:[#allocation4_spill] sm:$0xff] }
 0x20c   : > { %5353 = vmatprep.mubr.bf16.mxu1 %v3564_v46  ;;  %5382 = vmatpush3.bf16.msra.mxu1 %v5599_v29  ;;  %v1259_v41 = vpop.f32.mrf.mxu1  ;;  %vm7323_vm15 = vnez %v7322_v48  ;;  %v3875_v29 = vld [vmem:[#allocation2 + $0x20] sm:$0x1] }
 0x20d   : > { %5383 = vmatprep.subr.bf16.mxu1 %v5601_v23  ;;  %v1260_v31 = vadd.f32 %v1259_v41, %v7023_v0  ;;  %v1472_v32 = vadd.f32 %v5087_v13, %v1268_v11  ;;  %v3876_v62 = vsel %vm7323_vm15, %v3869_v24, 0 }
 0x20e   : > { %v5064_v1 = vpop.f32.mrf.mxu1  ;;  %v4629_v42 = vcombine.low %v3876_v62, %v3877_v36 }
 0x20f   : > { %v1271_v16 = vadd.f32 %v5064_v1, %v7028_v10  ;;  %v1470_v30 = vadd.f32 %v1440_v49, %v1260_v31  ;;  %v5605_v10 = vld [vmem:[%s7121_s3 + $0x3d0] sm:$0xff]   ;;  %v7326_v49 = vld [vmem:[#allocation6_spill] sm:$0xff] }
 0x210   : > { %5384 = vmatpush3.bf16.msra.mxu1 %v5601_v23  ;;  %v1262_v14 = vpop.f32.mrf.mxu1  ;;  %vm7327_vm6 = vnez %v7326_v49 }
 0x211   : > { %5385 = vmatprep.subr.bf16.mxu1 %v5602_v45  ;;  %v1263_v17 = vadd.f32 %v1262_v14, %v7030_v12  ;;  %v1473_v33 = vadd.f32 %v5088_v4, %v1271_v16  ;;  %v3878_v57 = vsel %vm7327_vm6, %v3871_v20, 0  ;;  %v3879_v4 = vsel %vm7329_vm1, %v3872_v51, 0 }
 0x212   : > { %v4630_v43 = vcombine.low %v3878_v57, %v3879_v4 }
 0x213   : > { %5354 = vmatmul.mubr.bf16.gmra.mxu1 %v3559_v2  ;;  %v1471_v44 = vadd.f32 %v1443_v52, %v1263_v17  ;;  %v3874_v52 = vld [vmem:[#allocation2 + $0x1c] sm:$0xf] }
 0x214   : > { %5386 = vmatpush3.bf16.msra.mxu1 %v5602_v45  ;;  %5397 = vmatprep.mubr.bf16.mxu1 %v4629_v42 }
 0x215   : > { %5387 = vmatprep.subr.bf16.mxu1 %v5603_v47 }
 0x218   : > { %v5067_v38 = vpop.f32.mrf.mxu1  ;;  %5388 = vmatpush3.bf16.msra.mxu1 %v5603_v47 }
 0x219   : > { %v1284_v5 = vadd.f32 %v5067_v38, %v7039_v22  ;;  %5389 = vmatprep.subr.bf16.mxu1 %v5604_v21 }
 0x21a   : > { %v1275_v60 = vpop.f32.mrf.mxu1 }
 0x21b   : > { %v1276_v28 = vadd.f32 %v1275_v60, %v7042_v50  ;;  %v1476_v53 = vadd.f32 %v5091_v9, %v1284_v5  ;;  %v5607_v50 = vld [vmem:[%s7121_s3 + $0x3c0] sm:$0xff]   ;;  %v7332_v9 = vld [vmem:[#allocation8_spill] sm:$0xff] }
 0x21c   : > { %v5068_v0 = vpop.f32.mrf.mxu1  ;;  %5390 = vmatpush3.bf16.msra.mxu1 %v5604_v21  ;;  %vm7333_vm12 = vnez %v7332_v9 }
 0x21d   : > { %v1474_v34 = vadd.f32 %v1456_v37, %v1276_v28  ;;  %v5135_v59 = vpop.f32.mrf.mxu0  ;;  %5391 = vmatprep.subr.bf16.mxu1 %v5605_v10  ;;  %v3881_v37 = vsel %vm7333_vm12, %v3874_v52, 0 }
 0x21e   : > { %v1278_v61 = vpop.f32.mrf.mxu1  ;;  %v4631_v2 = vcombine.low %v3880_v35, %v3881_v37 }
 0x21f   : > { %v1279_v12 = vadd.f32 %v1278_v61, %v1144_v63  ;;  %v1946_v15 = vpop.f32.mrf.mxu0  ;;  %v7334_v63 = vld [vmem:[#allocation10_spill] sm:$0xff] }
 0x220   : > { %5392 = vmatpush3.bf16.msra.mxu1 %v5605_v10  ;;  %vm7335_vm4 = vnez %v7334_v63 }
 0x221   : > { %v1475_v27 = vadd.f32 %v1459_v56, %v1279_v12  ;;  %v5136_v25 = vpop.f32.mrf.mxu0  ;;  %5393 = vmatprep.subr.bf16.mxu1 %v5606_v18  ;;  %v3882_v6 = vsel %vm7335_vm4, %v3875_v29, 0 }
 0x222   : > { %v4632_v24 = vcombine.low %v3882_v6, %v3882_v6 }
 0x223   : > { %v1949_v22 = vpop.f32.mrf.mxu0 }
 0x224   : > { %5394 = vmatpush3.bf16.msra.mxu1 %v5606_v18 }
 0x225   : > { %v5139_v7 = vpop.f32.mrf.mxu0  ;;  %5395 = vmatprep.subr.bf16.mxu1 %v5607_v50 }
 0x227   : > { %v1962_v8 = vpop.f32.mrf.mxu0 }
 0x228   : > { %5396 = vmatpush3.bf16.msra.mxu1 %v5607_v50 }
 0x229   : > { %v5140_v13 = vpop.f32.mrf.mxu0 }
 0x22b   : > { %v5111_v58 = vpop.f32.mrf.mxu1  ;;  %5398 = vmatmul.mubr.bf16.vlgmr.msra.gmra.mxu1 %v4630_v43  ;;  %v1965_v47 = vpop.f32.mrf.mxu0 }
 0x22c   : > { %v1689_v39 = vadd.f32 %v5111_v58, %v1472_v32  ;;  %5401 = vmatprep.mubr.bf16.mxu1 %v4631_v2 }
 0x22d   : > { %v1657_v23 = vpop.f32.mrf.mxu1 }
 0x22e   : > { %v1687_v3 = vadd.f32 %v1657_v23, %v1470_v30  ;;  %v1978_v46 = vadd.f32 %v5135_v59, %v1689_v39 }
 0x22f   : > { %v5112_v11 = vpop.f32.mrf.mxu1 }
 0x230   : > { %v1690_v54 = vadd.f32 %v5112_v11, %v1473_v33  ;;  %v1976_v41 = vadd.f32 %v1946_v15, %v1687_v3 }
 0x231   : > { %v1660_v45 = vpop.f32.mrf.mxu1 }
 0x232   : > { %v1688_v31 = vadd.f32 %v1660_v45, %v1471_v44  ;;  %v1979_v1 = vadd.f32 %v5136_v25, %v1690_v54 }
 0x233   : > { %v5115_v48 = vpop.f32.mrf.mxu1  ;;  %5402 = vmatmul.mubr.bf16.gmra.mxu1 %v4632_v24 }
 0x234   : > { %v1693_v62 = vadd.f32 %v5115_v48, %v1476_v53  ;;  %v1977_v19 = vadd.f32 %v1949_v22, %v1688_v31 }
 0x235   : > { %v1673_v36 = vpop.f32.mrf.mxu1 }
 0x236   : > { %v1691_v32 = vadd.f32 %v1673_v36, %v1474_v34  ;;  %v1982_v16 = vadd.f32 %v5139_v7, %v1693_v62 }
 0x237   : > { %v5116_v14 = vpop.f32.mrf.mxu1 }
 0x238   : > { %v1980_v17 = vadd.f32 %v1962_v8, %v1691_v32 }
 0x239   : > { %v1676_v42 = vpop.f32.mrf.mxu1 }
 0x23a   : > { %v1692_v30 = vadd.f32 %v1676_v42, %v1475_v27 }
 0x23c   : > { %v1981_v60 = vadd.f32 %v1965_v47, %v1692_v30 }
 0x23d   : > { %v5183_v38 = vpop.f32.mrf.mxu0 }
 0x23f   : > { %v2276_v5 = vpop.f32.mrf.mxu0 }
 0x241   : > { %v5184_v33 = vpop.f32.mrf.mxu0 }
 0x243   : > { %v2279_v21 = vpop.f32.mrf.mxu0 }
 0x245   : > { %v5187_v28 = vpop.f32.mrf.mxu0 }
 0x247   : > { %v2292_v44 = vpop.f32.mrf.mxu0 }
 0x249   : > { %v5188_v0 = vpop.f32.mrf.mxu0 }
 0x24b   : > { %v5159_v56 = vpop.f32.mrf.mxu1  ;;  %v2295_v13 = vpop.f32.mrf.mxu0 }
 0x24c   : > { %v2143_v61 = vadd.f32 %v5159_v56, %v1978_v46 }
 0x24d   : > { %v2111_v53 = vpop.f32.mrf.mxu1 }
 0x24e   : > { %v2141_v10 = vadd.f32 %v2111_v53, %v1976_v41  ;;  %v2308_v12 = vadd.f32 %v5183_v38, %v2143_v61 }
 0x24f   : > { %v5160_v34 = vpop.f32.mrf.mxu1 }
 0x250   : > { %v2144_v59 = vadd.f32 %v5160_v34, %v1979_v1  ;;  %v2306_v15 = vadd.f32 %v2276_v5, %v2141_v10 }
 0x251   : > { %v2114_v18 = vpop.f32.mrf.mxu1 }
 0x252   : > { %v2142_v25 = vadd.f32 %v2114_v18, %v1977_v19  ;;  %v2309_v22 = vadd.f32 %v5184_v33, %v2144_v59 }
 0x253   : > { %v5163_v27 = vpop.f32.mrf.mxu1 }
 0x254   : > { %v2147_v50 = vadd.f32 %v5163_v27, %v1982_v16  ;;  %v2307_v7 = vadd.f32 %v2279_v21, %v2142_v25 }
 0x255   : > { %v2127_v20 = vpop.f32.mrf.mxu1 }
 0x256   : > { %v2145_v51 = vadd.f32 %v2127_v20, %v1980_v17  ;;  %v2312_v8 = vadd.f32 %v5187_v28, %v2147_v50 }
 0x257   : > { %v5164_v26 = vpop.f32.mrf.mxu1 }
 0x258   : > { %v2310_v49 = vadd.f32 %v2292_v44, %v2145_v51 }
 0x259   : > { %v2130_v57 = vpop.f32.mrf.mxu1 }
 0x25a   : > { %v2146_v40 = vadd.f32 %v2130_v57, %v1981_v60 }
 0x25c   : > { %v2311_v55 = vadd.f32 %v2295_v13, %v2146_v40 }
 0x25d   : > { %v5231_v4 = vpop.f32.mrf.mxu0 }
 0x25f   : > { %v2739_v52 = vpop.f32.mrf.mxu0 }
 0x261   : > { %v5232_v35 = vpop.f32.mrf.mxu0 }
 0x263   : > { %v2742_v43 = vpop.f32.mrf.mxu0 }
 0x265   : > { %v5235_v9 = vpop.f32.mrf.mxu0 }
 0x267   : > { %v2755_v37 = vpop.f32.mrf.mxu0 }
 0x269   : > { %v5236_v29 = vpop.f32.mrf.mxu0 }
 0x26b   : > { %v5207_v2 = vpop.f32.mrf.mxu1  ;;  %v2758_v36 = vpop.f32.mrf.mxu0 }
 0x26c   : > { %v2569_v58 = vadd.f32 %v5207_v2, %v2308_v12 }
 0x26d   : > { %v2537_v39 = vpop.f32.mrf.mxu1 }
 0x26e   : > { %v2567_v63 = vadd.f32 %v2537_v39, %v2306_v15  ;;  %v2771_v6 = vadd.f32 %v5231_v4, %v2569_v58 }
 0x26f   : > { %v5208_v23 = vpop.f32.mrf.mxu1 }
 0x270   : > { %v2570_v3 = vadd.f32 %v5208_v23, %v2309_v22  ;;  %v2769_v46 = vadd.f32 %v2739_v52, %v2567_v63 }
 0x271   : > { %v2540_v11 = vpop.f32.mrf.mxu1 }
 0x272   : > { %v2568_v24 = vadd.f32 %v2540_v11, %v2307_v7  ;;  %v2772_v54 = vadd.f32 %v5232_v35, %v2570_v3 }
 0x273   : > { %v5211_v41 = vpop.f32.mrf.mxu1 }
 0x274   : > { %v2573_v45 = vadd.f32 %v5211_v41, %v2312_v8  ;;  %v2770_v31 = vadd.f32 %v2742_v43, %v2568_v24 }
 0x275   : > { %v2553_v1 = vpop.f32.mrf.mxu1 }
 0x276   : > { %v2571_v48 = vadd.f32 %v2553_v1, %v2310_v49  ;;  %v2775_v62 = vadd.f32 %v5235_v9, %v2573_v45 }
 0x277   : > { %v5212_v19 = vpop.f32.mrf.mxu1 }
 0x278   : > { %v2773_v32 = vadd.f32 %v2755_v37, %v2571_v48 }
 0x279   : > { %v2556_v16 = vpop.f32.mrf.mxu1 }
 0x27a   : > { %v2572_v14 = vadd.f32 %v2556_v16, %v2311_v55 }
 0x27c   : > { %v2774_v42 = vadd.f32 %v2758_v36, %v2572_v14 }
 0x27d   : > { %v5279_v47 = vpop.f32.mrf.mxu0 }
 0x27f   : > { %v3069_v17 = vpop.f32.mrf.mxu0 }
 0x281   : > { %v5280_v30 = vpop.f32.mrf.mxu0 }
 0x283   : > { %v3072_v38 = vpop.f32.mrf.mxu0 }
 0x285   : > { %v5283_v5 = vpop.f32.mrf.mxu0 }
 0x287   : > { %v3085_v60 = vpop.f32.mrf.mxu0 }
 0x289   : > { %v5284_v33 = vpop.f32.mrf.mxu0 }
 0x28b   : > { %v5255_v21 = vpop.f32.mrf.mxu1  ;;  %v3088_v20 = vpop.f32.mrf.mxu0 }
 0x28c   : > { %v2936_v28 = vadd.f32 %v5255_v21, %v2771_v6 }
 0x28d   : > { %v2904_v44 = vpop.f32.mrf.mxu1 }
 0x28e   : > { %v2934_v0 = vadd.f32 %v2904_v44, %v2769_v46  ;;  %v3101_v56 = vadd.f32 %v5279_v47, %v2936_v28 }
 0x28f   : > { %v5256_v61 = vpop.f32.mrf.mxu1 }
 0x290   : > { %v2937_v53 = vadd.f32 %v5256_v61, %v2772_v54  ;;  %v3099_v10 = vadd.f32 %v3069_v17, %v2934_v0 }
 0x291   : > { %v2907_v12 = vpop.f32.mrf.mxu1 }
 0x292   : > { %v2935_v34 = vadd.f32 %v2907_v12, %v2770_v31  ;;  %v3102_v59 = vadd.f32 %v5280_v30, %v2937_v53 }
 0x293   : > { %v5259_v15 = vpop.f32.mrf.mxu1 }
 0x294   : > { %v2940_v18 = vadd.f32 %v5259_v15, %v2775_v62  ;;  %v3100_v25 = vadd.f32 %v3072_v38, %v2935_v34  ;;  %v4641_v15 = vld [vmem:[%s7122_s4] ss:$0 sm:$0xff] }
 0x295   : > { %v2920_v22 = vpop.f32.mrf.mxu1 }
 0x296   : > { %v2938_v27 = vadd.f32 %v2920_v22, %v2773_v32  ;;  %v3105_v50 = vadd.f32 %v5283_v5, %v2940_v18 }
 0x297   : > { %v5260_v7 = vpop.f32.mrf.mxu1 }
 0x298   : > { %v3103_v51 = vadd.f32 %v3085_v60, %v2938_v27 }
 0x299   : > { %v2923_v8 = vpop.f32.mrf.mxu1 }
 0x29a   : > { %v2939_v26 = vadd.f32 %v2923_v8, %v2774_v42 }
 0x29c   : > { %v3104_v57 = vadd.f32 %v3088_v20, %v2939_v26 }
 0x29d   : > { %v5327_v13 = vpop.f32.mrf.mxu0 }
 0x29f   : > { %v3468_v49 = vpop.f32.mrf.mxu0 }
 0x2a1   : > { %v5328_v40 = vpop.f32.mrf.mxu0 }
 0x2a3   : > { %v3471_v4 = vpop.f32.mrf.mxu0 }
 0x2a5   : > { %v5331_v52 = vpop.f32.mrf.mxu0 }
 0x2a7   : > { %v3484_v55 = vpop.f32.mrf.mxu0 }
 0x2a9   : > { %v5332_v35 = vpop.f32.mrf.mxu0 }
 0x2ab   : > { %v5303_v43 = vpop.f32.mrf.mxu1  ;;  %v3487_v1 = vpop.f32.mrf.mxu0 }
 0x2ac   : > { %v3296_v9 = vadd.f32 %v5303_v43, %v3101_v56 }
 0x2ad   : > { %v3264_v37 = vpop.f32.mrf.mxu1 }
 0x2ae   : > { %v3294_v29 = vadd.f32 %v3264_v37, %v3099_v10  ;;  %v3500_v2 = vadd.f32 %v5327_v13, %v3296_v9 }
 0x2af   : > { %v5304_v58 = vpop.f32.mrf.mxu1 }
 0x2b0   : > { %v3297_v39 = vadd.f32 %v5304_v58, %v3102_v59  ;;  %v3498_v63 = vadd.f32 %v3468_v49, %v3294_v29 }
 0x2b1   : > { %v3267_v6 = vpop.f32.mrf.mxu1 }
 0x2b2   : > { %v3295_v23 = vadd.f32 %v3267_v6, %v3100_v25  ;;  %v3501_v3 = vadd.f32 %v5328_v40, %v3297_v39 }
 0x2b3   : > { %v5307_v46 = vpop.f32.mrf.mxu1 }
 0x2b4   : > { %v3300_v11 = vadd.f32 %v5307_v46, %v3105_v50  ;;  %v3499_v24 = vadd.f32 %v3471_v4, %v3295_v23 }
 0x2b5   : > { %v3280_v54 = vpop.f32.mrf.mxu1 }
 0x2b6   : > { %v3298_v41 = vadd.f32 %v3280_v54, %v3103_v51  ;;  %v3504_v45 = vadd.f32 %v5331_v52, %v3300_v11 }
 0x2b7   : > { %v5308_v31 = vpop.f32.mrf.mxu1 }
 0x2b8   : > { %v3502_v48 = vadd.f32 %v3484_v55, %v3298_v41  ;;  %v4097_v41 = vld [vmem:[%s224_s27 + $0x18] sm:$0x1] }
 0x2b9   : > { %v3283_v17 = vpop.f32.mrf.mxu1 }
 0x2ba   : > { %v3299_v59 = vadd.f32 %v3283_v17, %v3104_v57 }
 0x2bc   : > { %v3503_v26 = vadd.f32 %v3487_v1, %v3299_v59 }
 0x2bd   : > { %v5375_v62 = vpop.f32.mrf.mxu0 }
 0x2bf   : > { %v3832_v19 = vpop.f32.mrf.mxu0 }
 0x2c1   : > { %v5376_v36 = vpop.f32.mrf.mxu0 }
 0x2c3   : > { %v3835_v32 = vpop.f32.mrf.mxu0 }
 0x2c5   : > { %v5379_v16 = vpop.f32.mrf.mxu0 }
 0x2c7   : > { %v3848_v14 = vpop.f32.mrf.mxu0 }
 0x2c9   : > { %v5380_v47 = vpop.f32.mrf.mxu0 }
 0x2cb   : > { %v5351_v42 = vpop.f32.mrf.mxu1 }
 0x2cc   : > { %v3683_v28 = vadd.f32 %v5351_v42, %v3500_v2 }
 0x2cd   : > { %v3651_v30 = vpop.f32.mrf.mxu1 }
 0x2ce   : > { %v3681_v44 = vadd.f32 %v3651_v30, %v3498_v63  ;;  %v3864_v61 = vadd.f32 %v5375_v62, %v3683_v28 }
 0x2cf   : > { %v5352_v38 = vpop.f32.mrf.mxu1 }
 0x2d0   : > { %v3684_v56 = vadd.f32 %v5352_v38, %v3501_v3  ;;  %v3862_v34 = vadd.f32 %v3832_v19, %v3681_v44  ;;  %v3851_v3 = vpop.f32.mrf.mxu0 }
 0x2d1   : > { %v3654_v5 = vpop.f32.mrf.mxu1 }
 0x2d2   : > { %v3682_v10 = vadd.f32 %v3654_v5, %v3499_v24  ;;  %v3865_v27 = vadd.f32 %v5376_v36, %v3684_v56 }
 0x2d3   : > { %v5355_v60 = vpop.f32.mrf.mxu1 }
 0x2d4   : > { %v3687_v25 = vadd.f32 %v5355_v60, %v3504_v45  ;;  %v3863_v8 = vadd.f32 %v3835_v32, %v3682_v10 }
 0x2d5   : > { %v3667_v33 = vpop.f32.mrf.mxu1 }
 0x2d6   : > { %v3685_v50 = vadd.f32 %v3667_v33, %v3502_v48  ;;  %v3868_v57 = vadd.f32 %v5379_v16, %v3687_v25 }
 0x2d7   : > { %v5356_v21 = vpop.f32.mrf.mxu1 }
 0x2d8   : > { %v3866_v35 = vadd.f32 %v3848_v14, %v3685_v50 }
 0x2d9   : > { %v3670_v0 = vpop.f32.mrf.mxu1 }
 0x2da   : > { %v3686_v52 = vadd.f32 %v3670_v0, %v3503_v26 }
 0x2dc   : > { %v3867_v54 = vadd.f32 %v3851_v3, %v3686_v52 }
 0x2eb   : > { %v5399_v53 = vpop.f32.mrf.mxu1 }
 0x2ec   : > { %v4036_v12 = vadd.f32 %v5399_v53, %v3864_v61 }
 0x2ed   : > { %v4004_v18 = vpop.f32.mrf.mxu1 }
 0x2ee   : > { %v4034_v22 = vadd.f32 %v4004_v18, %v3862_v34  ;;  %v4050_v20 = vadd.f32 %v4641_v15, %v4036_v12 }
 0x2ef   : > { %v5400_v7 = vpop.f32.mrf.mxu1 }
 0x2f0   : > { %v4037_v51 = vadd.f32 %v5400_v7, %v3865_v27  ;;  %v4048_v13 = vadd.f32 %v4641_v15, %v4034_v22  ;;  %v4057_v43 = vmax.f32 %v4050_v20, 0.0 }
 0x2f1   : > { %v4007_v49 = vpop.f32.mrf.mxu1 }
 0x2f2   : > { %v4051_v40 = vadd.f32 %v4641_v15, %v4037_v51  ;;  %v4035_v4 = vadd.f32 %v4007_v49, %v3863_v8  ;;  %v4055_v2 = vmax.f32 %v4048_v13, 0.0 }
 0x2f3   : > { %v5403_v55 = vpop.f32.mrf.mxu1 }
 0x2f4   : > { %v4058_v9 = vmax.f32 %v4051_v40, 0.0  ;;  %v4049_v37 = vadd.f32 %v4641_v15, %v4035_v4  ;;  %v4040_v29 = vadd.f32 %v5403_v55, %v3868_v57 }
 0x2f5   : > { %v4020_v58 = vpop.f32.mrf.mxu1 }
 0x2f6   : > { %v4744_v39 = vpack.c.bf16 %v4058_v9, %v4057_v43  ;;  %v4056_v63 = vmax.f32 %v4049_v37, 0.0  ;;  %v4054_v6 = vadd.f32 %v4641_v15, %v4040_v29  ;;  %v4038_v23 = vadd.f32 %v4020_v58, %v3866_v35 }
 0x2f7   : > { %v5404_v46 = vpop.f32.mrf.mxu1 }
 0x2f8   : > { %4761 = vst [vmem:[%s224_s27 + $0x8] sm:$0xff] %v4744_v39   ;;  %v4739_v11 = vpack.c.bf16 %v4056_v63, %v4055_v2  ;;  %v4061_v24 = vmax.f32 %v4054_v6, 0.0  ;;  %v4052_v1 = vadd.f32 %v4641_v15, %v4038_v23 }
 0x2f9   : > { %v4023_v45 = vpop.f32.mrf.mxu1 }
 0x2fa   : > { %4740 = vst [vmem:[%s224_s27] sm:$0xff] %v4739_v11   ;;  %v4685_v31 = vpack.c.bf16 %v4061_v24, %v4061_v24  ;;  %v4039_v48 = vadd.f32 %v4023_v45, %v3867_v54  ;;  %v4059_v32 = vmax.f32 %v4052_v1, 0.0 }
 0x2fc   : > { %v4098_v19 = vsel %vm6153_vm5, %v4685_v31, %v4097_v41  ;;  %v4053_v36 = vadd.f32 %v4641_v15, %v4039_v48 }
 0x2fd   : > { %4099 = vst [vmem:[%s224_s27 + $0x18] sm:$0x1] %v4098_v19 }
 0x2fe   : > { %v4060_v16 = vmax.f32 %v4053_v36, 0.0 }
 0x300   : > { %v4749_v14 = vpack.c.bf16 %v4060_v16, %v4059_v32 }
 0x302   : > { %4762 = vst [vmem:[%s224_s27 + $0x10] sm:$0xff] %v4749_v14  }
 0x303 PF: > { %s15_s18 = sadd.s32 1, %s5617_s18  }
 0x304   : > { %p12_p4 = scmp.ge.s32.totalorder %s15_s18, 4  }
 0x306   :  { %14 = sbr.rel (!%p12_p4) target bundleno = 1 (0x1), region = 88 }

// kernel: encoder_forward.3
= control target key start
LH: loop header
LB: loop body
LE: loop exit
PB: predicated region body
PF: predicated region fallthrough
CT: control target
= control target key end

     0   :  { %v5886_v21 = vmov 1966171168   ;;  %v824_v23 = vlaneseq  ;;  %vm5888_vm0 = vmmov 0   ;;  %s7196_s1 = inlined_call_operand.vmem [shape: bf16[6272,128], index: 1, kind: input, shape index: {}]   ;;  %s7197_s0 = inlined_call_operand.vmem [shape: bf16[2,6272], index: 0, kind: input, shape index: {}]   ;;  %s7198_s2 = inlined_call_operand.vmem [shape: f32[1,128], index: 2, kind: input, shape index: {}]   ;;  %s7199_s3 = inlined_call_operand.vmem [shape: f32[2,128], index: 3, kind: output, shape index: {}]  }
   0x1   :  { %v5488_v0 = vld [vmem:[%s7196_s1 + $0x78] sm:$0xff]   ;;  %v5492_v4 = vld [vmem:[%s7196_s1 + $0x70] sm:$0xff]   ;;  %v5496_v8 = vld [vmem:[%s7196_s1 + $0x68] sm:$0xff]   ;;  %v822_v22 = vunpack.c.l.s4 %v5886_v21 }
   0x2   :  { %v5489_v1 = vld [vmem:[%s7196_s1 + $0x38] sm:$0xff]   ;;  %4928 = vmatprep.subr.bf16.mxu0 %v5488_v0  ;;  %v5493_v5 = vld [vmem:[%s7196_s1 + $0x30] sm:$0xff]   ;;  %v5497_v9 = vld [vmem:[%s7196_s1 + $0x28] sm:$0xff]   ;;  %v825_v29 = vshrl.u32 %v824_v23, 7 }
   0x3   :  { %v5490_v2 = vld [vmem:[%s7196_s1 + $0xf8] sm:$0xff]   ;;  %4929 = vmatpush3.bf16.msra.mxu0 %v5489_v1  ;;  %v5494_v6 = vld [vmem:[%s7196_s1 + $0xf0] sm:$0xff]   ;;  %v5498_v10 = vld [vmem:[%s7196_s1 + $0xe8] sm:$0xff]   ;;  %v823_v28 = vunpack.c.0.s8 %v822_v22 }
   0x4   :  { %v5491_v3 = vld [vmem:[%s7196_s1 + $0xb8] sm:$0xff]   ;;  %4950 = vmatprep.subr.bf16.mxu1 %v5490_v2  ;;  %4930 = vmatprep.subr.bf16.mxu0 %v5492_v4  ;;  %v5495_v7 = vld [vmem:[%s7196_s1 + $0xb0] sm:$0xff]   ;;  %v5499_v11 = vld [vmem:[%s7196_s1 + $0xa8] sm:$0xff]  }
   0x5   :  { %4951 = vmatpush3.bf16.msra.mxu1 %v5491_v3  ;;  %v5500_v12 = vld [vmem:[%s7196_s1 + $0x60] sm:$0xff]   ;;  %v5504_v16 = vld [vmem:[%s7196_s1 + $0x58] sm:$0xff]   ;;  %v5508_v20 = vld [vmem:[%s7196_s1 + $0x50] sm:$0xff]   ;;  %v5996_v34 = vsub.s32 %v823_v28, %v825_v29 }
   0x6   :  { %4952 = vmatprep.subr.bf16.mxu1 %v5494_v6  ;;  %v5501_v13 = vld [vmem:[%s7196_s1 + $0x20] sm:$0xff]   ;;  %v5505_v17 = vld [vmem:[%s7196_s1 + $0x18] sm:$0xff]   ;;  %v5509_v24 = vld [vmem:[%s7196_s1 + $0x10] sm:$0xff]  }
   0x7   :  { %4931 = vmatpush3.bf16.msra.mxu0 %v5493_v5  ;;  %v5502_v14 = vld [vmem:[%s7196_s1 + $0xe0] sm:$0xff]   ;;  %v5506_v18 = vld [vmem:[%s7196_s1 + $0xd8] sm:$0xff]   ;;  %v5510_v25 = vld [vmem:[%s7196_s1 + $0xd0] sm:$0xff]  }
   0x8   :  { %4932 = vmatprep.subr.bf16.mxu0 %v5496_v8  ;;  %v5503_v15 = vld [vmem:[%s7196_s1 + $0xa0] sm:$0xff]   ;;  %v5507_v19 = vld [vmem:[%s7196_s1 + $0x98] sm:$0xff]   ;;  %v5511_v26 = vld [vmem:[%s7196_s1 + $0x90] sm:$0xff]  }
   0x9   :  { %4953 = vmatpush3.bf16.msra.mxu1 %v5495_v7  ;;  %v5512_v27 = vld [vmem:[%s7196_s1 + $0x48] sm:$0xff]   ;;  %v5516_v33 = vld [vmem:[%s7196_s1 + $0x40] sm:$0xff]   ;;  %v5521_v41 = vld [vmem:[%s7196_s1 + $0x178] sm:$0xff]  }
   0xa   :  { %4954 = vmatprep.subr.bf16.mxu1 %v5498_v10  ;;  %v5513_v30 = vld [vmem:[%s7196_s1 + $0x8] sm:$0xff]   ;;  %v5517_v35 = vld [vmem:[%s7196_s1] sm:$0xff]   ;;  %v5522_v44 = vld [vmem:[%s7196_s1 + $0x138] sm:$0xff]  }
   0xb   :  { %4933 = vmatpush3.bf16.msra.mxu0 %v5497_v9  ;;  %v5514_v31 = vld [vmem:[%s7196_s1 + $0xc8] sm:$0xff]   ;;  %v5518_v36 = vld [vmem:[%s7196_s1 + $0xc0] sm:$0xff]   ;;  %v5523_v46 = vld [vmem:[%s7196_s1 + $0x1f8] sm:$0xff]  }
   0xc   :  { %4934 = vmatprep.subr.bf16.mxu0 %v5500_v12  ;;  %v5515_v32 = vld [vmem:[%s7196_s1 + $0x88] sm:$0xff]   ;;  %v15_v37 = vld [vmem:[%s7197_s0] sm:$0xff]  ;;  %v5524_v48 = vld [vmem:[%s7196_s1 + $0x1b8] sm:$0xff]  }
   0xd   :  { %4955 = vmatpush3.bf16.msra.mxu1 %v5499_v11  ;;  %v820_v38 = vcombine.high %v15_v37, %v15_v37  ;;  %v827_v39 = vrot.slane %v15_v37, %v5996_v34  ;;  %v5520_v40 = vld [vmem:[%s7196_s1 + $0x80] sm:$0xff]   ;;  %v5525_v51 = vld [vmem:[%s7196_s1 + $0x170] sm:$0xff]   ;;  %v5529_v58 = vld [vmem:[%s7196_s1 + $0x168] sm:$0xff]  }
   0xe   :  { %4956 = vmatprep.subr.bf16.mxu1 %v5502_v14  ;;  %v5526_v53 = vld [vmem:[%s7196_s1 + $0x130] sm:$0xff]   ;;  %v5530_v59 = vld [vmem:[%s7196_s1 + $0x128] sm:$0xff]   ;;  %v5533_v62 = vld [vmem:[%s7196_s1 + $0x160] sm:$0xff]  }
   0xf   :  { %4935 = vmatpush3.bf16.msra.mxu0 %v5501_v13  ;;  %v835_v42 = vcombine.high %v827_v39, %v827_v39  ;;  %v843_v43 = vrot.slane %v827_v39, %v5996_v34  ;;  %v6019_v45 = vrot.slane %v820_v38, %v5996_v34  ;;  %v5527_v55 = vld [vmem:[%s7196_s1 + $0x1f0] sm:$0xff]   ;;  %v5531_v60 = vld [vmem:[%s7196_s1 + $0x1e8] sm:$0xff]   ;;  %v5534_v63 = vld [vmem:[%s7196_s1 + $0x120] sm:$0xff]  }
  0x10   :  { %4936 = vmatprep.subr.bf16.mxu0 %v5504_v16  ;;  %v5528_v56 = vld [vmem:[%s7196_s1 + $0x1b0] sm:$0xff]   ;;  %v5532_v61 = vld [vmem:[%s7196_s1 + $0x1a8] sm:$0xff]   ;;  %v5535_v0 = vld [vmem:[%s7196_s1 + $0x1e0] sm:$0xff]  }
  0x11   :  { %4957 = vmatpush3.bf16.msra.mxu1 %v5503_v15  ;;  %v857_v47 = vrot.slane %v835_v42, %v5996_v34  ;;  %v836_v49 = vcombine.high %v6019_v45, %v6019_v45  ;;  %v865_v50 = vcombine.high %v843_v43, %v843_v43  ;;  %v5536_v1 = vld [vmem:[%s7196_s1 + $0x1a0] sm:$0xff]   ;;  %v5537_v2 = vld [vmem:[%s7196_s1 + $0x158] sm:$0xff]   ;;  %v5541_v6 = vld [vmem:[%s7196_s1 + $0x150] sm:$0xff]  }
  0x12   :  { %4958 = vmatprep.subr.bf16.mxu1 %v5506_v18  ;;  %v5538_v3 = vld [vmem:[%s7196_s1 + $0x118] sm:$0xff]   ;;  %v5542_v7 = vld [vmem:[%s7196_s1 + $0x110] sm:$0xff]   ;;  %v5545_v10 = vld [vmem:[%s7196_s1 + $0x148] sm:$0xff]   ;;  %v850_v18 = vrot.slane %v6019_v45, %v5996_v34 }
  0x13   :  { %4937 = vmatpush3.bf16.msra.mxu0 %v5505_v17  ;;  %3561 = vmatprep.mubr.bf16.mxu0 %v857_v47  ;;  %v867_v52 = vcombine.high %v857_v47, %v857_v47  ;;  %v864_v54 = vrot.slane %v836_v49, %v5996_v34  ;;  %v5539_v4 = vld [vmem:[%s7196_s1 + $0x1d8] sm:$0xff]   ;;  %v5543_v8 = vld [vmem:[%s7196_s1 + $0x1d0] sm:$0xff]   ;;  %v5546_v11 = vld [vmem:[%s7196_s1 + $0x108] sm:$0xff]  }
  0x14   :  { %4938 = vmatprep.subr.bf16.mxu0 %v5508_v20  ;;  %v5540_v5 = vld [vmem:[%s7196_s1 + $0x198] sm:$0xff]   ;;  %v5544_v9 = vld [vmem:[%s7196_s1 + $0x190] sm:$0xff]   ;;  %v5547_v12 = vld [vmem:[%s7196_s1 + $0x1c8] sm:$0xff]   ;;  %v866_v23 = vcombine.high %v850_v18, %v850_v18 }
  0x15   :  { %4959 = vmatpush3.bf16.msra.mxu1 %v5507_v19  ;;  %3601 = vmatprep.mubr.bf16.mxu1 %v867_v52  ;;  %v868_v57 = vcombine.high %v864_v54, %v864_v54  ;;  %v5548_v13 = vld [vmem:[%s7196_s1 + $0x188] sm:$0xff]   ;;  %v5549_v14 = vld [vmem:[%s7196_s1 + $0x140] sm:$0xff]   ;;  %v5553_v19 = vld [vmem:[%s7196_s1 + $0x278] sm:$0xff]  }
  0x16   :  { %4960 = vmatprep.subr.bf16.mxu1 %v5510_v25  ;;  %v5550_v15 = vld [vmem:[%s7196_s1 + $0x100] sm:$0xff]   ;;  %v5554_v20 = vld [vmem:[%s7196_s1 + $0x238] sm:$0xff]   ;;  %v5558_v25 = vld [vmem:[%s7196_s1 + $0x230] sm:$0xff]  }
  0x17   :  { %4939 = vmatpush3.bf16.msra.mxu0 %v5509_v24  ;;  %v5551_v16 = vld [vmem:[%s7196_s1 + $0x1c0] sm:$0xff]   ;;  %v5555_v21 = vld [vmem:[%s7196_s1 + $0x2f8] sm:$0xff]   ;;  %v5557_v24 = vld [vmem:[%s7196_s1 + $0x270] sm:$0xff]  }
  0x18   :  { %4940 = vmatprep.subr.bf16.mxu0 %v5512_v27  ;;  %v5552_v17 = vld [vmem:[%s7196_s1 + $0x180] sm:$0xff]   ;;  %v5556_v22 = vld [vmem:[%s7196_s1 + $0x2b8] sm:$0xff]   ;;  %v5560_v27 = vld [vmem:[%s7196_s1 + $0x2b0] sm:$0xff]  }
  0x19   :  { %4961 = vmatpush3.bf16.msra.mxu1 %v5511_v26  ;;  %v5559_v26 = vld [vmem:[%s7196_s1 + $0x2f0] sm:$0xff]   ;;  %v5561_v28 = vld [vmem:[%s7196_s1 + $0x268] sm:$0xff]   ;;  %v5569_v37 = vld [vmem:[%s7196_s1 + $0x258] sm:$0xff]  }
  0x1a   :  { %4962 = vmatprep.subr.bf16.mxu1 %v5514_v31  ;;  %v5562_v29 = vld [vmem:[%s7196_s1 + $0x228] sm:$0xff]   ;;  %v5570_v38 = vld [vmem:[%s7196_s1 + $0x218] sm:$0xff]   ;;  %v5574_v42 = vld [vmem:[%s7196_s1 + $0x210] sm:$0xff]  }
  0x1b   :  { %4941 = vmatpush3.bf16.msra.mxu0 %v5513_v30  ;;  %v5563_v30 = vld [vmem:[%s7196_s1 + $0x2e8] sm:$0xff]   ;;  %v5571_v39 = vld [vmem:[%s7196_s1 + $0x2d8] sm:$0xff]   ;;  %v5581_v49 = vld [vmem:[%s7196_s1 + $0x240] sm:$0xff]  }
  0x1c   :  { %4942 = vmatprep.subr.bf16.mxu0 %v5516_v33  ;;  %v5564_v31 = vld [vmem:[%s7196_s1 + $0x2a8] sm:$0xff]   ;;  %v5566_v33 = vld [vmem:[%s7196_s1 + $0x220] sm:$0xff]  }
  0x1d   :  { %4963 = vmatpush3.bf16.msra.mxu1 %v5515_v32  ;;  %v5565_v32 = vld [vmem:[%s7196_s1 + $0x260] sm:$0xff]   ;;  %v5577_v45 = vld [vmem:[%s7196_s1 + $0x248] sm:$0xff]  }
  0x1e   :  { %4964 = vmatprep.subr.bf16.mxu1 %v5518_v36  ;;  %v5568_v36 = vld [vmem:[%s7196_s1 + $0x2a0] sm:$0xff]   ;;  %v5579_v47 = vld [vmem:[%s7196_s1 + $0x2c8] sm:$0xff]  }
  0x1f   :  { %4943 = vmatpush3.bf16.msra.mxu0 %v5517_v35  ;;  %v5567_v35 = vld [vmem:[%s7196_s1 + $0x2e0] sm:$0xff]   ;;  %v16_v52 = vld [vmem:[%s7197_s0 + $0x8] sm:$0xff] }
  0x20   :  { %4972 = vmatprep.subr.bf16.mxu0 %v5521_v41  ;;  %v5573_v41 = vld [vmem:[%s7196_s1 + $0x250] sm:$0xff]  }
  0x21   :  { %4965 = vmatpush3.bf16.msra.mxu1 %v5520_v40  ;;  %v5572_v40 = vld [vmem:[%s7196_s1 + $0x298] sm:$0xff]  }
  0x22   :  { %4994 = vmatprep.subr.bf16.mxu1 %v5523_v46  ;;  %3562 = vmatmul.mubr.bf16.vlgmr.msra.gmra.mxu0 %v843_v43  ;;  %v5575_v43 = vld [vmem:[%s7196_s1 + $0x2d0] sm:$0xff]   ;;  %v5578_v46 = vld [vmem:[%s7196_s1 + $0x208] sm:$0xff]  }
  0x23   :  { %4973 = vmatpush3.bf16.msra.mxu0 %v5522_v44  ;;  %3641 = vmatprep.mubr.bf16.mxu0 %v864_v54  ;;  %v5576_v44 = vld [vmem:[%s7196_s1 + $0x290] sm:$0xff]   ;;  %v5584_v54 = vld [vmem:[%s7196_s1 + $0x280] sm:$0xff]  }
  0x24   :  { %3602 = vmatmul.mubr.bf16.vlgmr.msra.gmra.mxu1 %v865_v50  ;;  %4974 = vmatprep.subr.bf16.mxu0 %v5525_v51  ;;  %v5582_v50 = vld [vmem:[%s7196_s1 + $0x200] sm:$0xff]  }
  0x25   :  { %4995 = vmatpush3.bf16.msra.mxu1 %v5524_v48  ;;  %3681 = vmatprep.mubr.bf16.mxu1 %v868_v57  ;;  %v5580_v48 = vld [vmem:[%s7196_s1 + $0x288] sm:$0xff]   ;;  %v5583_v51 = vld [vmem:[%s7196_s1 + $0x2c0] sm:$0xff]  }
  0x26   :  { %4996 = vmatprep.subr.bf16.mxu1 %v5527_v55  ;;  %v869_v55 = vcombine.high %v16_v52, %v16_v52 }
  0x27   :  { %4975 = vmatpush3.bf16.msra.mxu0 %v5526_v53  ;;  %v876_v53 = vrot.slane %v16_v52, %v5996_v34  ;;  %v5634_v52 = vld [vmem:[%s7196_s1 + $0x458] sm:$0xff]  }
  0x28   :  { %4976 = vmatprep.subr.bf16.mxu0 %v5529_v58 }
  0x29   :  { %4997 = vmatpush3.bf16.msra.mxu1 %v5528_v56  ;;  %v5585_v56 = vld [vmem:[%s7196_s1 + $0x378] sm:$0xff]   ;;  %v884_v57 = vcombine.high %v876_v53, %v876_v53  ;;  %v892_v58 = vrot.slane %v876_v53, %v5996_v34 }
  0x2a   :  { %4998 = vmatprep.subr.bf16.mxu1 %v5531_v60  ;;  %v6225_v60 = vrot.slane %v869_v55, %v5996_v34  ;;  %v5635_v53 = vld [vmem:[%s7196_s1 + $0x418] sm:$0xff]  }
  0x2b   :  { %4977 = vmatpush3.bf16.msra.mxu0 %v5530_v59  ;;  %v5586_v59 = vld [vmem:[%s7196_s1 + $0x338] sm:$0xff]  }
  0x2c   :  { %4978 = vmatprep.subr.bf16.mxu0 %v5533_v62  ;;  %v906_v62 = vrot.slane %v884_v57, %v5996_v34  ;;  %v5637_v55 = vld [vmem:[%s7196_s1 + $0x498] sm:$0xff]   ;;  %v5639_v57 = vld [vmem:[%s7196_s1 + $0x410] sm:$0xff]  }
  0x2d   :  { %4999 = vmatpush3.bf16.msra.mxu1 %v5532_v61  ;;  %v5587_v61 = vld [vmem:[%s7196_s1 + $0x3f8] sm:$0xff]  }
  0x2e   :  { %5000 = vmatprep.subr.bf16.mxu1 %v5535_v0  ;;  %v885_v0 = vcombine.high %v6225_v60, %v6225_v60 }
  0x2f   :  { %4979 = vmatpush3.bf16.msra.mxu0 %v5534_v63  ;;  %v5588_v63 = vld [vmem:[%s7196_s1 + $0x3b8] sm:$0xff]  }
  0x30   :  { %4980 = vmatprep.subr.bf16.mxu0 %v5537_v2  ;;  %v5589_v2 = vld [vmem:[%s7196_s1 + $0x370] sm:$0xff]  }
  0x31   :  { %5001 = vmatpush3.bf16.msra.mxu1 %v5536_v1  ;;  %v914_v1 = vcombine.high %v892_v58, %v892_v58 }
  0x32   :  { %5002 = vmatprep.subr.bf16.mxu1 %v5539_v4  ;;  %v5590_v4 = vld [vmem:[%s7196_s1 + $0x330] sm:$0xff]  }
  0x33   :  { %4981 = vmatpush3.bf16.msra.mxu0 %v5538_v3  ;;  %v916_v3 = vcombine.high %v906_v62, %v906_v62 }
  0x34   :  { %4982 = vmatprep.subr.bf16.mxu0 %v5541_v6  ;;  %v5591_v6 = vld [vmem:[%s7196_s1 + $0x3f0] sm:$0xff]  }
  0x35   :  { %5003 = vmatpush3.bf16.msra.mxu1 %v5540_v5  ;;  %v913_v5 = vrot.slane %v885_v0, %v5996_v34  ;;  %v5646_v0 = vld [vmem:[%s7196_s1 + $0x440] sm:$0xff]  }
  0x36   :  { %5004 = vmatprep.subr.bf16.mxu1 %v5543_v8 }
  0x37   :  { %4983 = vmatpush3.bf16.msra.mxu0 %v5542_v7  ;;  %v5592_v7 = vld [vmem:[%s7196_s1 + $0x3b0] sm:$0xff]   ;;  %v917_v8 = vcombine.high %v913_v5, %v913_v5 }
  0x38   :  { %4984 = vmatprep.subr.bf16.mxu0 %v5545_v10  ;;  %v5594_v10 = vld [vmem:[%s7196_s1 + $0x328] sm:$0xff]  }
  0x39   :  { %5005 = vmatpush3.bf16.msra.mxu1 %v5544_v9  ;;  %v5593_v9 = vld [vmem:[%s7196_s1 + $0x368] sm:$0xff]  }
  0x3a   :  { %5006 = vmatprep.subr.bf16.mxu1 %v5547_v12  ;;  %v5596_v12 = vld [vmem:[%s7196_s1 + $0x3a8] sm:$0xff]  }
  0x3b   :  { %4985 = vmatpush3.bf16.msra.mxu0 %v5546_v11  ;;  %v5595_v11 = vld [vmem:[%s7196_s1 + $0x3e8] sm:$0xff]  }
  0x3c   :  { %4986 = vmatprep.subr.bf16.mxu0 %v5549_v14  ;;  %v5598_v14 = vld [vmem:[%s7196_s1 + $0x320] sm:$0xff]  }
  0x3d   :  { %5007 = vmatpush3.bf16.msra.mxu1 %v5548_v13  ;;  %v5597_v13 = vld [vmem:[%s7196_s1 + $0x360] sm:$0xff]  }
  0x3e   :  { %5008 = vmatprep.subr.bf16.mxu1 %v5551_v16  ;;  %v5600_v16 = vld [vmem:[%s7196_s1 + $0x3a0] sm:$0xff]  }
  0x3f   :  { %4987 = vmatpush3.bf16.msra.mxu0 %v5550_v15  ;;  %v5599_v15 = vld [vmem:[%s7196_s1 + $0x3e0] sm:$0xff]  }
  0x40   :  { %5016 = vmatprep.subr.bf16.mxu0 %v5553_v19  ;;  %v5603_v19 = vld [vmem:[%s7196_s1 + $0x3d8] sm:$0xff]  }
  0x41   :  { %5009 = vmatpush3.bf16.msra.mxu1 %v5552_v17  ;;  %v5601_v17 = vld [vmem:[%s7196_s1 + $0x358] sm:$0xff]  }
  0x42   :  { %3642 = vmatmul.mubr.bf16.vlgmr.msra.gmra.mxu0 %v850_v18  ;;  %5038 = vmatprep.subr.bf16.mxu1 %v5555_v21  ;;  %v5602_v18 = vld [vmem:[%s7196_s1 + $0x318] sm:$0xff]   ;;  %v5605_v21 = vld [vmem:[%s7196_s1 + $0x350] sm:$0xff]  }
  0x43   :  { %5017 = vmatpush3.bf16.msra.mxu0 %v5554_v20  ;;  %3721 = vmatprep.mubr.bf16.mxu0 %v906_v62  ;;  %v5604_v20 = vld [vmem:[%s7196_s1 + $0x398] sm:$0xff]   ;;  %v5644_v62 = vld [vmem:[%s7196_s1 + $0x4c8] sm:$0xff]  }
  0x44   :  { %3682 = vmatmul.mubr.bf16.vlgmr.msra.gmra.mxu1 %v866_v23  ;;  %5018 = vmatprep.subr.bf16.mxu0 %v5557_v24  ;;  %v5607_v23 = vld [vmem:[%s7196_s1 + $0x3d0] sm:$0xff]  }
  0x45   :  { %5039 = vmatpush3.bf16.msra.mxu1 %v5556_v22  ;;  %3761 = vmatprep.mubr.bf16.mxu1 %v916_v3  ;;  %v5606_v22 = vld [vmem:[%s7196_s1 + $0x310] sm:$0xff]  }
  0x46   :  { %5040 = vmatprep.subr.bf16.mxu1 %v5559_v26  ;;  %v5608_v24 = vld [vmem:[%s7196_s1 + $0x390] sm:$0xff]   ;;  %v5610_v26 = vld [vmem:[%s7196_s1 + $0x308] sm:$0xff]  }
  0x47   :  { %5019 = vmatpush3.bf16.msra.mxu0 %v5558_v25  ;;  %v5609_v25 = vld [vmem:[%s7196_s1 + $0x348] sm:$0xff]   ;;  %v17_v3 = vld [vmem:[%s7197_s0 + $0x10] sm:$0xff] }
  0x48   :  { %5020 = vmatprep.subr.bf16.mxu0 %v5561_v28  ;;  %v5612_v28 = vld [vmem:[%s7196_s1 + $0x388] sm:$0xff]  }
  0x49   :  { %5041 = vmatpush3.bf16.msra.mxu1 %v5560_v27  ;;  %v5611_v27 = vld [vmem:[%s7196_s1 + $0x3c8] sm:$0xff]  }
  0x4a   :  { %5042 = vmatprep.subr.bf16.mxu1 %v5563_v30  ;;  %v5614_v30 = vld [vmem:[%s7196_s1 + $0x300] sm:$0xff]  }
  0x4b   :  { %5021 = vmatpush3.bf16.msra.mxu0 %v5562_v29  ;;  %v5613_v29 = vld [vmem:[%s7196_s1 + $0x340] sm:$0xff]  }
  0x4c   :  { %5022 = vmatprep.subr.bf16.mxu0 %v5565_v32  ;;  %v5617_v32 = vld [vmem:[%s7196_s1 + $0x380] sm:$0xff]  }
  0x4d   :  { %5043 = vmatpush3.bf16.msra.mxu1 %v5564_v31  ;;  %v5615_v31 = vld [vmem:[%s7196_s1 + $0x3c0] sm:$0xff]  }
  0x4e   :  { %5044 = vmatprep.subr.bf16.mxu1 %v5567_v35  ;;  %v5618_v35 = vld [vmem:[%s7196_s1 + $0x478] sm:$0xff]  }
  0x4f   :  { %5023 = vmatpush3.bf16.msra.mxu0 %v5566_v33  ;;  %v899_v33 = vrot.slane %v6225_v60, %v5996_v34  ;;  %v5642_v60 = vld [vmem:[%s7196_s1 + $0x448] sm:$0xff]  }
  0x50   :  { %5024 = vmatprep.subr.bf16.mxu0 %v5569_v37  ;;  %v5620_v37 = vld [vmem:[%s7196_s1 + $0x4f8] sm:$0xff]  }
  0x51   :  { %5045 = vmatpush3.bf16.msra.mxu1 %v5568_v36  ;;  %v5619_v36 = vld [vmem:[%s7196_s1 + $0x438] sm:$0xff]  }
  0x52   :  { %5046 = vmatprep.subr.bf16.mxu1 %v5571_v39  ;;  %v915_v39 = vcombine.high %v899_v33, %v899_v33 }
  0x53   :  { %5025 = vmatpush3.bf16.msra.mxu0 %v5570_v38  ;;  %v5621_v38 = vld [vmem:[%s7196_s1 + $0x4b8] sm:$0xff]  }
  0x54   :  { %5026 = vmatprep.subr.bf16.mxu0 %v5573_v41  ;;  %v5623_v41 = vld [vmem:[%s7196_s1 + $0x430] sm:$0xff]  }
  0x55   :  { %5047 = vmatpush3.bf16.msra.mxu1 %v5572_v40  ;;  %v5622_v40 = vld [vmem:[%s7196_s1 + $0x470] sm:$0xff]  }
  0x56   :  { %5048 = vmatprep.subr.bf16.mxu1 %v5575_v43  ;;  %v5625_v43 = vld [vmem:[%s7196_s1 + $0x4b0] sm:$0xff]  }
  0x57   :  { %5027 = vmatpush3.bf16.msra.mxu0 %v5574_v42  ;;  %v5624_v42 = vld [vmem:[%s7196_s1 + $0x4f0] sm:$0xff]  }
  0x58   :  { %5028 = vmatprep.subr.bf16.mxu0 %v5577_v45  ;;  %v5627_v45 = vld [vmem:[%s7196_s1 + $0x428] sm:$0xff]  }
  0x59   :  { %5049 = vmatpush3.bf16.msra.mxu1 %v5576_v44  ;;  %v5626_v44 = vld [vmem:[%s7196_s1 + $0x468] sm:$0xff]  }
  0x5a   :  { %5050 = vmatprep.subr.bf16.mxu1 %v5579_v47  ;;  %v5629_v47 = vld [vmem:[%s7196_s1 + $0x4a8] sm:$0xff]  }
  0x5b   :  { %5029 = vmatpush3.bf16.msra.mxu0 %v5578_v46  ;;  %v5628_v46 = vld [vmem:[%s7196_s1 + $0x4e8] sm:$0xff]  }
  0x5c   :  { %5030 = vmatprep.subr.bf16.mxu0 %v5581_v49  ;;  %v5631_v49 = vld [vmem:[%s7196_s1 + $0x420] sm:$0xff]  }
  0x5d   :  { %5051 = vmatpush3.bf16.msra.mxu1 %v5580_v48  ;;  %v5630_v48 = vld [vmem:[%s7196_s1 + $0x460] sm:$0xff]  }
  0x5e   :  { %5052 = vmatprep.subr.bf16.mxu1 %v5583_v51  ;;  %v5633_v51 = vld [vmem:[%s7196_s1 + $0x4a0] sm:$0xff]  }
  0x5f   :  { %5031 = vmatpush3.bf16.msra.mxu0 %v5582_v50  ;;  %v5632_v50 = vld [vmem:[%s7196_s1 + $0x4e0] sm:$0xff]  }
  0x60   :  { %5060 = vmatprep.subr.bf16.mxu0 %v5585_v56  ;;  %v5638_v56 = vld [vmem:[%s7196_s1 + $0x450] sm:$0xff]  }
  0x61   :  { %5053 = vmatpush3.bf16.msra.mxu1 %v5584_v54  ;;  %v5636_v54 = vld [vmem:[%s7196_s1 + $0x4d8] sm:$0xff]  }
  0x62   :  { %3722 = vmatmul.mubr.bf16.vlgmr.msra.gmra.mxu0 %v892_v58  ;;  %5082 = vmatprep.subr.bf16.mxu1 %v5587_v61  ;;  %v5640_v58 = vld [vmem:[%s7196_s1 + $0x4d0] sm:$0xff]   ;;  %v5643_v61 = vld [vmem:[%s7196_s1 + $0x408] sm:$0xff]  }
  0x63   :  { %5061 = vmatpush3.bf16.msra.mxu0 %v5586_v59  ;;  %3801 = vmatprep.mubr.bf16.mxu0 %v913_v5  ;;  %v5641_v59 = vld [vmem:[%s7196_s1 + $0x490] sm:$0xff]   ;;  %v5649_v5 = vld [vmem:[%s7196_s1 + $0x480] sm:$0xff]  }
  0x64   :  { %3762 = vmatmul.mubr.bf16.vlgmr.msra.gmra.mxu1 %v914_v1  ;;  %5062 = vmatprep.subr.bf16.mxu0 %v5589_v2  ;;  %v5647_v1 = vld [vmem:[%s7196_s1 + $0x400] sm:$0xff]  }
  0x65   :  { %5083 = vmatpush3.bf16.msra.mxu1 %v5588_v63  ;;  %3841 = vmatprep.mubr.bf16.mxu1 %v917_v8  ;;  %v5645_v63 = vld [vmem:[%s7196_s1 + $0x488] sm:$0xff]   ;;  %v5648_v2 = vld [vmem:[%s7196_s1 + $0x4c0] sm:$0xff]  }
  0x66   :  { %5084 = vmatprep.subr.bf16.mxu1 %v5591_v6  ;;  %v918_v6 = vcombine.high %v17_v3, %v17_v3 }
  0x67   :  { %5063 = vmatpush3.bf16.msra.mxu0 %v5590_v4  ;;  %v925_v4 = vrot.slane %v17_v3, %v5996_v34  ;;  %v5699_v3 = vld [vmem:[%s7196_s1 + $0x658] sm:$0xff]  }
  0x68   :  { %5064 = vmatprep.subr.bf16.mxu0 %v5593_v9 }
  0x69   :  { %5085 = vmatpush3.bf16.msra.mxu1 %v5592_v7  ;;  %v5650_v7 = vld [vmem:[%s7196_s1 + $0x578] sm:$0xff]   ;;  %v933_v8 = vcombine.high %v925_v4, %v925_v4  ;;  %v941_v9 = vrot.slane %v925_v4, %v5996_v34 }
  0x6a   :  { %5086 = vmatprep.subr.bf16.mxu1 %v5595_v11  ;;  %v6431_v11 = vrot.slane %v918_v6, %v5996_v34  ;;  %v5700_v4 = vld [vmem:[%s7196_s1 + $0x618] sm:$0xff]  }
  0x6b   :  { %5065 = vmatpush3.bf16.msra.mxu0 %v5594_v10  ;;  %v5651_v10 = vld [vmem:[%s7196_s1 + $0x538] sm:$0xff]  }
  0x6c   :  { %5066 = vmatprep.subr.bf16.mxu0 %v5597_v13  ;;  %v955_v13 = vrot.slane %v933_v8, %v5996_v34  ;;  %v5702_v6 = vld [vmem:[%s7196_s1 + $0x698] sm:$0xff]   ;;  %v5704_v8 = vld [vmem:[%s7196_s1 + $0x610] sm:$0xff]  }
  0x6d   :  { %5087 = vmatpush3.bf16.msra.mxu1 %v5596_v12  ;;  %v5652_v12 = vld [vmem:[%s7196_s1 + $0x5f8] sm:$0xff]  }
  0x6e   :  { %5088 = vmatprep.subr.bf16.mxu1 %v5599_v15  ;;  %v934_v15 = vcombine.high %v6431_v11, %v6431_v11 }
  0x6f   :  { %5067 = vmatpush3.bf16.msra.mxu0 %v5598_v14  ;;  %v5653_v14 = vld [vmem:[%s7196_s1 + $0x5b8] sm:$0xff]  }
  0x70   :  { %5068 = vmatprep.subr.bf16.mxu0 %v5601_v17  ;;  %v5654_v17 = vld [vmem:[%s7196_s1 + $0x570] sm:$0xff]  }
  0x71   :  { %5089 = vmatpush3.bf16.msra.mxu1 %v5600_v16  ;;  %v963_v16 = vcombine.high %v941_v9, %v941_v9 }
  0x72   :  { %5090 = vmatprep.subr.bf16.mxu1 %v5603_v19  ;;  %v5655_v19 = vld [vmem:[%s7196_s1 + $0x530] sm:$0xff]  }
  0x73   :  { %5069 = vmatpush3.bf16.msra.mxu0 %v5602_v18  ;;  %v965_v18 = vcombine.high %v955_v13, %v955_v13 }
  0x74   :  { %5070 = vmatprep.subr.bf16.mxu0 %v5605_v21  ;;  %v5656_v21 = vld [vmem:[%s7196_s1 + $0x5f0] sm:$0xff]  }
  0x75   :  { %5091 = vmatpush3.bf16.msra.mxu1 %v5604_v20  ;;  %v962_v20 = vrot.slane %v934_v15, %v5996_v34  ;;  %v5711_v15 = vld [vmem:[%s7196_s1 + $0x640] sm:$0xff]  }
  0x76   :  { %5092 = vmatprep.subr.bf16.mxu1 %v5607_v23 }
  0x77   :  { %5071 = vmatpush3.bf16.msra.mxu0 %v5606_v22  ;;  %v5657_v22 = vld [vmem:[%s7196_s1 + $0x5b0] sm:$0xff]   ;;  %v966_v23 = vcombine.high %v962_v20, %v962_v20 }
  0x78   :  { %5072 = vmatprep.subr.bf16.mxu0 %v5609_v25  ;;  %v5659_v25 = vld [vmem:[%s7196_s1 + $0x528] sm:$0xff]  }
  0x79   :  { %5093 = vmatpush3.bf16.msra.mxu1 %v5608_v24  ;;  %v5658_v24 = vld [vmem:[%s7196_s1 + $0x568] sm:$0xff]  }
  0x7a   :  { %5094 = vmatprep.subr.bf16.mxu1 %v5611_v27  ;;  %v5661_v27 = vld [vmem:[%s7196_s1 + $0x5a8] sm:$0xff]  }
  0x7b   :  { %5073 = vmatpush3.bf16.msra.mxu0 %v5610_v26  ;;  %v5660_v26 = vld [vmem:[%s7196_s1 + $0x5e8] sm:$0xff]  }
  0x7c   :  { %5074 = vmatprep.subr.bf16.mxu0 %v5613_v29  ;;  %v5663_v29 = vld [vmem:[%s7196_s1 + $0x520] sm:$0xff]  }
  0x7d   :  { %5095 = vmatpush3.bf16.msra.mxu1 %v5612_v28  ;;  %v5662_v28 = vld [vmem:[%s7196_s1 + $0x560] sm:$0xff]  }
  0x7e   :  { %5096 = vmatprep.subr.bf16.mxu1 %v5615_v31  ;;  %v5665_v31 = vld [vmem:[%s7196_s1 + $0x5a0] sm:$0xff]  }
  0x7f   :  { %5075 = vmatpush3.bf16.msra.mxu0 %v5614_v30  ;;  %v5664_v30 = vld [vmem:[%s7196_s1 + $0x5e0] sm:$0xff]  }
  0x80   :  { %5104 = vmatprep.subr.bf16.mxu0 %v5618_v35  ;;  %v5668_v35 = vld [vmem:[%s7196_s1 + $0x5d8] sm:$0xff]  }
  0x81   :  { %5097 = vmatpush3.bf16.msra.mxu1 %v5617_v32  ;;  %v5666_v32 = vld [vmem:[%s7196_s1 + $0x558] sm:$0xff]  }
  0x82   :  { %3802 = vmatmul.mubr.bf16.vlgmr.msra.gmra.mxu0 %v899_v33  ;;  %5126 = vmatprep.subr.bf16.mxu1 %v5620_v37  ;;  %v5667_v33 = vld [vmem:[%s7196_s1 + $0x518] sm:$0xff]   ;;  %v5670_v37 = vld [vmem:[%s7196_s1 + $0x550] sm:$0xff]  }
  0x83   :  { %5105 = vmatpush3.bf16.msra.mxu0 %v5619_v36  ;;  %3881 = vmatprep.mubr.bf16.mxu0 %v955_v13  ;;  %v5669_v36 = vld [vmem:[%s7196_s1 + $0x598] sm:$0xff]   ;;  %v5709_v13 = vld [vmem:[%s7196_s1 + $0x6c8] sm:$0xff]  }
  0x84   :  { %3842 = vmatmul.mubr.bf16.vlgmr.msra.gmra.mxu1 %v915_v39  ;;  %5106 = vmatprep.subr.bf16.mxu0 %v5622_v40  ;;  %v5672_v39 = vld [vmem:[%s7196_s1 + $0x5d0] sm:$0xff]  }
  0x85   :  { %5127 = vmatpush3.bf16.msra.mxu1 %v5621_v38  ;;  %3921 = vmatprep.mubr.bf16.mxu1 %v965_v18  ;;  %v5671_v38 = vld [vmem:[%s7196_s1 + $0x510] sm:$0xff]   ;;  %v18_v18 = vld [vmem:[%s7197_s0 + $0x18] sm:$0xff] }
  0x86   :  { %5128 = vmatprep.subr.bf16.mxu1 %v5624_v42  ;;  %v5673_v40 = vld [vmem:[%s7196_s1 + $0x590] sm:$0xff]   ;;  %v5675_v42 = vld [vmem:[%s7196_s1 + $0x508] sm:$0xff]  }
  0x87   :  { %5107 = vmatpush3.bf16.msra.mxu0 %v5623_v41  ;;  %v5674_v41 = vld [vmem:[%s7196_s1 + $0x548] sm:$0xff]  }
  0x88   :  { %5108 = vmatprep.subr.bf16.mxu0 %v5626_v44  ;;  %v5677_v44 = vld [vmem:[%s7196_s1 + $0x588] sm:$0xff]  }
  0x89   :  { %5129 = vmatpush3.bf16.msra.mxu1 %v5625_v43  ;;  %v5676_v43 = vld [vmem:[%s7196_s1 + $0x5c8] sm:$0xff]  }
  0x8a   :  { %5130 = vmatprep.subr.bf16.mxu1 %v5628_v46  ;;  %v5679_v46 = vld [vmem:[%s7196_s1 + $0x500] sm:$0xff]  }
  0x8b   :  { %5109 = vmatpush3.bf16.msra.mxu0 %v5627_v45  ;;  %v5678_v45 = vld [vmem:[%s7196_s1 + $0x540] sm:$0xff]  }
  0x8c   :  { %5110 = vmatprep.subr.bf16.mxu0 %v5630_v48  ;;  %v5682_v48 = vld [vmem:[%s7196_s1 + $0x580] sm:$0xff]  }
  0x8d   :  { %5131 = vmatpush3.bf16.msra.mxu1 %v5629_v47  ;;  %v5680_v47 = vld [vmem:[%s7196_s1 + $0x5c0] sm:$0xff]  }
  0x8e   :  { %5132 = vmatprep.subr.bf16.mxu1 %v5632_v50  ;;  %v5683_v50 = vld [vmem:[%s7196_s1 + $0x678] sm:$0xff]  }
  0x8f   :  { %5111 = vmatpush3.bf16.msra.mxu0 %v5631_v49  ;;  %v948_v49 = vrot.slane %v6431_v11, %v5996_v34  ;;  %v5707_v11 = vld [vmem:[%s7196_s1 + $0x648] sm:$0xff]  }
  0x90   :  { %5112 = vmatprep.subr.bf16.mxu0 %v5634_v52  ;;  %v5685_v52 = vld [vmem:[%s7196_s1 + $0x6f8] sm:$0xff]  }
  0x91   :  { %5133 = vmatpush3.bf16.msra.mxu1 %v5633_v51  ;;  %v5684_v51 = vld [vmem:[%s7196_s1 + $0x638] sm:$0xff]  }
  0x92   :  { %5134 = vmatprep.subr.bf16.mxu1 %v5636_v54  ;;  %v964_v54 = vcombine.high %v948_v49, %v948_v49 }
  0x93   :  { %5113 = vmatpush3.bf16.msra.mxu0 %v5635_v53  ;;  %v5686_v53 = vld [vmem:[%s7196_s1 + $0x6b8] sm:$0xff]  }
  0x94   :  { %5114 = vmatprep.subr.bf16.mxu0 %v5638_v56  ;;  %v5688_v56 = vld [vmem:[%s7196_s1 + $0x630] sm:$0xff]  }
  0x95   :  { %5135 = vmatpush3.bf16.msra.mxu1 %v5637_v55  ;;  %v5687_v55 = vld [vmem:[%s7196_s1 + $0x670] sm:$0xff]  }
  0x96   :  { %5136 = vmatprep.subr.bf16.mxu1 %v5640_v58  ;;  %v5690_v58 = vld [vmem:[%s7196_s1 + $0x6b0] sm:$0xff]  }
  0x97   :  { %5115 = vmatpush3.bf16.msra.mxu0 %v5639_v57  ;;  %v5689_v57 = vld [vmem:[%s7196_s1 + $0x6f0] sm:$0xff]  }
  0x98   :  { %5116 = vmatprep.subr.bf16.mxu0 %v5642_v60  ;;  %v5692_v60 = vld [vmem:[%s7196_s1 + $0x628] sm:$0xff]  }
  0x99   :  { %5137 = vmatpush3.bf16.msra.mxu1 %v5641_v59  ;;  %v5691_v59 = vld [vmem:[%s7196_s1 + $0x668] sm:$0xff]  }
  0x9a   :  { %5138 = vmatprep.subr.bf16.mxu1 %v5644_v62  ;;  %v5694_v62 = vld [vmem:[%s7196_s1 + $0x6a8] sm:$0xff]  }
  0x9b   :  { %5117 = vmatpush3.bf16.msra.mxu0 %v5643_v61  ;;  %v5693_v61 = vld [vmem:[%s7196_s1 + $0x6e8] sm:$0xff]  }
  0x9c   :  { %5118 = vmatprep.subr.bf16.mxu0 %v5646_v0  ;;  %v5696_v0 = vld [vmem:[%s7196_s1 + $0x620] sm:$0xff]  }
  0x9d   :  { %5139 = vmatpush3.bf16.msra.mxu1 %v5645_v63  ;;  %v5695_v63 = vld [vmem:[%s7196_s1 + $0x660] sm:$0xff]  }
  0x9e   :  { %5140 = vmatprep.subr.bf16.mxu1 %v5648_v2  ;;  %v5698_v2 = vld [vmem:[%s7196_s1 + $0x6a0] sm:$0xff]  }
  0x9f   :  { %5119 = vmatpush3.bf16.msra.mxu0 %v5647_v1  ;;  %v5697_v1 = vld [vmem:[%s7196_s1 + $0x6e0] sm:$0xff]  }
  0xa0   :  { %5148 = vmatprep.subr.bf16.mxu0 %v5650_v7  ;;  %v5703_v7 = vld [vmem:[%s7196_s1 + $0x650] sm:$0xff]  }
  0xa1   :  { %5141 = vmatpush3.bf16.msra.mxu1 %v5649_v5  ;;  %v5701_v5 = vld [vmem:[%s7196_s1 + $0x6d8] sm:$0xff]  }
  0xa2   :  { %3882 = vmatmul.mubr.bf16.vlgmr.msra.gmra.mxu0 %v941_v9  ;;  %5170 = vmatprep.subr.bf16.mxu1 %v5652_v12  ;;  %v5705_v9 = vld [vmem:[%s7196_s1 + $0x6d0] sm:$0xff]   ;;  %v5708_v12 = vld [vmem:[%s7196_s1 + $0x608] sm:$0xff]  }
  0xa3   :  { %5149 = vmatpush3.bf16.msra.mxu0 %v5651_v10  ;;  %3961 = vmatprep.mubr.bf16.mxu0 %v962_v20  ;;  %v5706_v10 = vld [vmem:[%s7196_s1 + $0x690] sm:$0xff]   ;;  %v5714_v20 = vld [vmem:[%s7196_s1 + $0x680] sm:$0xff]  }
  0xa4   :  { %3922 = vmatmul.mubr.bf16.vlgmr.msra.gmra.mxu1 %v963_v16  ;;  %5150 = vmatprep.subr.bf16.mxu0 %v5654_v17  ;;  %v5712_v16 = vld [vmem:[%s7196_s1 + $0x600] sm:$0xff]  }
  0xa5   :  { %5171 = vmatpush3.bf16.msra.mxu1 %v5653_v14  ;;  %4001 = vmatprep.mubr.bf16.mxu1 %v966_v23  ;;  %v5710_v14 = vld [vmem:[%s7196_s1 + $0x688] sm:$0xff]   ;;  %v5713_v17 = vld [vmem:[%s7196_s1 + $0x6c0] sm:$0xff]  }
  0xa6   :  { %5172 = vmatprep.subr.bf16.mxu1 %v5656_v21  ;;  %v967_v21 = vcombine.high %v18_v18, %v18_v18 }
  0xa7   :  { %5151 = vmatpush3.bf16.msra.mxu0 %v5655_v19  ;;  %v974_v19 = vrot.slane %v18_v18, %v5996_v34 }
  0xa8   :  { %5152 = vmatprep.subr.bf16.mxu0 %v5658_v24 }
  0xa9   :  { %5173 = vmatpush3.bf16.msra.mxu1 %v5657_v22  ;;  %v5715_v22 = vld [vmem:[%s7196_s1 + $0x778] sm:$0xff]   ;;  %v982_v23 = vcombine.high %v974_v19, %v974_v19  ;;  %v990_v24 = vrot.slane %v974_v19, %v5996_v34  ;;  %v5752_v19 = vld [vmem:[%s7196_s1 + $0x870] sm:$0xff]  }
  0xaa   :  { %5174 = vmatprep.subr.bf16.mxu1 %v5660_v26  ;;  %v6637_v26 = vrot.slane %v967_v21, %v5996_v34  ;;  %v5753_v21 = vld [vmem:[%s7196_s1 + $0x830] sm:$0xff]  }
  0xab   :  { %5153 = vmatpush3.bf16.msra.mxu0 %v5659_v25  ;;  %v5716_v25 = vld [vmem:[%s7196_s1 + $0x738] sm:$0xff]  }
  0xac   :  { %5154 = vmatprep.subr.bf16.mxu0 %v5662_v28  ;;  %v1004_v28 = vrot.slane %v982_v23, %v5996_v34 }
  0xad   :  { %5175 = vmatpush3.bf16.msra.mxu1 %v5661_v27  ;;  %v5717_v27 = vld [vmem:[%s7196_s1 + $0x7f8] sm:$0xff]  }
  0xae   :  { %5176 = vmatprep.subr.bf16.mxu1 %v5664_v30  ;;  %v983_v30 = vcombine.high %v6637_v26, %v6637_v26 }
  0xaf   :  { %5155 = vmatpush3.bf16.msra.mxu0 %v5663_v29  ;;  %v5718_v29 = vld [vmem:[%s7196_s1 + $0x7b8] sm:$0xff]  }
  0xb0   :  { %5156 = vmatprep.subr.bf16.mxu0 %v5666_v32  ;;  %v5719_v32 = vld [vmem:[%s7196_s1 + $0x770] sm:$0xff]  }
  0xb1   :  { %5177 = vmatpush3.bf16.msra.mxu1 %v5665_v31  ;;  %v1012_v31 = vcombine.high %v990_v24, %v990_v24 }
  0xb2   :  { %5178 = vmatprep.subr.bf16.mxu1 %v5668_v35  ;;  %v1014_v35 = vcombine.high %v1004_v28, %v1004_v28 }
  0xb3   :  { %5157 = vmatpush3.bf16.msra.mxu0 %v5667_v33 }
  0xb4   :  { %5158 = vmatprep.subr.bf16.mxu0 %v5670_v37  ;;  %v5720_v37 = vld [vmem:[%s7196_s1 + $0x730] sm:$0xff]  }
  0xb5   :  { %5179 = vmatpush3.bf16.msra.mxu1 %v5669_v36  ;;  %v4534_v36 = vld [vmem:[%s7198_s2] ss:$0 sm:$0xff] }
  0xb6   :  { %5180 = vmatprep.subr.bf16.mxu1 %v5672_v39  ;;  %v5721_v39 = vld [vmem:[%s7196_s1 + $0x7f0] sm:$0xff]  }
  0xb7   :  { %5159 = vmatpush3.bf16.msra.mxu0 %v5671_v38  ;;  %v1011_v38 = vrot.slane %v983_v30, %v5996_v34  ;;  %v5757_v30 = vld [vmem:[%s7196_s1 + $0x828] sm:$0xff]  }
  0xb8   :  { %5160 = vmatprep.subr.bf16.mxu0 %v5674_v41 }
  0xb9   :  { %5181 = vmatpush3.bf16.msra.mxu1 %v5673_v40 }
  0xba   :  { %5182 = vmatprep.subr.bf16.mxu1 %v5676_v43  ;;  %v1015_v43 = vcombine.high %v1011_v38, %v1011_v38 }
  0xbb   :  { %5161 = vmatpush3.bf16.msra.mxu0 %v5675_v42  ;;  %v5722_v42 = vld [vmem:[%s7196_s1 + $0x7b0] sm:$0xff]  }
  0xbc   :  { %5162 = vmatprep.subr.bf16.mxu0 %v5678_v45  ;;  %v5723_v45 = vld [vmem:[%s7196_s1 + $0x768] sm:$0xff]  }
  0xbd   :  { %5183 = vmatpush3.bf16.msra.mxu1 %v5677_v44 }
  0xbe   :  { %5184 = vmatprep.subr.bf16.mxu1 %v5680_v47 }
  0xbf   :  { %5163 = vmatpush3.bf16.msra.mxu0 %v5679_v46 }
  0xc0   :  { %5192 = vmatprep.subr.bf16.mxu0 %v5683_v50 }
  0xc1   :  { %5185 = vmatpush3.bf16.msra.mxu1 %v5682_v48  ;;  %v5724_v48 = vld [vmem:[%s7196_s1 + $0x728] sm:$0xff]  }
  0xc2   :  { %3962 = vmatmul.mubr.bf16.vlgmr.msra.gmra.mxu0 %v948_v49  ;;  %5214 = vmatprep.subr.bf16.mxu1 %v5685_v52 }
  0xc3   :  { %5193 = vmatpush3.bf16.msra.mxu0 %v5684_v51  ;;  %4041 = vmatprep.mubr.bf16.mxu0 %v1004_v28  ;;  %v5725_v51 = vld [vmem:[%s7196_s1 + $0x7e8] sm:$0xff]  }
  0xc4   :  { %4002 = vmatmul.mubr.bf16.vlgmr.msra.gmra.mxu1 %v964_v54  ;;  %5194 = vmatprep.subr.bf16.mxu0 %v5687_v55 }
  0xc5   :  { %5215 = vmatpush3.bf16.msra.mxu1 %v5686_v53  ;;  %4081 = vmatprep.mubr.bf16.mxu1 %v1014_v35  ;;  %v5726_v53 = vld [vmem:[%s7196_s1 + $0x7a8] sm:$0xff]  }
  0xc6   :  { %5216 = vmatprep.subr.bf16.mxu1 %v5689_v57  ;;  %v5728_v57 = vld [vmem:[%s7196_s1 + $0x720] sm:$0xff]  }
  0xc7   :  { %5195 = vmatpush3.bf16.msra.mxu0 %v5688_v56  ;;  %v5727_v56 = vld [vmem:[%s7196_s1 + $0x760] sm:$0xff]  }
  0xc8   :  { %5196 = vmatprep.subr.bf16.mxu0 %v5691_v59  ;;  %v5729_v59 = vld [vmem:[%s7196_s1 + $0x7e0] sm:$0xff]  }
  0xc9   :  { %5217 = vmatpush3.bf16.msra.mxu1 %v5690_v58 }
  0xca   :  { %5218 = vmatprep.subr.bf16.mxu1 %v5693_v61  ;;  %v5731_v61 = vld [vmem:[%s7196_s1 + $0x758] sm:$0xff]  }
  0xcb   :  { %5197 = vmatpush3.bf16.msra.mxu0 %v5692_v60  ;;  %v5730_v60 = vld [vmem:[%s7196_s1 + $0x7a0] sm:$0xff]  }
  0xcc   :  { %5198 = vmatprep.subr.bf16.mxu0 %v5695_v63  ;;  %v5733_v63 = vld [vmem:[%s7196_s1 + $0x7d8] sm:$0xff]  }
  0xcd   :  { %5219 = vmatpush3.bf16.msra.mxu1 %v5694_v62  ;;  %v5732_v62 = vld [vmem:[%s7196_s1 + $0x718] sm:$0xff]  }
  0xce   :  { %5220 = vmatprep.subr.bf16.mxu1 %v5697_v1  ;;  %v5735_v1 = vld [vmem:[%s7196_s1 + $0x750] sm:$0xff]  }
  0xcf   :  { %5199 = vmatpush3.bf16.msra.mxu0 %v5696_v0  ;;  %v5734_v0 = vld [vmem:[%s7196_s1 + $0x798] sm:$0xff]  }
  0xd0   :  { %5200 = vmatprep.subr.bf16.mxu0 %v5699_v3  ;;  %v5737_v3 = vld [vmem:[%s7196_s1 + $0x7d0] sm:$0xff]  }
  0xd1   :  { %5221 = vmatpush3.bf16.msra.mxu1 %v5698_v2  ;;  %v5736_v2 = vld [vmem:[%s7196_s1 + $0x710] sm:$0xff]  }
  0xd2   :  { %5222 = vmatprep.subr.bf16.mxu1 %v5701_v5  ;;  %v5739_v5 = vld [vmem:[%s7196_s1 + $0x748] sm:$0xff]  }
  0xd3   :  { %5201 = vmatpush3.bf16.msra.mxu0 %v5700_v4  ;;  %v5738_v4 = vld [vmem:[%s7196_s1 + $0x790] sm:$0xff]  }
  0xd4   :  { %5202 = vmatprep.subr.bf16.mxu0 %v5703_v7  ;;  %v5741_v7 = vld [vmem:[%s7196_s1 + $0x7c8] sm:$0xff]  }
  0xd5   :  { %5223 = vmatpush3.bf16.msra.mxu1 %v5702_v6  ;;  %v5740_v6 = vld [vmem:[%s7196_s1 + $0x708] sm:$0xff]  }
  0xd6   :  { %5224 = vmatprep.subr.bf16.mxu1 %v5705_v9  ;;  %v5743_v9 = vld [vmem:[%s7196_s1 + $0x740] sm:$0xff]  }
  0xd7   :  { %5203 = vmatpush3.bf16.msra.mxu0 %v5704_v8  ;;  %v5742_v8 = vld [vmem:[%s7196_s1 + $0x788] sm:$0xff]  }
  0xd8   :  { %5204 = vmatprep.subr.bf16.mxu0 %v5707_v11  ;;  %v5745_v11 = vld [vmem:[%s7196_s1 + $0x7c0] sm:$0xff]  }
  0xd9   :  { %5225 = vmatpush3.bf16.msra.mxu1 %v5706_v10  ;;  %v5744_v10 = vld [vmem:[%s7196_s1 + $0x700] sm:$0xff]  }
  0xda   :  { %5226 = vmatprep.subr.bf16.mxu1 %v5709_v13  ;;  %v997_v13 = vrot.slane %v6637_v26, %v5996_v34 }
  0xdb   :  { %5205 = vmatpush3.bf16.msra.mxu0 %v5708_v12  ;;  %v5747_v12 = vld [vmem:[%s7196_s1 + $0x780] sm:$0xff]  }
  0xdc   :  { %5206 = vmatprep.subr.bf16.mxu0 %v5711_v15  ;;  %v5749_v15 = vld [vmem:[%s7196_s1 + $0x838] sm:$0xff]   ;;  %v1013_v18 = vcombine.high %v997_v13, %v997_v13 }
  0xdd   :  { %5227 = vmatpush3.bf16.msra.mxu1 %v5710_v14  ;;  %v5748_v14 = vld [vmem:[%s7196_s1 + $0x878] sm:$0xff]  }
  0xde   :  { %5228 = vmatprep.subr.bf16.mxu1 %v5713_v17  ;;  %v5751_v17 = vld [vmem:[%s7196_s1 + $0x8b8] sm:$0xff]  }
  0xdf   :  { %5207 = vmatpush3.bf16.msra.mxu0 %v5712_v16  ;;  %v5750_v16 = vld [vmem:[%s7196_s1 + $0x8f8] sm:$0xff]  }
  0xe0   :  { %5236 = vmatprep.subr.bf16.mxu0 %v5715_v22  ;;  %v5754_v22 = vld [vmem:[%s7196_s1 + $0x8f0] sm:$0xff]  }
  0xe1   :  { %5229 = vmatpush3.bf16.msra.mxu1 %v5714_v20 }
  0xe2   :  { %v4944_v33 = vpop.f32.mrf.mxu0  ;;  %5258 = vmatprep.subr.bf16.mxu1 %v5717_v27  ;;  %4042 = vmatmul.mubr.bf16.vlgmr.msra.gmra.mxu0 %v990_v24  ;;  %v5756_v27 = vld [vmem:[%s7196_s1 + $0x868] sm:$0xff]  }
  0xe3   :  { %5237 = vmatpush3.bf16.msra.mxu0 %v5716_v25  ;;  %4121 = vmatprep.mubr.bf16.mxu0 %v1011_v38  ;;  %v5755_v25 = vld [vmem:[%s7196_s1 + $0x8b0] sm:$0xff]  }
  0xe4   :  { %v4945_v40 = vpop.f32.mrf.mxu0  ;;  %v4966_v41 = vpop.f32.mrf.mxu1  ;;  %4082 = vmatmul.mubr.bf16.vlgmr.msra.gmra.mxu1 %v1012_v31  ;;  %5238 = vmatprep.subr.bf16.mxu0 %v5719_v32 }
  0xe5   :  { %v4946_v44 = vadd.f32 %v4945_v40, %v4944_v33  ;;  %5259 = vmatpush3.bf16.msra.mxu1 %v5718_v29  ;;  %4161 = vmatprep.mubr.bf16.mxu1 %v1015_v43  ;;  %v5758_v33 = vld [vmem:[%s7196_s1 + $0x8e8] sm:$0xff]   ;;  %v5761_v40 = vld [vmem:[%s7196_s1 + $0x820] sm:$0xff]  }
  0xe6   :  { %v4947_v46 = vpop.f32.mrf.mxu0  ;;  %v4967_v47 = vpop.f32.mrf.mxu1  ;;  %5260 = vmatprep.subr.bf16.mxu1 %v5721_v39  ;;  %v5760_v39 = vld [vmem:[%s7196_s1 + $0x860] sm:$0xff]  }
  0xe7   :  { %v3564_v49 = vadd.f32 %v4946_v44, %v4534_v36  ;;  %v4968_v50 = vadd.f32 %v4967_v47, %v4966_v41  ;;  %5239 = vmatpush3.bf16.msra.mxu0 %v5720_v37  ;;  %v5759_v36 = vld [vmem:[%s7196_s1 + $0x8a8] sm:$0xff]   ;;  %v5763_v43 = vld [vmem:[%s7196_s1 + $0x8a0] sm:$0xff]   ;;  %v5764_v44 = vld [vmem:[%s7196_s1 + $0x858] sm:$0xff]  }
  0xe8   :  { %v4948_v52 = vpop.f32.mrf.mxu0  ;;  %v4969_v54 = vpop.f32.mrf.mxu1  ;;  %5240 = vmatprep.subr.bf16.mxu0 %v5723_v45  ;;  %v5765_v45 = vld [vmem:[%s7196_s1 + $0x818] sm:$0xff]  }
  0xe9   :  { %v6676_v55 = vadd.f32 %v4968_v50, %v3564_v49  ;;  %5261 = vmatpush3.bf16.msra.mxu1 %v5722_v42  ;;  %v5762_v42 = vld [vmem:[%s7196_s1 + $0x8e0] sm:$0xff]   ;;  %v5766_v46 = vld [vmem:[%s7196_s1 + $0x8d8] sm:$0xff]   ;;  %v5769_v49 = vld [vmem:[%s7196_s1 + $0x810] sm:$0xff]  }
  0xea   :  { %v4970_v58 = vpop.f32.mrf.mxu1  ;;  %5262 = vmatprep.subr.bf16.mxu1 %v5725_v51  ;;  %v5767_v47 = vld [vmem:[%s7196_s1 + $0x898] sm:$0xff]   ;;  %v5770_v50 = vld [vmem:[%s7196_s1 + $0x8d0] sm:$0xff]   ;;  %v5772_v52 = vld [vmem:[%s7196_s1 + $0x848] sm:$0xff]  }
  0xeb   :  { %5241 = vmatpush3.bf16.msra.mxu0 %v5724_v48  ;;  %v5768_v48 = vld [vmem:[%s7196_s1 + $0x850] sm:$0xff]   ;;  %v5774_v54 = vld [vmem:[%s7196_s1 + $0x8c8] sm:$0xff]   ;;  %v5778_v58 = vld [vmem:[%s7196_s1 + $0x8c0] sm:$0xff]  }
  0xec   :  { %5242 = vmatprep.subr.bf16.mxu0 %v5727_v56  ;;  %v5771_v51 = vld [vmem:[%s7196_s1 + $0x890] sm:$0xff]   ;;  %v5776_v56 = vld [vmem:[%s7196_s1 + $0x840] sm:$0xff]  }
  0xed   :  { %5263 = vmatpush3.bf16.msra.mxu1 %v5726_v53  ;;  %v5773_v53 = vld [vmem:[%s7196_s1 + $0x808] sm:$0xff]  }
  0xee   :  { %5264 = vmatprep.subr.bf16.mxu1 %v5729_v59  ;;  %v19_v59 = vld [vmem:[%s7197_s0 + $0x20] sm:$0xff] }
  0xef   :  { %5243 = vmatpush3.bf16.msra.mxu0 %v5728_v57  ;;  %v5777_v57 = vld [vmem:[%s7196_s1 + $0x800] sm:$0xff]  }
  0xf0   :  { %5244 = vmatprep.subr.bf16.mxu0 %v5731_v61  ;;  %v5779_v61 = vld [vmem:[%s7196_s1 + $0x880] sm:$0xff]  }
  0xf1   :  { %5265 = vmatpush3.bf16.msra.mxu1 %v5730_v60  ;;  %v1023_v60 = vrot.slane %v19_v59, %v5996_v34 }
  0xf2   :  { %5266 = vmatprep.subr.bf16.mxu1 %v5733_v63  ;;  %v5780_v63 = vld [vmem:[%s7196_s1 + $0x978] sm:$0xff]  }
  0xf3   :  { %5245 = vmatpush3.bf16.msra.mxu0 %v5732_v62  ;;  %v1016_v62 = vcombine.high %v19_v59, %v19_v59  ;;  %v5817_v59 = vld [vmem:[%s7196_s1 + $0xa70] sm:$0xff]  }
  0xf4   :  { %5246 = vmatprep.subr.bf16.mxu0 %v5735_v1  ;;  %v1039_v1 = vrot.slane %v1023_v60, %v5996_v34 }
  0xf5   :  { %5267 = vmatpush3.bf16.msra.mxu1 %v5734_v0  ;;  %v1031_v0 = vcombine.high %v1023_v60, %v1023_v60 }
  0xf6   :  { %5268 = vmatprep.subr.bf16.mxu1 %v5737_v3  ;;  %v6851_v3 = vrot.slane %v1016_v62, %v5996_v34  ;;  %v5819_v62 = vld [vmem:[%s7196_s1 + $0xaf0] sm:$0xff]  }
  0xf7   :  { %5247 = vmatpush3.bf16.msra.mxu0 %v5736_v2  ;;  %v5781_v2 = vld [vmem:[%s7196_s1 + $0x938] sm:$0xff]  }
  0xf8   :  { %5248 = vmatprep.subr.bf16.mxu0 %v5739_v5  ;;  %v1053_v5 = vrot.slane %v1031_v0, %v5996_v34 }
  0xf9   :  { %5269 = vmatpush3.bf16.msra.mxu1 %v5738_v4  ;;  %v5782_v4 = vld [vmem:[%s7196_s1 + $0x9f8] sm:$0xff]  }
  0xfa   :  { %5270 = vmatprep.subr.bf16.mxu1 %v5741_v7  ;;  %v1032_v7 = vcombine.high %v6851_v3, %v6851_v3 }
  0xfb   :  { %5249 = vmatpush3.bf16.msra.mxu0 %v5740_v6  ;;  %v5783_v6 = vld [vmem:[%s7196_s1 + $0x9b8] sm:$0xff]  }
  0xfc   :  { %5250 = vmatprep.subr.bf16.mxu0 %v5743_v9  ;;  %v5784_v9 = vld [vmem:[%s7196_s1 + $0x970] sm:$0xff]  }
  0xfd   :  { %5271 = vmatpush3.bf16.msra.mxu1 %v5742_v8  ;;  %v1061_v8 = vcombine.high %v1039_v1, %v1039_v1 }
  0xfe   :  { %5272 = vmatprep.subr.bf16.mxu1 %v5745_v11  ;;  %v1063_v11 = vcombine.high %v1053_v5, %v1053_v5 }
  0xff   :  { %5251 = vmatpush3.bf16.msra.mxu0 %v5744_v10 }
 0x100   :  { %5280 = vmatprep.subr.bf16.mxu0 %v5748_v14  ;;  %v5786_v14 = vld [vmem:[%s7196_s1 + $0x9f0] sm:$0xff]  }
 0x101   :  { %5273 = vmatpush3.bf16.msra.mxu1 %v5747_v12  ;;  %v5785_v12 = vld [vmem:[%s7196_s1 + $0x930] sm:$0xff]  }
 0x102   :  { %v4988_v20 = vpop.f32.mrf.mxu0  ;;  %4122 = vmatmul.mubr.bf16.vlgmr.msra.gmra.mxu0 %v997_v13  ;;  %5302 = vmatprep.subr.bf16.mxu1 %v5750_v16  ;;  %v1060_v13 = vrot.slane %v1032_v7, %v5996_v34 }
 0x103   :  { %5281 = vmatpush3.bf16.msra.mxu0 %v5749_v15  ;;  %4201 = vmatprep.mubr.bf16.mxu0 %v1053_v5 }
 0x104   :  { %v4989_v23 = vpop.f32.mrf.mxu0  ;;  %v5010_v24 = vpop.f32.mrf.mxu1  ;;  %4162 = vmatmul.mubr.bf16.vlgmr.msra.gmra.mxu1 %v1013_v18  ;;  %5282 = vmatprep.subr.bf16.mxu0 %v5752_v19  ;;  %v1064_v18 = vcombine.high %v1060_v13, %v1060_v13 }
 0x105   :  { %v4990_v26 = vadd.f32 %v4989_v23, %v4988_v20  ;;  %5303 = vmatpush3.bf16.msra.mxu1 %v5751_v17  ;;  %4241 = vmatprep.mubr.bf16.mxu1 %v1063_v11  ;;  %v5787_v17 = vld [vmem:[%s7196_s1 + $0x9b0] sm:$0xff]   ;;  %v5788_v20 = vld [vmem:[%s7196_s1 + $0x968] sm:$0xff]  }
 0x106   :  { %v4991_v28 = vpop.f32.mrf.mxu0  ;;  %v5011_v29 = vpop.f32.mrf.mxu1  ;;  %5304 = vmatprep.subr.bf16.mxu1 %v5754_v22  ;;  %v5789_v23 = vld [vmem:[%s7196_s1 + $0x928] sm:$0xff]  }
 0x107   :  { %v3644_v31 = vadd.f32 %v4990_v26, %v6676_v55  ;;  %v5012_v32 = vadd.f32 %v5011_v29, %v5010_v24  ;;  %5283 = vmatpush3.bf16.msra.mxu0 %v5753_v21  ;;  %v5775_v55 = vld [vmem:[%s7196_s1 + $0x888] sm:$0xff]  }
 0x108   :  { %v4992_v35 = vpop.f32.mrf.mxu0  ;;  %v5013_v37 = vpop.f32.mrf.mxu1  ;;  %5284 = vmatprep.subr.bf16.mxu0 %v5756_v27  ;;  %v5790_v26 = vld [vmem:[%s7196_s1 + $0x9e8] sm:$0xff]  }
 0x109   :  { %v6777_v38 = vadd.f32 %v5012_v32, %v3644_v31  ;;  %5305 = vmatpush3.bf16.msra.mxu1 %v5755_v25  ;;  %v5791_v28 = vld [vmem:[%s7196_s1 + $0x9a8] sm:$0xff]   ;;  %v5792_v31 = vld [vmem:[%s7196_s1 + $0x960] sm:$0xff]   ;;  %v5796_v37 = vld [vmem:[%s7196_s1 + $0x958] sm:$0xff]  }
 0x10a   :  { %v5014_v41 = vpop.f32.mrf.mxu1  ;;  %5306 = vmatprep.subr.bf16.mxu1 %v5758_v33  ;;  %v5793_v32 = vld [vmem:[%s7196_s1 + $0x920] sm:$0xff]   ;;  %v5824_v11 = vld [vmem:[%s7196_s1 + $0xaa8] sm:$0xff]  }
 0x10b   :  { %5285 = vmatpush3.bf16.msra.mxu0 %v5757_v30  ;;  %v5794_v35 = vld [vmem:[%s7196_s1 + $0x9e0] sm:$0xff]   ;;  %v5800_v41 = vld [vmem:[%s7196_s1 + $0x950] sm:$0xff]  }
 0x10c   :  { %5286 = vmatprep.subr.bf16.mxu0 %v5760_v39  ;;  %v5798_v39 = vld [vmem:[%s7196_s1 + $0x9d8] sm:$0xff]  }
 0x10d   :  { %5307 = vmatpush3.bf16.msra.mxu1 %v5759_v36  ;;  %v5795_v36 = vld [vmem:[%s7196_s1 + $0x9a0] sm:$0xff]  }
 0x10e   :  { %5308 = vmatprep.subr.bf16.mxu1 %v5762_v42  ;;  %v5801_v42 = vld [vmem:[%s7196_s1 + $0x910] sm:$0xff]  }
 0x10f   :  { %5287 = vmatpush3.bf16.msra.mxu0 %v5761_v40  ;;  %v5799_v40 = vld [vmem:[%s7196_s1 + $0x998] sm:$0xff]  }
 0x110   :  { %5288 = vmatprep.subr.bf16.mxu0 %v5764_v44  ;;  %v5803_v44 = vld [vmem:[%s7196_s1 + $0x990] sm:$0xff]  }
 0x111   :  { %5309 = vmatpush3.bf16.msra.mxu1 %v5763_v43  ;;  %v5802_v43 = vld [vmem:[%s7196_s1 + $0x9d0] sm:$0xff]  }
 0x112   :  { %5310 = vmatprep.subr.bf16.mxu1 %v5766_v46  ;;  %v5805_v46 = vld [vmem:[%s7196_s1 + $0x908] sm:$0xff]  }
 0x113   :  { %5289 = vmatpush3.bf16.msra.mxu0 %v5765_v45  ;;  %v5804_v45 = vld [vmem:[%s7196_s1 + $0x948] sm:$0xff]  }
 0x114   :  { %5290 = vmatprep.subr.bf16.mxu0 %v5768_v48  ;;  %v5807_v48 = vld [vmem:[%s7196_s1 + $0x988] sm:$0xff]  }
 0x115   :  { %5311 = vmatpush3.bf16.msra.mxu1 %v5767_v47  ;;  %v5806_v47 = vld [vmem:[%s7196_s1 + $0x9c8] sm:$0xff]  }
 0x116   :  { %5312 = vmatprep.subr.bf16.mxu1 %v5770_v50  ;;  %v5809_v50 = vld [vmem:[%s7196_s1 + $0x900] sm:$0xff]  }
 0x117   :  { %5291 = vmatpush3.bf16.msra.mxu0 %v5769_v49  ;;  %v5808_v49 = vld [vmem:[%s7196_s1 + $0x940] sm:$0xff]  }
 0x118   :  { %5292 = vmatprep.subr.bf16.mxu0 %v5772_v52  ;;  %v5812_v52 = vld [vmem:[%s7196_s1 + $0x980] sm:$0xff]  }
 0x119   :  { %5313 = vmatpush3.bf16.msra.mxu1 %v5771_v51  ;;  %v5810_v51 = vld [vmem:[%s7196_s1 + $0x9c0] sm:$0xff]  }
 0x11a   :  { %5314 = vmatprep.subr.bf16.mxu1 %v5774_v54  ;;  %v5813_v54 = vld [vmem:[%s7196_s1 + $0xa78] sm:$0xff]  }
 0x11b   :  { %5293 = vmatpush3.bf16.msra.mxu0 %v5773_v53  ;;  %v1046_v53 = vrot.slane %v6851_v3, %v5996_v34  ;;  %v5821_v3 = vld [vmem:[%s7196_s1 + $0xa68] sm:$0xff]  }
 0x11c   :  { %5294 = vmatprep.subr.bf16.mxu0 %v5776_v56  ;;  %v5815_v56 = vld [vmem:[%s7196_s1 + $0xaf8] sm:$0xff]  }
 0x11d   :  { %5315 = vmatpush3.bf16.msra.mxu1 %v5775_v55  ;;  %v5814_v55 = vld [vmem:[%s7196_s1 + $0xa38] sm:$0xff]  }
 0x11e   :  { %5316 = vmatprep.subr.bf16.mxu1 %v5778_v58  ;;  %v1062_v58 = vcombine.high %v1046_v53, %v1046_v53 }
 0x11f   :  { %5295 = vmatpush3.bf16.msra.mxu0 %v5777_v57  ;;  %v5816_v57 = vld [vmem:[%s7196_s1 + $0xab8] sm:$0xff]  }
 0x120   :  { %5324 = vmatprep.subr.bf16.mxu0 %v5780_v63 }
 0x121   :  { %5317 = vmatpush3.bf16.msra.mxu1 %v5779_v61  ;;  %v5818_v61 = vld [vmem:[%s7196_s1 + $0xa30] sm:$0xff]  }
 0x122   :  { %v5032_v10 = vpop.f32.mrf.mxu0  ;;  %4202 = vmatmul.mubr.bf16.vlgmr.msra.gmra.mxu0 %v1039_v1  ;;  %5346 = vmatprep.subr.bf16.mxu1 %v5782_v4  ;;  %v5820_v1 = vld [vmem:[%s7196_s1 + $0xab0] sm:$0xff]  }
 0x123   :  { %5325 = vmatpush3.bf16.msra.mxu0 %v5781_v2  ;;  %4281 = vmatprep.mubr.bf16.mxu0 %v1060_v13 }
 0x124   :  { %v5033_v15 = vpop.f32.mrf.mxu0  ;;  %v5054_v16 = vpop.f32.mrf.mxu1  ;;  %4242 = vmatmul.mubr.bf16.vlgmr.msra.gmra.mxu1 %v1061_v8  ;;  %5326 = vmatprep.subr.bf16.mxu0 %v5784_v9  ;;  %v5823_v9 = vld [vmem:[%s7196_s1 + $0xae8] sm:$0xff]  }
 0x125   :  { %v5034_v19 = vadd.f32 %v5033_v15, %v5032_v10  ;;  %5347 = vmatpush3.bf16.msra.mxu1 %v5783_v6  ;;  %4321 = vmatprep.mubr.bf16.mxu1 %v1064_v18  ;;  %v5822_v6 = vld [vmem:[%s7196_s1 + $0xa28] sm:$0xff]   ;;  %v5826_v15 = vld [vmem:[%s7196_s1 + $0xa20] sm:$0xff]  }
 0x126   :  { %v5035_v21 = vpop.f32.mrf.mxu0  ;;  %v5055_v22 = vpop.f32.mrf.mxu1  ;;  %5348 = vmatprep.subr.bf16.mxu1 %v5786_v14  ;;  %v5825_v14 = vld [vmem:[%s7196_s1 + $0xa60] sm:$0xff]  }
 0x127   :  { %v3724_v24 = vadd.f32 %v5034_v19, %v6777_v38  ;;  %v5056_v25 = vadd.f32 %v5055_v22, %v5054_v16  ;;  %5327 = vmatpush3.bf16.msra.mxu0 %v5785_v12  ;;  %v5797_v38 = vld [vmem:[%s7196_s1 + $0x918] sm:$0xff]   ;;  %v5828_v18 = vld [vmem:[%s7196_s1 + $0xaa0] sm:$0xff]  }
 0x128   :  { %v5036_v27 = vpop.f32.mrf.mxu0  ;;  %v5057_v29 = vpop.f32.mrf.mxu1  ;;  %5328 = vmatprep.subr.bf16.mxu0 %v5788_v20  ;;  %v5829_v19 = vld [vmem:[%s7196_s1 + $0xa58] sm:$0xff]  }
 0x129   :  { %v6888_v30 = vadd.f32 %v5056_v25, %v3724_v24  ;;  %5349 = vmatpush3.bf16.msra.mxu1 %v5787_v17  ;;  %v5827_v17 = vld [vmem:[%s7196_s1 + $0xae0] sm:$0xff]   ;;  %v5830_v20 = vld [vmem:[%s7196_s1 + $0xa18] sm:$0xff]   ;;  %v5834_v24 = vld [vmem:[%s7196_s1 + $0xa10] sm:$0xff]  }
 0x12a   :  { %v5058_v33 = vpop.f32.mrf.mxu1  ;;  %5350 = vmatprep.subr.bf16.mxu1 %v5790_v26  ;;  %v5831_v21 = vld [vmem:[%s7196_s1 + $0xad8] sm:$0xff]   ;;  %v5835_v25 = vld [vmem:[%s7196_s1 + $0xad0] sm:$0xff]   ;;  %v5837_v27 = vld [vmem:[%s7196_s1 + $0xa48] sm:$0xff]  }
 0x12b   :  { %5329 = vmatpush3.bf16.msra.mxu0 %v5789_v23  ;;  %v5832_v22 = vld [vmem:[%s7196_s1 + $0xa98] sm:$0xff]   ;;  %v5833_v23 = vld [vmem:[%s7196_s1 + $0xa50] sm:$0xff]   ;;  %v5839_v29 = vld [vmem:[%s7196_s1 + $0xac8] sm:$0xff]  }
 0x12c   :  { %5330 = vmatprep.subr.bf16.mxu0 %v5792_v31  ;;  %v5836_v26 = vld [vmem:[%s7196_s1 + $0xa90] sm:$0xff]   ;;  %v5841_v31 = vld [vmem:[%s7196_s1 + $0xa40] sm:$0xff]  }
 0x12d   :  { %5351 = vmatpush3.bf16.msra.mxu1 %v5791_v28  ;;  %v5838_v28 = vld [vmem:[%s7196_s1 + $0xa08] sm:$0xff]   ;;  %v5843_v33 = vld [vmem:[%s7196_s1 + $0xac0] sm:$0xff]  }
 0x12e   :  { %5352 = vmatprep.subr.bf16.mxu1 %v5794_v35  ;;  %v20_v35 = vld [vmem:[%s7197_s0 + $0x28] sm:$0xff] }
 0x12f   :  { %5331 = vmatpush3.bf16.msra.mxu0 %v5793_v32  ;;  %v5842_v32 = vld [vmem:[%s7196_s1 + $0xa00] sm:$0xff]  }
 0x130   :  { %5332 = vmatprep.subr.bf16.mxu0 %v5796_v37  ;;  %v5844_v37 = vld [vmem:[%s7196_s1 + $0xa80] sm:$0xff]  }
 0x131   :  { %5353 = vmatpush3.bf16.msra.mxu1 %v5795_v36  ;;  %v1072_v36 = vrot.slane %v20_v35, %v5996_v34 }
 0x132   :  { %5354 = vmatprep.subr.bf16.mxu1 %v5798_v39  ;;  %v5845_v39 = vld [vmem:[%s7196_s1 + $0xb78] sm:$0xff]  }
 0x133   :  { %5333 = vmatpush3.bf16.msra.mxu0 %v5797_v38  ;;  %v1065_v38 = vcombine.high %v20_v35, %v20_v35 }
 0x134   :  { %5334 = vmatprep.subr.bf16.mxu0 %v5800_v41  ;;  %v1088_v41 = vrot.slane %v1072_v36, %v5996_v34 }
 0x135   :  { %5355 = vmatpush3.bf16.msra.mxu1 %v5799_v40  ;;  %v1080_v40 = vcombine.high %v1072_v36, %v1072_v36 }
 0x136   :  { %5356 = vmatprep.subr.bf16.mxu1 %v5802_v43  ;;  %v5847_v43 = vld [vmem:[%s7196_s1 + $0xbf8] sm:$0xff]  }
 0x137   :  { %5335 = vmatpush3.bf16.msra.mxu0 %v5801_v42  ;;  %v7060_v42 = vrot.slane %v1065_v38, %v5996_v34 }
 0x138   :  { %5336 = vmatprep.subr.bf16.mxu0 %v5804_v45  ;;  %v5846_v45 = vld [vmem:[%s7196_s1 + $0xb38] sm:$0xff]  }
 0x139   :  { %5357 = vmatpush3.bf16.msra.mxu1 %v5803_v44  ;;  %v1102_v44 = vrot.slane %v1080_v40, %v5996_v34 }
 0x13a   :  { %5358 = vmatprep.subr.bf16.mxu1 %v5806_v47 }
 0x13b   :  { %5337 = vmatpush3.bf16.msra.mxu0 %v5805_v46  ;;  %v1081_v46 = vcombine.high %v7060_v42, %v7060_v42 }
 0x13c   :  { %5338 = vmatprep.subr.bf16.mxu0 %v5808_v49  ;;  %v5849_v49 = vld [vmem:[%s7196_s1 + $0xb70] sm:$0xff]  }
 0x13d   :  { %5359 = vmatpush3.bf16.msra.mxu1 %v5807_v48  ;;  %v1110_v48 = vcombine.high %v1088_v41, %v1088_v41 }
 0x13e   :  { %5360 = vmatprep.subr.bf16.mxu1 %v5810_v51  ;;  %v5848_v51 = vld [vmem:[%s7196_s1 + $0xbb8] sm:$0xff]  }
 0x13f   :  { %5339 = vmatpush3.bf16.msra.mxu0 %v5809_v50  ;;  %v1112_v50 = vcombine.high %v1102_v44, %v1102_v44 }
 0x140   :  { %5368 = vmatprep.subr.bf16.mxu0 %v5813_v54 }
 0x141   :  { %5361 = vmatpush3.bf16.msra.mxu1 %v5812_v52  ;;  %v1109_v52 = vrot.slane %v1081_v46, %v5996_v34 }
 0x142   :  { %v5076_v60 = vpop.f32.mrf.mxu0  ;;  %4282 = vmatmul.mubr.bf16.vlgmr.msra.gmra.mxu0 %v1046_v53  ;;  %5390 = vmatprep.subr.bf16.mxu1 %v5815_v56 }
 0x143   :  { %5369 = vmatpush3.bf16.msra.mxu0 %v5814_v55  ;;  %4361 = vmatprep.mubr.bf16.mxu0 %v1102_v44  ;;  %v5851_v55 = vld [vmem:[%s7196_s1 + $0xbf0] sm:$0xff]  }
 0x144   :  { %v5077_v63 = vpop.f32.mrf.mxu0  ;;  %v5098_v0 = vpop.f32.mrf.mxu1  ;;  %4322 = vmatmul.mubr.bf16.vlgmr.msra.gmra.mxu1 %v1062_v58  ;;  %5370 = vmatprep.subr.bf16.mxu0 %v5817_v59  ;;  %v1113_v58 = vcombine.high %v1109_v52, %v1109_v52 }
 0x145   :  { %v5078_v2 = vadd.f32 %v5077_v63, %v5076_v60  ;;  %5391 = vmatpush3.bf16.msra.mxu1 %v5816_v57  ;;  %4401 = vmatprep.mubr.bf16.mxu1 %v1112_v50  ;;  %v5850_v57 = vld [vmem:[%s7196_s1 + $0xb30] sm:$0xff]   ;;  %v5884_v50 = vld [vmem:[%s7196_s1 + $0xc08] sm:$0xff]  }
 0x146   :  { %v5079_v4 = vpop.f32.mrf.mxu0  ;;  %v5099_v5 = vpop.f32.mrf.mxu1  ;;  %5392 = vmatprep.subr.bf16.mxu1 %v5819_v62 }
 0x147   :  { %v3804_v7 = vadd.f32 %v5078_v2, %v6888_v30  ;;  %v5100_v8 = vadd.f32 %v5099_v5, %v5098_v0  ;;  %5371 = vmatpush3.bf16.msra.mxu0 %v5818_v61  ;;  %v5840_v30 = vld [vmem:[%s7196_s1 + $0xa88] sm:$0xff]   ;;  %v5852_v0 = vld [vmem:[%s7196_s1 + $0xbb0] sm:$0xff]  }
 0x148   :  { %v5080_v10 = vpop.f32.mrf.mxu0  ;;  %v5101_v12 = vpop.f32.mrf.mxu1  ;;  %5372 = vmatprep.subr.bf16.mxu0 %v5821_v3  ;;  %v5853_v61 = vld [vmem:[%s7196_s1 + $0xb68] sm:$0xff]  }
 0x149   :  { %v6989_v13 = vadd.f32 %v5100_v8, %v3804_v7  ;;  %5393 = vmatpush3.bf16.msra.mxu1 %v5820_v1  ;;  %v5855_v2 = vld [vmem:[%s7196_s1 + $0xbe8] sm:$0xff]   ;;  %v5858_v10 = vld [vmem:[%s7196_s1 + $0xb20] sm:$0xff]  }
 0x14a   :  { %v5102_v16 = vpop.f32.mrf.mxu1  ;;  %5394 = vmatprep.subr.bf16.mxu1 %v5823_v9  ;;  %v5854_v5 = vld [vmem:[%s7196_s1 + $0xb28] sm:$0xff]   ;;  %v5859_v9 = vld [vmem:[%s7196_s1 + $0xbe0] sm:$0xff]  }
 0x14b   :  { %5373 = vmatpush3.bf16.msra.mxu0 %v5822_v6  ;;  %v5857_v6 = vld [vmem:[%s7196_s1 + $0xb60] sm:$0xff]   ;;  %v5856_v8 = vld [vmem:[%s7196_s1 + $0xba8] sm:$0xff]   ;;  %v5864_v16 = vld [vmem:[%s7196_s1 + $0xb98] sm:$0xff]  }
 0x14c   :  { %5374 = vmatprep.subr.bf16.mxu0 %v5825_v14  ;;  %v5860_v12 = vld [vmem:[%s7196_s1 + $0xba0] sm:$0xff]   ;;  %v5862_v14 = vld [vmem:[%s7196_s1 + $0xb18] sm:$0xff]  }
 0x14d   :  { %5395 = vmatpush3.bf16.msra.mxu1 %v5824_v11  ;;  %v5861_v11 = vld [vmem:[%s7196_s1 + $0xb58] sm:$0xff]  }
 0x14e   :  { %5396 = vmatprep.subr.bf16.mxu1 %v5827_v17  ;;  %v5867_v17 = vld [vmem:[%s7196_s1 + $0xbd0] sm:$0xff]  }
 0x14f   :  { %5375 = vmatpush3.bf16.msra.mxu0 %v5826_v15  ;;  %v5865_v15 = vld [vmem:[%s7196_s1 + $0xb50] sm:$0xff]  }
 0x150   :  { %5376 = vmatprep.subr.bf16.mxu0 %v5829_v19  ;;  %v5869_v19 = vld [vmem:[%s7196_s1 + $0xb48] sm:$0xff]  }
 0x151   :  { %5397 = vmatpush3.bf16.msra.mxu1 %v5828_v18  ;;  %v5866_v18 = vld [vmem:[%s7196_s1 + $0xb10] sm:$0xff]  }
 0x152   :  { %5398 = vmatprep.subr.bf16.mxu1 %v5831_v21  ;;  %v5871_v21 = vld [vmem:[%s7196_s1 + $0xbc8] sm:$0xff]  }
 0x153   :  { %5377 = vmatpush3.bf16.msra.mxu0 %v5830_v20  ;;  %v5868_v20 = vld [vmem:[%s7196_s1 + $0xb90] sm:$0xff]  }
 0x154   :  { %5378 = vmatprep.subr.bf16.mxu0 %v5833_v23  ;;  %v5873_v23 = vld [vmem:[%s7196_s1 + $0xb40] sm:$0xff]  }
 0x155   :  { %5399 = vmatpush3.bf16.msra.mxu1 %v5832_v22  ;;  %v5870_v22 = vld [vmem:[%s7196_s1 + $0xb08] sm:$0xff]  }
 0x156   :  { %5400 = vmatprep.subr.bf16.mxu1 %v5835_v25  ;;  %v5875_v25 = vld [vmem:[%s7196_s1 + $0xbc0] sm:$0xff]  }
 0x157   :  { %5379 = vmatpush3.bf16.msra.mxu0 %v5834_v24  ;;  %v5872_v24 = vld [vmem:[%s7196_s1 + $0xb88] sm:$0xff]  }
 0x158   :  { %5380 = vmatprep.subr.bf16.mxu0 %v5837_v27  ;;  %v1095_v27 = vrot.slane %v7060_v42, %v5996_v34 }
 0x159   :  { %5401 = vmatpush3.bf16.msra.mxu1 %v5836_v26  ;;  %v5874_v26 = vld [vmem:[%s7196_s1 + $0xb00] sm:$0xff]  }
 0x15a   :  { %5402 = vmatprep.subr.bf16.mxu1 %v5839_v29  ;;  %v5878_v29 = vld [vmem:[%s7196_s1 + $0xc38] sm:$0xff]  }
 0x15b   :  { %5381 = vmatpush3.bf16.msra.mxu0 %v5838_v28  ;;  %v5877_v28 = vld [vmem:[%s7196_s1 + $0xb80] sm:$0xff]  }
 0x15c   :  { %5382 = vmatprep.subr.bf16.mxu0 %v5841_v31  ;;  %v5887_v31 = vmov 0.0  }
 0x15d   :  { %5403 = vmatpush3.bf16.msra.mxu1 %v5840_v30 }
 0x15e   :  { %5404 = vmatprep.subr.bf16.mxu1 %v5843_v33 }
 0x15f   :  { %5383 = vmatpush3.bf16.msra.mxu0 %v5842_v32  ;;  %v1111_v32 = vcombine.high %v1095_v27, %v1095_v27 }
 0x160   :  { %5412 = vmatprep.subr.bf16.mxu0 %v5845_v39 }
 0x161   :  { %5405 = vmatpush3.bf16.msra.mxu1 %v5844_v37  ;;  %v5879_v37 = vld [vmem:[%s7196_s1 + $0xc30] sm:$0xff]  }
 0x162   :  { %v5120_v47 = vpop.f32.mrf.mxu0  ;;  %5434 = vmatprep.subr.bf16.mxu1 %v5847_v43  ;;  %4362 = vmatmul.mubr.bf16.vlgmr.msra.gmra.mxu0 %v1088_v41 }
 0x163   :  { %5413 = vmatpush3.bf16.msra.mxu0 %v5846_v45  ;;  %4441 = vmatprep.mubr.bf16.mxu0 %v1109_v52  ;;  %v5880_v45 = vld [vmem:[%s7196_s1 + $0xc28] sm:$0xff]   ;;  %v4535_v52 = vld.sshfl [vmem:[%s7197_s0 + $0x30] sm:$0x1 pattern:$0x75316420] }
 0x164   :  { %v5121_v53 = vpop.f32.mrf.mxu0  ;;  %v5142_v54 = vpop.f32.mrf.mxu1  ;;  %4402 = vmatmul.mubr.bf16.vlgmr.msra.gmra.mxu1 %v1110_v48  ;;  %5414 = vmatprep.subr.bf16.mxu0 %v5849_v49  ;;  %v5882_v48 = vld [vmem:[%s7196_s1 + $0xc18] sm:$0xff]   ;;  %v5883_v49 = vld [vmem:[%s7196_s1 + $0xc10] sm:$0xff]  }
 0x165   :  { %v5122_v56 = vadd.f32 %v5121_v53, %v5120_v47  ;;  %5435 = vmatpush3.bf16.msra.mxu1 %v5848_v51  ;;  %4481 = vmatprep.mubr.bf16.mxu1 %v1113_v58  ;;  %v5881_v47 = vld [vmem:[%s7196_s1 + $0xc20] sm:$0xff]   ;;  %v1127_v53 = vrot.slane %v4535_v52, %v5996_v34 }
 0x166   :  { %v5123_v59 = vpop.f32.mrf.mxu0  ;;  %v5143_v60 = vpop.f32.mrf.mxu1  ;;  %5436 = vmatprep.subr.bf16.mxu1 %v5851_v55  ;;  %v5885_v51 = vld [vmem:[%s7196_s1 + $0xc00] sm:$0xff]  }
 0x167   :  { %v3884_v62 = vadd.f32 %v5122_v56, %v6989_v13  ;;  %v5144_v63 = vadd.f32 %v5143_v60, %v5142_v54  ;;  %5415 = vmatpush3.bf16.msra.mxu0 %v5850_v57  ;;  %v5863_v13 = vld [vmem:[%s7196_s1 + $0xbd8] sm:$0xff]  }
 0x168   :  { %v5124_v1 = vpop.f32.mrf.mxu0  ;;  %v5145_v3 = vpop.f32.mrf.mxu1  ;;  %5416 = vmatprep.subr.bf16.mxu0 %v5853_v61 }
 0x169   :  { %v7094_v4 = vadd.f32 %v5144_v63, %v3884_v62  ;;  %5437 = vmatpush3.bf16.msra.mxu1 %v5852_v0 }
 0x16a   :  { %v5146_v7 = vpop.f32.mrf.mxu1  ;;  %5438 = vmatprep.subr.bf16.mxu1 %v5855_v2 }
 0x16b   :  { %5417 = vmatpush3.bf16.msra.mxu0 %v5854_v5 }
 0x16c   :  { %5418 = vmatprep.subr.bf16.mxu0 %v5857_v6 }
 0x16d   :  { %5439 = vmatpush3.bf16.msra.mxu1 %v5856_v8 }
 0x16e   :  { %5440 = vmatprep.subr.bf16.mxu1 %v5859_v9 }
 0x16f   :  { %5419 = vmatpush3.bf16.msra.mxu0 %v5858_v10 }
 0x170   :  { %5420 = vmatprep.subr.bf16.mxu0 %v5861_v11 }
 0x171   :  { %5441 = vmatpush3.bf16.msra.mxu1 %v5860_v12 }
 0x172   :  { %5442 = vmatprep.subr.bf16.mxu1 %v5863_v13 }
 0x173   :  { %5421 = vmatpush3.bf16.msra.mxu0 %v5862_v14 }
 0x174   :  { %5422 = vmatprep.subr.bf16.mxu0 %v5865_v15 }
 0x175   :  { %5443 = vmatpush3.bf16.msra.mxu1 %v5864_v16 }
 0x176   :  { %5444 = vmatprep.subr.bf16.mxu1 %v5867_v17 }
 0x177   :  { %5423 = vmatpush3.bf16.msra.mxu0 %v5866_v18 }
 0x178   :  { %5424 = vmatprep.subr.bf16.mxu0 %v5869_v19 }
 0x179   :  { %5445 = vmatpush3.bf16.msra.mxu1 %v5868_v20 }
 0x17a   :  { %5446 = vmatprep.subr.bf16.mxu1 %v5871_v21 }
 0x17b   :  { %5425 = vmatpush3.bf16.msra.mxu0 %v5870_v22 }
 0x17c   :  { %5426 = vmatprep.subr.bf16.mxu0 %v5873_v23 }
 0x17d   :  { %5447 = vmatpush3.bf16.msra.mxu1 %v5872_v24 }
 0x17e   :  { %5448 = vmatprep.subr.bf16.mxu1 %v5875_v25 }
 0x17f   :  { %5427 = vmatpush3.bf16.msra.mxu0 %v5874_v26 }
 0x180   :  { %5465 = vmatprep.subr.bf16.mxu0 %v5887_v31 }
 0x181   :  { %5449 = vmatpush3.bf16.msra.mxu1 %v5877_v28 }
 0x182   :  { %v5164_v30 = vpop.f32.mrf.mxu0  ;;  %4442 = vmatmul.mubr.bf16.vlgmr.msra.gmra.mxu0 %v1095_v27 }
 0x183   :  { %5466 = vmatpush3.bf16.msra.mxu0 %v5878_v29  ;;  %5481 = vmatprep.mubr.msk.bf16.mxu0 %vm5888_vm0, %v5887_v31 }
 0x184   :  { %v5165_v33 = vpop.f32.mrf.mxu0  ;;  %v5186_v35 = vpop.f32.mrf.mxu1  ;;  %4482 = vmatmul.mubr.bf16.vlgmr.msra.gmra.mxu1 %v1111_v32  ;;  %5467 = vmatprep.subr.bf16.mxu0 %v5887_v31 }
 0x185   :  { %v5166_v36 = vadd.f32 %v5165_v33, %v5164_v30 }
 0x186   :  { %v5167_v38 = vpop.f32.mrf.mxu0  ;;  %v5187_v39 = vpop.f32.mrf.mxu1 }
 0x187   :  { %v3964_v40 = vadd.f32 %v5166_v36, %v7094_v4  ;;  %v5188_v41 = vadd.f32 %v5187_v39, %v5186_v35  ;;  %5468 = vmatpush3.bf16.msra.mxu0 %v5879_v37 }
 0x188   :  { %v5168_v42 = vpop.f32.mrf.mxu0  ;;  %v5189_v43 = vpop.f32.mrf.mxu1  ;;  %5469 = vmatprep.subr.bf16.mxu0 %v5887_v31 }
 0x189   :  { %v4004_v44 = vadd.f32 %v5188_v41, %v3964_v40 }
 0x18a   :  { %v5190_v46 = vpop.f32.mrf.mxu1 }
 0x18b   :  { %5470 = vmatpush3.bf16.msra.mxu0 %v5880_v45 }
 0x18c   :  { %5471 = vmatprep.subr.bf16.mxu0 %v5887_v31 }
 0x18f   :  { %5472 = vmatpush3.bf16.msra.mxu0 %v5881_v47 }
 0x190   :  { %5473 = vmatprep.subr.bf16.mxu0 %v5887_v31 }
 0x193   :  { %5474 = vmatpush3.bf16.msra.mxu0 %v5882_v48 }
 0x194   :  { %5475 = vmatprep.subr.bf16.mxu0 %v5887_v31 }
 0x197   :  { %5476 = vmatpush3.bf16.msra.mxu0 %v5883_v49 }
 0x198   :  { %5477 = vmatprep.subr.bf16.mxu0 %v5887_v31 }
 0x19b   :  { %5478 = vmatpush3.bf16.msra.mxu0 %v5884_v50 }
 0x19c   :  { %5479 = vmatprep.subr.bf16.mxu0 %v5887_v31 }
 0x19f   :  { %5480 = vmatpush3.bf16.msra.mxu0 %v5885_v51 }
 0x1a2   :  { %v5208_v54 = vpop.f32.mrf.mxu0  ;;  %5482 = vmatmul.mubr.bf16.vlgmr.msra.gmra.mxu0 %v1127_v53 }
 0x1a4   :  { %v5209_v55 = vpop.f32.mrf.mxu0  ;;  %v5230_v56 = vpop.f32.mrf.mxu1 }
 0x1a5   :  { %v5210_v57 = vadd.f32 %v5209_v55, %v5208_v54 }
 0x1a6   :  { %v5211_v58 = vpop.f32.mrf.mxu0  ;;  %v5231_v59 = vpop.f32.mrf.mxu1 }
 0x1a7   :  { %v4044_v60 = vadd.f32 %v5210_v57, %v4004_v44  ;;  %v5232_v61 = vadd.f32 %v5231_v59, %v5230_v56 }
 0x1a8   :  { %v5212_v62 = vpop.f32.mrf.mxu0  ;;  %v5233_v63 = vpop.f32.mrf.mxu1 }
 0x1a9   :  { %v4084_v0 = vadd.f32 %v5232_v61, %v4044_v60 }
 0x1aa   :  { %v5234_v1 = vpop.f32.mrf.mxu1 }
 0x1c2   :  { %v5252_v2 = vpop.f32.mrf.mxu0 }
 0x1c4   :  { %v5253_v3 = vpop.f32.mrf.mxu0  ;;  %v5274_v4 = vpop.f32.mrf.mxu1 }
 0x1c5   :  { %v5254_v5 = vadd.f32 %v5253_v3, %v5252_v2 }
 0x1c6   :  { %v5255_v6 = vpop.f32.mrf.mxu0  ;;  %v5275_v34 = vpop.f32.mrf.mxu1 }
 0x1c7   :  { %v4124_v7 = vadd.f32 %v5254_v5, %v4084_v0  ;;  %v5276_v8 = vadd.f32 %v5275_v34, %v5274_v4 }
 0x1c8   :  { %v5256_v9 = vpop.f32.mrf.mxu0  ;;  %v5277_v10 = vpop.f32.mrf.mxu1 }
 0x1c9   :  { %v4164_v11 = vadd.f32 %v5276_v8, %v4124_v7 }
 0x1ca   :  { %v5278_v12 = vpop.f32.mrf.mxu1 }
 0x1e2   :  { %v5296_v13 = vpop.f32.mrf.mxu0 }
 0x1e4   :  { %v5297_v14 = vpop.f32.mrf.mxu0  ;;  %v5318_v15 = vpop.f32.mrf.mxu1 }
 0x1e5   :  { %v5298_v16 = vadd.f32 %v5297_v14, %v5296_v13 }
 0x1e6   :  { %v5299_v17 = vpop.f32.mrf.mxu0  ;;  %v5319_v18 = vpop.f32.mrf.mxu1 }
 0x1e7   :  { %v4204_v19 = vadd.f32 %v5298_v16, %v4164_v11  ;;  %v5320_v20 = vadd.f32 %v5319_v18, %v5318_v15 }
 0x1e8   :  { %v5300_v21 = vpop.f32.mrf.mxu0  ;;  %v5321_v22 = vpop.f32.mrf.mxu1 }
 0x1e9   :  { %v4244_v23 = vadd.f32 %v5320_v20, %v4204_v19 }
 0x1ea   :  { %v5322_v24 = vpop.f32.mrf.mxu1 }
 0x202   :  { %v5340_v25 = vpop.f32.mrf.mxu0 }
 0x204   :  { %v5341_v26 = vpop.f32.mrf.mxu0  ;;  %v5362_v27 = vpop.f32.mrf.mxu1 }
 0x205   :  { %v5342_v28 = vadd.f32 %v5341_v26, %v5340_v25 }
 0x206   :  { %v5343_v29 = vpop.f32.mrf.mxu0  ;;  %v5363_v30 = vpop.f32.mrf.mxu1 }
 0x207   :  { %v4284_v31 = vadd.f32 %v5342_v28, %v4244_v23  ;;  %v5364_v32 = vadd.f32 %v5363_v30, %v5362_v27 }
 0x208   :  { %v5344_v33 = vpop.f32.mrf.mxu0  ;;  %v5365_v35 = vpop.f32.mrf.mxu1 }
 0x209   :  { %v4324_v36 = vadd.f32 %v5364_v32, %v4284_v31 }
 0x20a   :  { %v5366_v37 = vpop.f32.mrf.mxu1 }
 0x222   :  { %v5384_v38 = vpop.f32.mrf.mxu0 }
 0x224   :  { %v5385_v39 = vpop.f32.mrf.mxu0  ;;  %v5406_v40 = vpop.f32.mrf.mxu1 }
 0x225   :  { %v5386_v54 = vadd.f32 %v5385_v39, %v5384_v38 }
 0x226   :  { %v5387_v41 = vpop.f32.mrf.mxu0  ;;  %v5407_v42 = vpop.f32.mrf.mxu1 }
 0x227   :  { %v4364_v55 = vadd.f32 %v5386_v54, %v4324_v36  ;;  %v5408_v56 = vadd.f32 %v5407_v42, %v5406_v40 }
 0x228   :  { %v5388_v43 = vpop.f32.mrf.mxu0  ;;  %v5409_v44 = vpop.f32.mrf.mxu1 }
 0x229   :  { %v4404_v58 = vadd.f32 %v5408_v56, %v4364_v55 }
 0x22a   :  { %v5410_v45 = vpop.f32.mrf.mxu1 }
 0x242   :  { %v5428_v46 = vpop.f32.mrf.mxu0 }
 0x244   :  { %v5429_v47 = vpop.f32.mrf.mxu0  ;;  %v5450_v48 = vpop.f32.mrf.mxu1 }
 0x245   :  { %v5430_v57 = vadd.f32 %v5429_v47, %v5428_v46 }
 0x246   :  { %v5431_v49 = vpop.f32.mrf.mxu0  ;;  %v5451_v50 = vpop.f32.mrf.mxu1 }
 0x247   :  { %v4444_v59 = vadd.f32 %v5430_v57, %v4404_v58  ;;  %v5452_v60 = vadd.f32 %v5451_v50, %v5450_v48 }
 0x248   :  { %v5432_v51 = vpop.f32.mrf.mxu0  ;;  %v5453_v52 = vpop.f32.mrf.mxu1 }
 0x249   :  { %v4484_v61 = vadd.f32 %v5452_v60, %v4444_v59 }
 0x24a   :  { %v5454_v53 = vpop.f32.mrf.mxu1 }
 0x262   :  { %v4523_v62 = vpop.f32.mrf.mxu0 }
 0x263   :  { %v4524_v63 = vadd.f32 %v4523_v62, %v4484_v61 }
 0x264   :  { %v5483_v0 = vpop.f32.mrf.mxu0 }
 0x265   :  { %4529 = vst [vmem:[%s7199_s3] sm:$0x3] %v4524_v63 }
 0x266   :  { %v4526_v1 = vpop.f32.mrf.mxu0 }
 0x268   :  { %v5484_v2 = vpop.f32.mrf.mxu0 }

</bundles_post_ra>
